<compile_context>
chip_gen: v5e
topology: v5e:2x2
jax: 0.10.0
libtpu: 0.0.40
codegen_flags: <defaults>
</compile_context>

<pallas_src>
import functools

import jax
import jax.numpy as jnp
from jax.experimental import pallas as pl
from jax.experimental.pallas import tpu as pltpu


NUM_CLASSES = 11   # tiny stand-in for SSD's 91 COCO classes
NUM_ANCHORS = 4    # anchors per location per feature map

_VMEM_LIMIT = 32 * 1024 * 1024   # explicit: safe on v5e/v6e (128 MiB) and v7x (64 MiB)


def _round_up(x, m):
    return ((x + m - 1) // m) * m


def _divisor_tile(m, cap=256):
    """Largest tile (multiple of 8, dividing m) not exceeding cap; m itself if small."""
    if m <= cap:
        return m
    t = (cap // 8) * 8
    while t >= 8:
        if m % t == 0:
            return t
        t -= 8
    return None


# ----------------------------- Pallas kernels ------------------------------ #

def _conv_full_kernel(x_ref, w_ref, b_ref, o_ref, *, relu):
    """Full im2col conv tile: one deep matmul + fused bias (+ReLU).

    x_ref: (tm, KH*KW*Cin_p)   im2col patch rows (bf16)
    w_ref: (KH*KW*Cin_p, Cout) flattened weights (bf16)
    b_ref: (1, Cout)           bias (f32)
    o_ref: (tm, Cout)
    """
    acc = jnp.dot(x_ref[...], w_ref[...], preferred_element_type=jnp.float32)
    acc = acc + b_ref[...]
    if relu:
        acc = jnp.maximum(acc, 0.0)
    o_ref[...] = acc.astype(o_ref.dtype)


def _conv_rowshift_kernel(x_ref, w_ref, b_ref, o_ref, *, wo, tm, kh_count, relu):
    """Stride-1 conv tile via KH row-shifted matmuls over a KW-channel-concat slab.

    x_ref: (1, Hrows*Wo, KW*Cin_p)  per-image column-concat slab (resident across M tiles)
    w_ref: (KH, KW*Cin_p, Cout)     per-kh weight matrices (bf16)
    b_ref: (1, Cout)                bias (f32)
    o_ref: (1, tm, Cout)            output row tile
    """
    mi = pl.program_id(1)
    m0 = pl.multiple_of(mi * tm, tm)
    acc = None
    for kh in range(kh_count):
        lhs = x_ref[0, pl.ds(m0 + kh * wo, tm), :]            # (tm, KW*Cin_p) bf16
        part = jnp.dot(lhs, w_ref[kh], preferred_element_type=jnp.float32)
        acc = part if acc is None else acc + part
    acc = acc + b_ref[...]
    if relu:
        acc = jnp.maximum(acc, 0.0)
    o_ref[0] = acc.astype(o_ref.dtype)


# ------------------------------- Convolution -------------------------------- #

def conv2d(x, layer, stride=1, padding=1, relu=True, out_dtype=jnp.bfloat16, ksize=3):
    """NHWC 3x3 conv (PyTorch semantics), im2col fused into Pallas matmul kernels."""
    wk, b2 = layer                           # wk: (KH, KW*Cin_p, Cout) bf16 ; b2: (1, Cout) f32
    KH = KW = ksize
    N, H, W, Cin = x.shape
    _, KWC, Cout = wk.shape
    Cin_p = KWC // KW
    if Cin < Cin_p:                          # only the 3-channel network input needs this
        x = jnp.pad(x, ((0, 0), (0, 0), (0, 0), (0, Cin_p - Cin)))
    x = x.astype(jnp.bfloat16)

    s = stride
    Ho = (H + 2 * padding - KH) // s + 1
    Wo = (W + 2 * padding - KW) // s + 1
    M = Ho * Wo

    # Path choice: full 9-tap channel concat (deep K, one matmul/tile) for 64-channel or
    # tiny maps / strided convs; KW-only concat (3x fewer input bytes) for the larger,
    # narrow early layers.
    use_full = (s != 1) or (Cin_p >= 64) or (M <= 128)
    tm_b = None if use_full else _divisor_tile(M, 256)
    if tm_b is None:
        use_full = True

    if use_full:
        xp = jnp.pad(x, ((0, 0), (padding, padding), (padding, padding), (0, 0)))
        taps = []
        for kh in range(KH):
            for kw in range(KW):
                taps.append(xp[:, kh:kh + s * (Ho - 1) + 1:s,
                                kw:kw + s * (Wo - 1) + 1:s, :])   # (N, Ho, Wo, Cin_p)
        K = KH * KW * Cin_p
        xg = jnp.concatenate(taps, axis=-1).reshape(N * M, K)      # (N*M, K) bf16
        wf = wk.reshape(K, Cout)

        NM = N * M
        tm = min(256, _round_up(NM, 8))
        NMp = _round_up(NM, tm)
        if NMp > NM:                          # guard awkward row counts (pad, never unroll)
            xg = jnp.pad(xg, ((0, NMp - NM), (0, 0)))

        out = pl.pallas_call(
            functools.partial(_conv_full_kernel, relu=relu),
            out_shape=jax.ShapeDtypeStruct((NMp, Cout), out_dtype),
            grid=(NMp // tm,),
            in_specs=[
                pl.BlockSpec((tm, K), lambda i: (i, 0)),
                pl.BlockSpec((K, Cout), lambda i: (0, 0)),
                pl.BlockSpec((1, Cout), lambda i: (0, 0)),
            ],
            out_specs=pl.BlockSpec((tm, Cout), lambda i: (i, 0)),
            compiler_params=pltpu.CompilerParams(
                dimension_semantics=("parallel",),
                vmem_limit_bytes=_VMEM_LIMIT),
        )(xg, wf, b2)
        return out[:NM].reshape(N, Ho, Wo, Cout)

    # ---- stride-1 row-shift path (KW channel concat, KH matmuls per tile) ----
    Hrows = Ho + KH - 1                       # == H + 2*padding for stride 1
    Hp = H + 2 * padding
    extra_h = max(0, Hrows - Hp)
    xp = jnp.pad(x, ((0, 0), (padding, padding + extra_h), (padding, padding), (0, 0)))
    cols = [xp[:, :Hrows, kw:kw + Wo, :] for kw in range(KW)]      # each (N, Hrows, Wo, Cin_p)
    K3 = KW * Cin_p
    xg = jnp.concatenate(cols, axis=-1).reshape(N, Hrows * Wo, K3)  # (N, R, K3) bf16
    R = Hrows * Wo
    tm = tm_b

    out = pl.pallas_call(
        functools.partial(_conv_rowshift_kernel, wo=Wo, tm=tm, kh_count=KH, relu=relu),
        out_shape=jax.ShapeDtypeStruct((N, M, Cout), out_dtype),
        grid=(N, M // tm),
        in_specs=[
            pl.BlockSpec((1, R, K3), lambda n, mi: (n, 0, 0)),       # slab resident over M tiles
            pl.BlockSpec((KH, K3, Cout), lambda n, mi: (0, 0, 0)),
            pl.BlockSpec((1, Cout), lambda n, mi: (0, 0)),
        ],
        out_specs=pl.BlockSpec((1, tm, Cout), lambda n, mi: (n, mi, 0)),
        compiler_params=pltpu.CompilerParams(
            dimension_semantics=("parallel", "parallel"),
            vmem_limit_bytes=_VMEM_LIMIT),
    )(xg, wk, b2)
    return out.reshape(N, Ho, Wo, Cout)


def maxpool2x2(x):
    # NHWC 2x2 max pool (even H/W); XLA fuses this with the next conv's slab prep.
    N, H, W, C = x.shape
    return x.reshape(N, H // 2, 2, W // 2, 2, C).max(axis=(2, 4))


# ------------------------------- Parameters -------------------------------- #

def _conv_param(key, cout, cin, k):
    fan_in = cin * k * k
    w = jax.random.normal(key, (cout, cin, k, k), jnp.float32) / jnp.sqrt(float(fan_in))
    b = jnp.zeros((cout,), jnp.float32)
    return w, b


def init_params(key):
    ks = jax.random.split(key, 11)
    params = {
        "conv1": _conv_param(ks[0], 16, 3, 3),
        "conv2": _conv_param(ks[1], 32, 16, 3),
        "conv3": _conv_param(ks[2], 64, 32, 3),
        "conv4": _conv_param(ks[3], 64, 64, 3),   # extra feature layer (stride 2)
        "conv5": _conv_param(ks[4], 64, 64, 3),   # extra feature layer (stride 2)
    }
    for i in range(3):
        params[f"cls_head{i}"] = _conv_param(ks[5 + i], NUM_ANCHORS * NUM_CLASSES, 64, 3)
        params[f"reg_head{i}"] = _conv_param(ks[8 + i], NUM_ANCHORS * 4, 64, 3)
    return params


def _prep_conv(w, b, pad_cout_to=None):
    """PyTorch (Cout, Cin, KH, KW) -> (KH, KW*Cin_pad, Cout_pad) bf16, bias (1, Cout_pad) f32.

    The KW taps are concatenated along the contraction axis (matches the kernels' channel
    concat); the full-concat path just reshapes this to (KH*KW*Cin_pad, Cout_pad).
    """
    Cout, Cin, KH, KW = w.shape
    Cin_p = _round_up(Cin, 8)
    Cout_p = pad_cout_to if pad_cout_to is not None else Cout
    wt = jnp.transpose(w, (2, 3, 1, 0))                          # (KH, KW, Cin, Cout)
    wt = jnp.pad(wt, ((0, 0), (0, 0), (0, Cin_p - Cin), (0, Cout_p - Cout)))
    wk = wt.reshape(KH, KW * Cin_p, Cout_p).astype(jnp.bfloat16)
    b2 = jnp.pad(b, (0, Cout_p - Cout)).reshape(1, Cout_p).astype(jnp.float32)
    return wk, b2


def prepare_params(params):
    """Pad/transpose/cast weights once (not per forward call); fuse cls+reg heads."""
    prepared = {}
    for name in ("conv1", "conv2", "conv3", "conv4", "conv5"):
        prepared[name] = _prep_conv(*params[name])
    for i in range(3):
        wc, bc = params[f"cls_head{i}"]
        wr, br = params[f"reg_head{i}"]
        w = jnp.concatenate([wc, wr], axis=0)     # Cout = A*K + A*4 = 60, shared patches
        b = jnp.concatenate([bc, br], axis=0)
        prepared[f"head{i}"] = _prep_conv(w, b, pad_cout_to=64)   # lane-friendly 60 -> 64
    return prepared


# --------------------------------- Forward --------------------------------- #

def ssd_forward(prepared, x_nchw):
    x = jnp.transpose(x_nchw, (0, 2, 3, 1))        # single layout change: NCHW -> NHWC

    # VGG-lite backbone (bf16 activations, NHWC)
    h = conv2d(x, prepared["conv1"], relu=True)
    h = maxpool2x2(h)
    h = conv2d(h, prepared["conv2"], relu=True)
    h = maxpool2x2(h)
    f1 = conv2d(h, prepared["conv3"], relu=True)                 # (N, H/4,  W/4,  64)
    # extra SSD feature layers
    f2 = conv2d(f1, prepared["conv4"], stride=2, relu=True)      # (N, H/8,  W/8,  64)
    f3 = conv2d(f2, prepared["conv5"], stride=2, relu=True)      # (N, H/16, W/16, 64)

    cls_list, reg_list = [], []
    ak = NUM_ANCHORS * NUM_CLASSES
    for i, f in enumerate((f1, f2, f3)):
        # fused cls+reg head: one conv per feature map (Cout padded 60->64), bf16 store
        hout = conv2d(f, prepared[f"head{i}"], relu=False, out_dtype=jnp.bfloat16)
        N, Hf, Wf, _ = hout.shape
        # NHWC channels are (anchor-major, class-minor) = torchvision's
        # (N,A,K,H,W) -> (N,H,W,A,K) -> (N,HWA,K) permutation, so a plain reshape suffices.
        cls = hout[..., :ak].reshape(N, Hf * Wf * NUM_ANCHORS, NUM_CLASSES)
        reg = hout[..., ak:ak + NUM_ANCHORS * 4].reshape(N, Hf * Wf * NUM_ANCHORS, 4)
        cls_list.append(cls)
        reg_list.append(reg)

    cls_logits = jnp.concatenate(cls_list, axis=1).astype(jnp.float32)
    bbox_regression = jnp.concatenate(reg_list, axis=1).astype(jnp.float32)
    # TODO(synk): anchor generation + box decode + per-class NMS postprocess omitted.
    return {"bbox_regression": bbox_regression, "cls_logits": cls_logits}


if __name__ == "__main__":
    key = jax.random.PRNGKey(0)
    pkey, xkey = jax.random.split(key)
    params = init_params(pkey)
    prepared = prepare_params(params)
    x = jax.random.normal(xkey, (2, 3, 32, 32), jnp.float32)  # NCHW, like PyTorch

    fwd = jax.jit(ssd_forward)
    out = fwd(prepared, x)
    jax.block_until_ready(out)

    n_anchors = (8 * 8 + 4 * 4 + 2 * 2) * NUM_ANCHORS  # 336
    assert out["cls_logits"].shape == (2, n_anchors, NUM_CLASSES), out["cls_logits"].shape
    assert out["bbox_regression"].shape == (2, n_anchors, 4), out["bbox_regression"].shape
    assert jnp.all(jnp.isfinite(out["cls_logits"])) and jnp.all(jnp.isfinite(out["bbox_regression"]))
    print("KERNEL_OK")
</pallas_src>

<mosaic_0001>
module attributes {stable_mosaic.version = 11 : i64} {
  func.func @_conv_rowshift_kernel(%arg0: i32, %arg1: i32, %arg2: memref<1x1088x24xbf16, #tpu.memory_space<vmem>>, %arg3: memref<3x24x16xbf16, #tpu.memory_space<vmem>>, %arg4: memref<1x16xf32, #tpu.memory_space<vmem>>, %arg5: memref<1x256x16xbf16, #tpu.memory_space<vmem>>) attributes {dimension_semantics = [#tpu.dimension_semantics<parallel>, #tpu.dimension_semantics<parallel>], iteration_bounds = array<i64: 2, 4>, scalar_prefetch = 0 : i64, scratch_operands = 0 : i64, tpu.core_type = #tpu.core_type<tc>, window_params = [{transform_indices = @transform_0, window_bounds = array<i64: 1, 1088, 24>}, {pipeline_mode = #tpu.pipeline_mode<synchronous>, transform_indices = @transform_1, window_bounds = array<i64: 3, 24, 16>}, {pipeline_mode = #tpu.pipeline_mode<synchronous>, transform_indices = @transform_2, window_bounds = array<i64: 1, 16>}, {transform_indices = @transform_3, window_bounds = array<i64: 1, 256, 16>}]} {
    %c256_i32 = arith.constant 256 : i32
    %0 = arith.muli %arg1, %c256_i32 : i32
    %1 = tpu.assume_multiple %0, 256 : i32
    %c0_i32 = arith.constant 0 : i32
    %2 = arith.addi %1, %c0_i32 : i32
    %c0 = arith.constant 0 : index
    %3 = arith.index_cast %2 : i32 to index
    %c0_0 = arith.constant 0 : index
    %4 = vector.load %arg2[%c0, %3, %c0_0] : memref<1x1088x24xbf16, #tpu.memory_space<vmem>>, vector<1x256x24xbf16>
    %5 = vector.shape_cast %4 : vector<1x256x24xbf16> to vector<256x24xbf16>
    %c0_1 = arith.constant 0 : index
    %c0_2 = arith.constant 0 : index
    %c0_3 = arith.constant 0 : index
    %6 = vector.load %arg3[%c0_1, %c0_2, %c0_3] : memref<3x24x16xbf16, #tpu.memory_space<vmem>>, vector<1x24x16xbf16>
    %7 = vector.shape_cast %6 : vector<1x24x16xbf16> to vector<24x16xbf16>
    %cst = arith.constant dense<0.000000e+00> : vector<256x16xf32>
    %8 = tpu.matmul %5, %7, %cst {dimension_numbers = #tpu.dot_dimension_numbers<[1], [0], [0], [1], [0, 0, 1, 1], [], []>} : vector<256x24xbf16>, vector<24x16xbf16>, vector<256x16xf32> -> vector<256x16xf32>
    %c32_i32 = arith.constant 32 : i32
    %9 = arith.addi %1, %c32_i32 : i32
    %c0_4 = arith.constant 0 : index
    %10 = arith.index_cast %9 : i32 to index
    %c0_5 = arith.constant 0 : index
    %11 = vector.load %arg2[%c0_4, %10, %c0_5] : memref<1x1088x24xbf16, #tpu.memory_space<vmem>>, vector<1x256x24xbf16>
    %12 = vector.shape_cast %11 : vector<1x256x24xbf16> to vector<256x24xbf16>
    %c1 = arith.constant 1 : index
    %c0_6 = arith.constant 0 : index
    %c0_7 = arith.constant 0 : index
    %13 = vector.load %arg3[%c1, %c0_6, %c0_7] : memref<3x24x16xbf16, #tpu.memory_space<vmem>>, vector<1x24x16xbf16>
    %14 = vector.shape_cast %13 : vector<1x24x16xbf16> to vector<24x16xbf16>
    %cst_8 = arith.constant dense<0.000000e+00> : vector<256x16xf32>
    %15 = tpu.matmul %12, %14, %cst_8 {dimension_numbers = #tpu.dot_dimension_numbers<[1], [0], [0], [1], [0, 0, 1, 1], [], []>} : vector<256x24xbf16>, vector<24x16xbf16>, vector<256x16xf32> -> vector<256x16xf32>
    %16 = arith.addf %8, %15 : vector<256x16xf32>
    %c64_i32 = arith.constant 64 : i32
    %17 = arith.addi %1, %c64_i32 : i32
    %c0_9 = arith.constant 0 : index
    %18 = arith.index_cast %17 : i32 to index
    %c0_10 = arith.constant 0 : index
    %19 = vector.load %arg2[%c0_9, %18, %c0_10] : memref<1x1088x24xbf16, #tpu.memory_space<vmem>>, vector<1x256x24xbf16>
    %20 = vector.shape_cast %19 : vector<1x256x24xbf16> to vector<256x24xbf16>
    %c2 = arith.constant 2 : index
    %c0_11 = arith.constant 0 : index
    %c0_12 = arith.constant 0 : index
    %21 = vector.load %arg3[%c2, %c0_11, %c0_12] : memref<3x24x16xbf16, #tpu.memory_space<vmem>>, vector<1x24x16xbf16>
    %22 = vector.shape_cast %21 : vector<1x24x16xbf16> to vector<24x16xbf16>
    %cst_13 = arith.constant dense<0.000000e+00> : vector<256x16xf32>
    %23 = tpu.matmul %20, %22, %cst_13 {dimension_numbers = #tpu.dot_dimension_numbers<[1], [0], [0], [1], [0, 0, 1, 1], [], []>} : vector<256x24xbf16>, vector<24x16xbf16>, vector<256x16xf32> -> vector<256x16xf32>
    %24 = arith.addf %16, %23 : vector<256x16xf32>
    %c0_14 = arith.constant 0 : index
    %c0_15 = arith.constant 0 : index
    %25 = vector.load %arg4[%c0_14, %c0_15] : memref<1x16xf32, #tpu.memory_space<vmem>>, vector<1x16xf32>
    %26 = vector.broadcast %25 : vector<1x16xf32> to vector<256x16xf32>
    %27 = arith.addf %24, %26 : vector<256x16xf32>
    %cst_16 = arith.constant 0.000000e+00 : f32
    %28 = vector.broadcast %cst_16 : f32 to vector<256x16xf32>
    %29 = arith.maximumf %27, %28 : vector<256x16xf32>
    %30 = arith.truncf %29 : vector<256x16xf32> to vector<256x16xbf16>
    %c0_17 = arith.constant 0 : index
    %c0_18 = arith.constant 0 : index
    %c0_19 = arith.constant 0 : index
    %31 = vector.load %arg5[%c0_17, %c0_18, %c0_19] : memref<1x256x16xbf16, #tpu.memory_space<vmem>>, vector<1x256x16xbf16>
    %32 = vector.shape_cast %31 : vector<1x256x16xbf16> to vector<256x16xbf16>
    %33 = vector.shape_cast %30 : vector<256x16xbf16> to vector<1x256x16xbf16>
    tpu.vector_store %arg5[%c0_17, %c0_18, %c0_19], %33 {strides = array<i32>} : memref<1x256x16xbf16, #tpu.memory_space<vmem>>, vector<1x256x16xbf16>,
    return
  }
  func.func @transform_0(%arg0: i32, %arg1: i32) -> (i32, i32, i32) {
    %c0_i32 = arith.constant 0 : i32
    %c0_i32_0 = arith.constant 0 : i32
    %c0_i32_1 = arith.constant 0 : i32
    return %arg0, %c0_i32, %c0_i32_0 : i32, i32, i32
  }
  func.func @transform_1(%arg0: i32, %arg1: i32) -> (i32, i32, i32) {
    %c0_i32 = arith.constant 0 : i32
    %c0_i32_0 = arith.constant 0 : i32
    %c0_i32_1 = arith.constant 0 : i32
    %c0_i32_2 = arith.constant 0 : i32
    return %c0_i32, %c0_i32_0, %c0_i32_1 : i32, i32, i32
  }
  func.func @transform_2(%arg0: i32, %arg1: i32) -> (i32, i32) {
    %c0_i32 = arith.constant 0 : i32
    %c0_i32_0 = arith.constant 0 : i32
    %c0_i32_1 = arith.constant 0 : i32
    return %c0_i32, %c0_i32_0 : i32, i32
  }
  func.func @transform_3(%arg0: i32, %arg1: i32) -> (i32, i32, i32) {
    %c0_i32 = arith.constant 0 : i32
    %c0_i32_0 = arith.constant 0 : i32
    return %arg0, %arg1, %c0_i32 : i32, i32, i32
  }
}

module attributes {stable_mosaic.version = 11 : i64} {
  func.func @_conv_rowshift_kernel(%arg0: i32, %arg1: i32, %arg2: memref<1x288x48xbf16, #tpu.memory_space<vmem>>, %arg3: memref<3x48x32xbf16, #tpu.memory_space<vmem>>, %arg4: memref<1x32xf32, #tpu.memory_space<vmem>>, %arg5: memref<1x256x32xbf16, #tpu.memory_space<vmem>>) attributes {dimension_semantics = [#tpu.dimension_semantics<parallel>, #tpu.dimension_semantics<parallel>], iteration_bounds = array<i64: 2, 1>, scalar_prefetch = 0 : i64, scratch_operands = 0 : i64, tpu.core_type = #tpu.core_type<tc>, window_params = [{transform_indices = @transform_0, window_bounds = array<i64: 1, 288, 48>}, {pipeline_mode = #tpu.pipeline_mode<synchronous>, transform_indices = @transform_1, window_bounds = array<i64: 3, 48, 32>}, {pipeline_mode = #tpu.pipeline_mode<synchronous>, transform_indices = @transform_2, window_bounds = array<i64: 1, 32>}, {transform_indices = @transform_3, window_bounds = array<i64: 1, 256, 32>}]} {
    %c256_i32 = arith.constant 256 : i32
    %0 = arith.muli %arg1, %c256_i32 : i32
    %1 = tpu.assume_multiple %0, 256 : i32
    %c0_i32 = arith.constant 0 : i32
    %2 = arith.addi %1, %c0_i32 : i32
    %c0 = arith.constant 0 : index
    %3 = arith.index_cast %2 : i32 to index
    %c0_0 = arith.constant 0 : index
    %4 = vector.load %arg2[%c0, %3, %c0_0] : memref<1x288x48xbf16, #tpu.memory_space<vmem>>, vector<1x256x48xbf16>
    %5 = vector.shape_cast %4 : vector<1x256x48xbf16> to vector<256x48xbf16>
    %c0_1 = arith.constant 0 : index
    %c0_2 = arith.constant 0 : index
    %c0_3 = arith.constant 0 : index
    %6 = vector.load %arg3[%c0_1, %c0_2, %c0_3] : memref<3x48x32xbf16, #tpu.memory_space<vmem>>, vector<1x48x32xbf16>
    %7 = vector.shape_cast %6 : vector<1x48x32xbf16> to vector<48x32xbf16>
    %cst = arith.constant dense<0.000000e+00> : vector<256x32xf32>
    %8 = tpu.matmul %5, %7, %cst {dimension_numbers = #tpu.dot_dimension_numbers<[1], [0], [0], [1], [0, 0, 1, 1], [], []>} : vector<256x48xbf16>, vector<48x32xbf16>, vector<256x32xf32> -> vector<256x32xf32>
    %c16_i32 = arith.constant 16 : i32
    %9 = arith.addi %1, %c16_i32 : i32
    %c0_4 = arith.constant 0 : index
    %10 = arith.index_cast %9 : i32 to index
    %c0_5 = arith.constant 0 : index
    %11 = vector.load %arg2[%c0_4, %10, %c0_5] : memref<1x288x48xbf16, #tpu.memory_space<vmem>>, vector<1x256x48xbf16>
    %12 = vector.shape_cast %11 : vector<1x256x48xbf16> to vector<256x48xbf16>
    %c1 = arith.constant 1 : index
    %c0_6 = arith.constant 0 : index
    %c0_7 = arith.constant 0 : index
    %13 = vector.load %arg3[%c1, %c0_6, %c0_7] : memref<3x48x32xbf16, #tpu.memory_space<vmem>>, vector<1x48x32xbf16>
    %14 = vector.shape_cast %13 : vector<1x48x32xbf16> to vector<48x32xbf16>
    %cst_8 = arith.constant dense<0.000000e+00> : vector<256x32xf32>
    %15 = tpu.matmul %12, %14, %cst_8 {dimension_numbers = #tpu.dot_dimension_numbers<[1], [0], [0], [1], [0, 0, 1, 1], [], []>} : vector<256x48xbf16>, vector<48x32xbf16>, vector<256x32xf32> -> vector<256x32xf32>
    %16 = arith.addf %8, %15 : vector<256x32xf32>
    %c32_i32 = arith.constant 32 : i32
    %17 = arith.addi %1, %c32_i32 : i32
    %c0_9 = arith.constant 0 : index
    %18 = arith.index_cast %17 : i32 to index
    %c0_10 = arith.constant 0 : index
    %19 = vector.load %arg2[%c0_9, %18, %c0_10] : memref<1x288x48xbf16, #tpu.memory_space<vmem>>, vector<1x256x48xbf16>
    %20 = vector.shape_cast %19 : vector<1x256x48xbf16> to vector<256x48xbf16>
    %c2 = arith.constant 2 : index
    %c0_11 = arith.constant 0 : index
    %c0_12 = arith.constant 0 : index
    %21 = vector.load %arg3[%c2, %c0_11, %c0_12] : memref<3x48x32xbf16, #tpu.memory_space<vmem>>, vector<1x48x32xbf16>
    %22 = vector.shape_cast %21 : vector<1x48x32xbf16> to vector<48x32xbf16>
    %cst_13 = arith.constant dense<0.000000e+00> : vector<256x32xf32>
    %23 = tpu.matmul %20, %22, %cst_13 {dimension_numbers = #tpu.dot_dimension_numbers<[1], [0], [0], [1], [0, 0, 1, 1], [], []>} : vector<256x48xbf16>, vector<48x32xbf16>, vector<256x32xf32> -> vector<256x32xf32>
    %24 = arith.addf %16, %23 : vector<256x32xf32>
    %c0_14 = arith.constant 0 : index
    %c0_15 = arith.constant 0 : index
    %25 = vector.load %arg4[%c0_14, %c0_15] : memref<1x32xf32, #tpu.memory_space<vmem>>, vector<1x32xf32>
    %26 = vector.broadcast %25 : vector<1x32xf32> to vector<256x32xf32>
    %27 = arith.addf %24, %26 : vector<256x32xf32>
    %cst_16 = arith.constant 0.000000e+00 : f32
    %28 = vector.broadcast %cst_16 : f32 to vector<256x32xf32>
    %29 = arith.maximumf %27, %28 : vector<256x32xf32>
    %30 = arith.truncf %29 : vector<256x32xf32> to vector<256x32xbf16>
    %c0_17 = arith.constant 0 : index
    %c0_18 = arith.constant 0 : index
    %c0_19 = arith.constant 0 : index
    %31 = vector.load %arg5[%c0_17, %c0_18, %c0_19] : memref<1x256x32xbf16, #tpu.memory_space<vmem>>, vector<1x256x32xbf16>
    %32 = vector.shape_cast %31 : vector<1x256x32xbf16> to vector<256x32xbf16>
    %33 = vector.shape_cast %30 : vector<256x32xbf16> to vector<1x256x32xbf16>
    tpu.vector_store %arg5[%c0_17, %c0_18, %c0_19], %33 {strides = array<i32>} : memref<1x256x32xbf16, #tpu.memory_space<vmem>>, vector<1x256x32xbf16>,
    return
  }
  func.func @transform_0(%arg0: i32, %arg1: i32) -> (i32, i32, i32) {
    %c0_i32 = arith.constant 0 : i32
    %c0_i32_0 = arith.constant 0 : i32
    %c0_i32_1 = arith.constant 0 : i32
    return %arg0, %c0_i32, %c0_i32_0 : i32, i32, i32
  }
  func.func @transform_1(%arg0: i32, %arg1: i32) -> (i32, i32, i32) {
    %c0_i32 = arith.constant 0 : i32
    %c0_i32_0 = arith.constant 0 : i32
    %c0_i32_1 = arith.constant 0 : i32
    %c0_i32_2 = arith.constant 0 : i32
    return %c0_i32, %c0_i32_0, %c0_i32_1 : i32, i32, i32
  }
  func.func @transform_2(%arg0: i32, %arg1: i32) -> (i32, i32) {
    %c0_i32 = arith.constant 0 : i32
    %c0_i32_0 = arith.constant 0 : i32
    %c0_i32_1 = arith.constant 0 : i32
    return %c0_i32, %c0_i32_0 : i32, i32
  }
  func.func @transform_3(%arg0: i32, %arg1: i32) -> (i32, i32, i32) {
    %c0_i32 = arith.constant 0 : i32
    %c0_i32_0 = arith.constant 0 : i32
    return %arg0, %arg1, %c0_i32 : i32, i32, i32
  }
}

module attributes {stable_mosaic.version = 11 : i64} {
  func.func @_conv_full_kernel(%arg0: i32, %arg1: memref<128x288xbf16, #tpu.memory_space<vmem>>, %arg2: memref<288x64xbf16, #tpu.memory_space<vmem>>, %arg3: memref<1x64xf32, #tpu.memory_space<vmem>>, %arg4: memref<128x64xbf16, #tpu.memory_space<vmem>>) attributes {dimension_semantics = [#tpu.dimension_semantics<parallel>], iteration_bounds = array<i64: 1>, scalar_prefetch = 0 : i64, scratch_operands = 0 : i64, tpu.core_type = #tpu.core_type<tc>, window_params = [{transform_indices = @transform_0, window_bounds = array<i64: 128, 288>}, {pipeline_mode = #tpu.pipeline_mode<synchronous>, transform_indices = @transform_1, window_bounds = array<i64: 288, 64>}, {pipeline_mode = #tpu.pipeline_mode<synchronous>, transform_indices = @transform_2, window_bounds = array<i64: 1, 64>}, {transform_indices = @transform_3, window_bounds = array<i64: 128, 64>}]} {
    %c0 = arith.constant 0 : index
    %c0_0 = arith.constant 0 : index
    %0 = vector.load %arg1[%c0, %c0_0] : memref<128x288xbf16, #tpu.memory_space<vmem>>, vector<128x288xbf16>
    %c0_1 = arith.constant 0 : index
    %c0_2 = arith.constant 0 : index
    %1 = vector.load %arg2[%c0_1, %c0_2] : memref<288x64xbf16, #tpu.memory_space<vmem>>, vector<288x64xbf16>
    %cst = arith.constant dense<0.000000e+00> : vector<128x64xf32>
    %2 = tpu.matmul %0, %1, %cst {dimension_numbers = #tpu.dot_dimension_numbers<[1], [0], [0], [1], [0, 0, 1, 1], [], []>} : vector<128x288xbf16>, vector<288x64xbf16>, vector<128x64xf32> -> vector<128x64xf32>
    %c0_3 = arith.constant 0 : index
    %c0_4 = arith.constant 0 : index
    %3 = vector.load %arg3[%c0_3, %c0_4] : memref<1x64xf32, #tpu.memory_space<vmem>>, vector<1x64xf32>
    %4 = vector.broadcast %3 : vector<1x64xf32> to vector<128x64xf32>
    %5 = arith.addf %2, %4 : vector<128x64xf32>
    %cst_5 = arith.constant 0.000000e+00 : f32
    %6 = vector.broadcast %cst_5 : f32 to vector<128x64xf32>
    %7 = arith.maximumf %5, %6 : vector<128x64xf32>
    %8 = arith.truncf %7 : vector<128x64xf32> to vector<128x64xbf16>
    %c0_6 = arith.constant 0 : index
    %c0_7 = arith.constant 0 : index
    %9 = vector.load %arg4[%c0_6, %c0_7] : memref<128x64xbf16, #tpu.memory_space<vmem>>, vector<128x64xbf16>
    tpu.vector_store %arg4[%c0_6, %c0_7], %8 {strides = array<i32>} : memref<128x64xbf16, #tpu.memory_space<vmem>>, vector<128x64xbf16>,
    return
  }
  func.func @transform_0(%arg0: i32) -> (i32, i32) {
    %c0_i32 = arith.constant 0 : i32
    %c0_i32_0 = arith.constant 0 : i32
    return %arg0, %c0_i32 : i32, i32
  }
  func.func @transform_1(%arg0: i32) -> (i32, i32) {
    %c0_i32 = arith.constant 0 : i32
    %c0_i32_0 = arith.constant 0 : i32
    %c0_i32_1 = arith.constant 0 : i32
    return %c0_i32, %c0_i32_0 : i32, i32
  }
  func.func @transform_2(%arg0: i32) -> (i32, i32) {
    %c0_i32 = arith.constant 0 : i32
    %c0_i32_0 = arith.constant 0 : i32
    %c0_i32_1 = arith.constant 0 : i32
    return %c0_i32, %c0_i32_0 : i32, i32
  }
  func.func @transform_3(%arg0: i32) -> (i32, i32) {
    %c0_i32 = arith.constant 0 : i32
    %c0_i32_0 = arith.constant 0 : i32
    return %arg0, %c0_i32 : i32, i32
  }
}

module attributes {stable_mosaic.version = 11 : i64} {
  func.func @_conv_full_kernel(%arg0: i32, %arg1: memref<128x576xbf16, #tpu.memory_space<vmem>>, %arg2: memref<576x64xbf16, #tpu.memory_space<vmem>>, %arg3: memref<1x64xf32, #tpu.memory_space<vmem>>, %arg4: memref<128x64xbf16, #tpu.memory_space<vmem>>) attributes {dimension_semantics = [#tpu.dimension_semantics<parallel>], iteration_bounds = array<i64: 1>, scalar_prefetch = 0 : i64, scratch_operands = 0 : i64, tpu.core_type = #tpu.core_type<tc>, window_params = [{transform_indices = @transform_0, window_bounds = array<i64: 128, 576>}, {pipeline_mode = #tpu.pipeline_mode<synchronous>, transform_indices = @transform_1, window_bounds = array<i64: 576, 64>}, {pipeline_mode = #tpu.pipeline_mode<synchronous>, transform_indices = @transform_2, window_bounds = array<i64: 1, 64>}, {transform_indices = @transform_3, window_bounds = array<i64: 128, 64>}]} {
    %c0 = arith.constant 0 : index
    %c0_0 = arith.constant 0 : index
    %0 = vector.load %arg1[%c0, %c0_0] : memref<128x576xbf16, #tpu.memory_space<vmem>>, vector<128x576xbf16>
    %c0_1 = arith.constant 0 : index
    %c0_2 = arith.constant 0 : index
    %1 = vector.load %arg2[%c0_1, %c0_2] : memref<576x64xbf16, #tpu.memory_space<vmem>>, vector<576x64xbf16>
    %cst = arith.constant dense<0.000000e+00> : vector<128x64xf32>
    %2 = tpu.matmul %0, %1, %cst {dimension_numbers = #tpu.dot_dimension_numbers<[1], [0], [0], [1], [0, 0, 1, 1], [], []>} : vector<128x576xbf16>, vector<576x64xbf16>, vector<128x64xf32> -> vector<128x64xf32>
    %c0_3 = arith.constant 0 : index
    %c0_4 = arith.constant 0 : index
    %3 = vector.load %arg3[%c0_3, %c0_4] : memref<1x64xf32, #tpu.memory_space<vmem>>, vector<1x64xf32>
    %4 = vector.broadcast %3 : vector<1x64xf32> to vector<128x64xf32>
    %5 = arith.addf %2, %4 : vector<128x64xf32>
    %6 = arith.truncf %5 : vector<128x64xf32> to vector<128x64xbf16>
    %c0_5 = arith.constant 0 : index
    %c0_6 = arith.constant 0 : index
    %7 = vector.load %arg4[%c0_5, %c0_6] : memref<128x64xbf16, #tpu.memory_space<vmem>>, vector<128x64xbf16>
    tpu.vector_store %arg4[%c0_5, %c0_6], %6 {strides = array<i32>} : memref<128x64xbf16, #tpu.memory_space<vmem>>, vector<128x64xbf16>,
    return
  }
  func.func @transform_0(%arg0: i32) -> (i32, i32) {
    %c0_i32 = arith.constant 0 : i32
    %c0_i32_0 = arith.constant 0 : i32
    return %arg0, %c0_i32 : i32, i32
  }
  func.func @transform_1(%arg0: i32) -> (i32, i32) {
    %c0_i32 = arith.constant 0 : i32
    %c0_i32_0 = arith.constant 0 : i32
    %c0_i32_1 = arith.constant 0 : i32
    return %c0_i32, %c0_i32_0 : i32, i32
  }
  func.func @transform_2(%arg0: i32) -> (i32, i32) {
    %c0_i32 = arith.constant 0 : i32
    %c0_i32_0 = arith.constant 0 : i32
    %c0_i32_1 = arith.constant 0 : i32
    return %c0_i32, %c0_i32_0 : i32, i32
  }
  func.func @transform_3(%arg0: i32) -> (i32, i32) {
    %c0_i32 = arith.constant 0 : i32
    %c0_i32_0 = arith.constant 0 : i32
    return %arg0, %c0_i32 : i32, i32
  }
}

module attributes {stable_mosaic.version = 11 : i64} {
  func.func @_conv_full_kernel(%arg0: i32, %arg1: memref<32x576xbf16, #tpu.memory_space<vmem>>, %arg2: memref<576x64xbf16, #tpu.memory_space<vmem>>, %arg3: memref<1x64xf32, #tpu.memory_space<vmem>>, %arg4: memref<32x64xbf16, #tpu.memory_space<vmem>>) attributes {dimension_semantics = [#tpu.dimension_semantics<parallel>], iteration_bounds = array<i64: 1>, scalar_prefetch = 0 : i64, scratch_operands = 0 : i64, tpu.core_type = #tpu.core_type<tc>, window_params = [{transform_indices = @transform_0, window_bounds = array<i64: 32, 576>}, {pipeline_mode = #tpu.pipeline_mode<synchronous>, transform_indices = @transform_1, window_bounds = array<i64: 576, 64>}, {pipeline_mode = #tpu.pipeline_mode<synchronous>, transform_indices = @transform_2, window_bounds = array<i64: 1, 64>}, {transform_indices = @transform_3, window_bounds = array<i64: 32, 64>}]} {
    %c0 = arith.constant 0 : index
    %c0_0 = arith.constant 0 : index
    %0 = vector.load %arg1[%c0, %c0_0] : memref<32x576xbf16, #tpu.memory_space<vmem>>, vector<32x576xbf16>
    %c0_1 = arith.constant 0 : index
    %c0_2 = arith.constant 0 : index
    %1 = vector.load %arg2[%c0_1, %c0_2] : memref<576x64xbf16, #tpu.memory_space<vmem>>, vector<576x64xbf16>
    %cst = arith.constant dense<0.000000e+00> : vector<32x64xf32>
    %2 = tpu.matmul %0, %1, %cst {dimension_numbers = #tpu.dot_dimension_numbers<[1], [0], [0], [1], [0, 0, 1, 1], [], []>} : vector<32x576xbf16>, vector<576x64xbf16>, vector<32x64xf32> -> vector<32x64xf32>
    %c0_3 = arith.constant 0 : index
    %c0_4 = arith.constant 0 : index
    %3 = vector.load %arg3[%c0_3, %c0_4] : memref<1x64xf32, #tpu.memory_space<vmem>>, vector<1x64xf32>
    %4 = vector.broadcast %3 : vector<1x64xf32> to vector<32x64xf32>
    %5 = arith.addf %2, %4 : vector<32x64xf32>
    %cst_5 = arith.constant 0.000000e+00 : f32
    %6 = vector.broadcast %cst_5 : f32 to vector<32x64xf32>
    %7 = arith.maximumf %5, %6 : vector<32x64xf32>
    %8 = arith.truncf %7 : vector<32x64xf32> to vector<32x64xbf16>
    %c0_6 = arith.constant 0 : index
    %c0_7 = arith.constant 0 : index
    %9 = vector.load %arg4[%c0_6, %c0_7] : memref<32x64xbf16, #tpu.memory_space<vmem>>, vector<32x64xbf16>
    tpu.vector_store %arg4[%c0_6, %c0_7], %8 {strides = array<i32>} : memref<32x64xbf16, #tpu.memory_space<vmem>>, vector<32x64xbf16>,
    return
  }
  func.func @transform_0(%arg0: i32) -> (i32, i32) {
    %c0_i32 = arith.constant 0 : i32
    %c0_i32_0 = arith.constant 0 : i32
    return %arg0, %c0_i32 : i32, i32
  }
  func.func @transform_1(%arg0: i32) -> (i32, i32) {
    %c0_i32 = arith.constant 0 : i32
    %c0_i32_0 = arith.constant 0 : i32
    %c0_i32_1 = arith.constant 0 : i32
    return %c0_i32, %c0_i32_0 : i32, i32
  }
  func.func @transform_2(%arg0: i32) -> (i32, i32) {
    %c0_i32 = arith.constant 0 : i32
    %c0_i32_0 = arith.constant 0 : i32
    %c0_i32_1 = arith.constant 0 : i32
    return %c0_i32, %c0_i32_0 : i32, i32
  }
  func.func @transform_3(%arg0: i32) -> (i32, i32) {
    %c0_i32 = arith.constant 0 : i32
    %c0_i32_0 = arith.constant 0 : i32
    return %arg0, %c0_i32 : i32, i32
  }
}

module attributes {stable_mosaic.version = 11 : i64} {
  func.func @_conv_full_kernel(%arg0: i32, %arg1: memref<32x576xbf16, #tpu.memory_space<vmem>>, %arg2: memref<576x64xbf16, #tpu.memory_space<vmem>>, %arg3: memref<1x64xf32, #tpu.memory_space<vmem>>, %arg4: memref<32x64xbf16, #tpu.memory_space<vmem>>) attributes {dimension_semantics = [#tpu.dimension_semantics<parallel>], iteration_bounds = array<i64: 1>, scalar_prefetch = 0 : i64, scratch_operands = 0 : i64, tpu.core_type = #tpu.core_type<tc>, window_params = [{transform_indices = @transform_0, window_bounds = array<i64: 32, 576>}, {pipeline_mode = #tpu.pipeline_mode<synchronous>, transform_indices = @transform_1, window_bounds = array<i64: 576, 64>}, {pipeline_mode = #tpu.pipeline_mode<synchronous>, transform_indices = @transform_2, window_bounds = array<i64: 1, 64>}, {transform_indices = @transform_3, window_bounds = array<i64: 32, 64>}]} {
    %c0 = arith.constant 0 : index
    %c0_0 = arith.constant 0 : index
    %0 = vector.load %arg1[%c0, %c0_0] : memref<32x576xbf16, #tpu.memory_space<vmem>>, vector<32x576xbf16>
    %c0_1 = arith.constant 0 : index
    %c0_2 = arith.constant 0 : index
    %1 = vector.load %arg2[%c0_1, %c0_2] : memref<576x64xbf16, #tpu.memory_space<vmem>>, vector<576x64xbf16>
    %cst = arith.constant dense<0.000000e+00> : vector<32x64xf32>
    %2 = tpu.matmul %0, %1, %cst {dimension_numbers = #tpu.dot_dimension_numbers<[1], [0], [0], [1], [0, 0, 1, 1], [], []>} : vector<32x576xbf16>, vector<576x64xbf16>, vector<32x64xf32> -> vector<32x64xf32>
    %c0_3 = arith.constant 0 : index
    %c0_4 = arith.constant 0 : index
    %3 = vector.load %arg3[%c0_3, %c0_4] : memref<1x64xf32, #tpu.memory_space<vmem>>, vector<1x64xf32>
    %4 = vector.broadcast %3 : vector<1x64xf32> to vector<32x64xf32>
    %5 = arith.addf %2, %4 : vector<32x64xf32>
    %6 = arith.truncf %5 : vector<32x64xf32> to vector<32x64xbf16>
    %c0_5 = arith.constant 0 : index
    %c0_6 = arith.constant 0 : index
    %7 = vector.load %arg4[%c0_5, %c0_6] : memref<32x64xbf16, #tpu.memory_space<vmem>>, vector<32x64xbf16>
    tpu.vector_store %arg4[%c0_5, %c0_6], %6 {strides = array<i32>} : memref<32x64xbf16, #tpu.memory_space<vmem>>, vector<32x64xbf16>,
    return
  }
  func.func @transform_0(%arg0: i32) -> (i32, i32) {
    %c0_i32 = arith.constant 0 : i32
    %c0_i32_0 = arith.constant 0 : i32
    return %arg0, %c0_i32 : i32, i32
  }
  func.func @transform_1(%arg0: i32) -> (i32, i32) {
    %c0_i32 = arith.constant 0 : i32
    %c0_i32_0 = arith.constant 0 : i32
    %c0_i32_1 = arith.constant 0 : i32
    return %c0_i32, %c0_i32_0 : i32, i32
  }
  func.func @transform_2(%arg0: i32) -> (i32, i32) {
    %c0_i32 = arith.constant 0 : i32
    %c0_i32_0 = arith.constant 0 : i32
    %c0_i32_1 = arith.constant 0 : i32
    return %c0_i32, %c0_i32_0 : i32, i32
  }
  func.func @transform_3(%arg0: i32) -> (i32, i32) {
    %c0_i32 = arith.constant 0 : i32
    %c0_i32_0 = arith.constant 0 : i32
    return %arg0, %c0_i32 : i32, i32
  }
}

module attributes {stable_mosaic.version = 11 : i64} {
  func.func @_conv_full_kernel(%arg0: i32, %arg1: memref<8x576xbf16, #tpu.memory_space<vmem>>, %arg2: memref<576x64xbf16, #tpu.memory_space<vmem>>, %arg3: memref<1x64xf32, #tpu.memory_space<vmem>>, %arg4: memref<8x64xbf16, #tpu.memory_space<vmem>>) attributes {dimension_semantics = [#tpu.dimension_semantics<parallel>], iteration_bounds = array<i64: 1>, scalar_prefetch = 0 : i64, scratch_operands = 0 : i64, tpu.core_type = #tpu.core_type<tc>, window_params = [{transform_indices = @transform_0, window_bounds = array<i64: 8, 576>}, {pipeline_mode = #tpu.pipeline_mode<synchronous>, transform_indices = @transform_1, window_bounds = array<i64: 576, 64>}, {pipeline_mode = #tpu.pipeline_mode<synchronous>, transform_indices = @transform_2, window_bounds = array<i64: 1, 64>}, {transform_indices = @transform_3, window_bounds = array<i64: 8, 64>}]} {
    %c0 = arith.constant 0 : index
    %c0_0 = arith.constant 0 : index
    %0 = vector.load %arg1[%c0, %c0_0] : memref<8x576xbf16, #tpu.memory_space<vmem>>, vector<8x576xbf16>
    %c0_1 = arith.constant 0 : index
    %c0_2 = arith.constant 0 : index
    %1 = vector.load %arg2[%c0_1, %c0_2] : memref<576x64xbf16, #tpu.memory_space<vmem>>, vector<576x64xbf16>
    %cst = arith.constant dense<0.000000e+00> : vector<8x64xf32>
    %2 = tpu.matmul %0, %1, %cst {dimension_numbers = #tpu.dot_dimension_numbers<[1], [0], [0], [1], [0, 0, 1, 1], [], []>} : vector<8x576xbf16>, vector<576x64xbf16>, vector<8x64xf32> -> vector<8x64xf32>
    %c0_3 = arith.constant 0 : index
    %c0_4 = arith.constant 0 : index
    %3 = vector.load %arg3[%c0_3, %c0_4] : memref<1x64xf32, #tpu.memory_space<vmem>>, vector<1x64xf32>
    %4 = vector.broadcast %3 : vector<1x64xf32> to vector<8x64xf32>
    %5 = arith.addf %2, %4 : vector<8x64xf32>
    %cst_5 = arith.constant 0.000000e+00 : f32
    %6 = vector.broadcast %cst_5 : f32 to vector<8x64xf32>
    %7 = arith.maximumf %5, %6 : vector<8x64xf32>
    %8 = arith.truncf %7 : vector<8x64xf32> to vector<8x64xbf16>
    %c0_6 = arith.constant 0 : index
    %c0_7 = arith.constant 0 : index
    %9 = vector.load %arg4[%c0_6, %c0_7] : memref<8x64xbf16, #tpu.memory_space<vmem>>, vector<8x64xbf16>
    tpu.vector_store %arg4[%c0_6, %c0_7], %8 {strides = array<i32>} : memref<8x64xbf16, #tpu.memory_space<vmem>>, vector<8x64xbf16>,
    return
  }
  func.func @transform_0(%arg0: i32) -> (i32, i32) {
    %c0_i32 = arith.constant 0 : i32
    %c0_i32_0 = arith.constant 0 : i32
    return %arg0, %c0_i32 : i32, i32
  }
  func.func @transform_1(%arg0: i32) -> (i32, i32) {
    %c0_i32 = arith.constant 0 : i32
    %c0_i32_0 = arith.constant 0 : i32
    %c0_i32_1 = arith.constant 0 : i32
    return %c0_i32, %c0_i32_0 : i32, i32
  }
  func.func @transform_2(%arg0: i32) -> (i32, i32) {
    %c0_i32 = arith.constant 0 : i32
    %c0_i32_0 = arith.constant 0 : i32
    %c0_i32_1 = arith.constant 0 : i32
    return %c0_i32, %c0_i32_0 : i32, i32
  }
  func.func @transform_3(%arg0: i32) -> (i32, i32) {
    %c0_i32 = arith.constant 0 : i32
    %c0_i32_0 = arith.constant 0 : i32
    return %arg0, %c0_i32 : i32, i32
  }
}

module attributes {stable_mosaic.version = 11 : i64} {
  func.func @_conv_full_kernel(%arg0: i32, %arg1: memref<8x576xbf16, #tpu.memory_space<vmem>>, %arg2: memref<576x64xbf16, #tpu.memory_space<vmem>>, %arg3: memref<1x64xf32, #tpu.memory_space<vmem>>, %arg4: memref<8x64xbf16, #tpu.memory_space<vmem>>) attributes {dimension_semantics = [#tpu.dimension_semantics<parallel>], iteration_bounds = array<i64: 1>, scalar_prefetch = 0 : i64, scratch_operands = 0 : i64, tpu.core_type = #tpu.core_type<tc>, window_params = [{transform_indices = @transform_0, window_bounds = array<i64: 8, 576>}, {pipeline_mode = #tpu.pipeline_mode<synchronous>, transform_indices = @transform_1, window_bounds = array<i64: 576, 64>}, {pipeline_mode = #tpu.pipeline_mode<synchronous>, transform_indices = @transform_2, window_bounds = array<i64: 1, 64>}, {transform_indices = @transform_3, window_bounds = array<i64: 8, 64>}]} {
    %c0 = arith.constant 0 : index
    %c0_0 = arith.constant 0 : index
    %0 = vector.load %arg1[%c0, %c0_0] : memref<8x576xbf16, #tpu.memory_space<vmem>>, vector<8x576xbf16>
    %c0_1 = arith.constant 0 : index
    %c0_2 = arith.constant 0 : index
    %1 = vector.load %arg2[%c0_1, %c0_2] : memref<576x64xbf16, #tpu.memory_space<vmem>>, vector<576x64xbf16>
    %cst = arith.constant dense<0.000000e+00> : vector<8x64xf32>
    %2 = tpu.matmul %0, %1, %cst {dimension_numbers = #tpu.dot_dimension_numbers<[1], [0], [0], [1], [0, 0, 1, 1], [], []>} : vector<8x576xbf16>, vector<576x64xbf16>, vector<8x64xf32> -> vector<8x64xf32>
    %c0_3 = arith.constant 0 : index
    %c0_4 = arith.constant 0 : index
    %3 = vector.load %arg3[%c0_3, %c0_4] : memref<1x64xf32, #tpu.memory_space<vmem>>, vector<1x64xf32>
    %4 = vector.broadcast %3 : vector<1x64xf32> to vector<8x64xf32>
    %5 = arith.addf %2, %4 : vector<8x64xf32>
    %6 = arith.truncf %5 : vector<8x64xf32> to vector<8x64xbf16>
    %c0_5 = arith.constant 0 : index
    %c0_6 = arith.constant 0 : index
    %7 = vector.load %arg4[%c0_5, %c0_6] : memref<8x64xbf16, #tpu.memory_space<vmem>>, vector<8x64xbf16>
    tpu.vector_store %arg4[%c0_5, %c0_6], %6 {strides = array<i32>} : memref<8x64xbf16, #tpu.memory_space<vmem>>, vector<8x64xbf16>,
    return
  }
  func.func @transform_0(%arg0: i32) -> (i32, i32) {
    %c0_i32 = arith.constant 0 : i32
    %c0_i32_0 = arith.constant 0 : i32
    return %arg0, %c0_i32 : i32, i32
  }
  func.func @transform_1(%arg0: i32) -> (i32, i32) {
    %c0_i32 = arith.constant 0 : i32
    %c0_i32_0 = arith.constant 0 : i32
    %c0_i32_1 = arith.constant 0 : i32
    return %c0_i32, %c0_i32_0 : i32, i32
  }
  func.func @transform_2(%arg0: i32) -> (i32, i32) {
    %c0_i32 = arith.constant 0 : i32
    %c0_i32_0 = arith.constant 0 : i32
    %c0_i32_1 = arith.constant 0 : i32
    return %c0_i32, %c0_i32_0 : i32, i32
  }
  func.func @transform_3(%arg0: i32) -> (i32, i32) {
    %c0_i32 = arith.constant 0 : i32
    %c0_i32_0 = arith.constant 0 : i32
    return %arg0, %c0_i32 : i32, i32
  }
}

</mosaic_0001>

<bundles_post_ra>
// kernel: ssd_forward.8
= control target key start
LH: loop header
LB: loop body
LE: loop exit
PB: predicated region body
PF: predicated region fallthrough
CT: control target
= control target key end

     0   :  { %s1693_s12 = smov 0   ;;  %s1695_s13 = smov 0   ;;  %s2026_s0 = inlined_call_operand.vmem [shape: bf16[2,1088,24], index: 0, kind: input, shape index: {}]   ;;  %s2027_s1 = inlined_call_operand.vmem [shape: bf16[3,24,16], index: 1, kind: input, shape index: {}]   ;;  %s2028_s2 = inlined_call_operand.vmem [shape: f32[1,16], index: 2, kind: input, shape index: {}]   ;;  %s2029_s3 = inlined_call_operand.vmem [shape: bf16[2,1024,16], index: 3, kind: output, shape index: {}]  }
   0x1   :  { %s1697_s14 = smov 0   ;;  %s1699_s15 = smov 0  }
   0x2   :  { %s1701_s16 = smov 0  }
   0x3 LB: > { %s22_s17 = sadd.s32 1, %s1663_s14  ;;  %s25_s18 = sadd.s32 1, %s1667_s15  ;;  %s1671_s16 = sphi %s1701_s16, %s13_s16   ;;  %s1667_s15 = sphi %s1699_s15, %s2033_s15   ;;  %s1663_s14 = sphi %s1697_s14, %s2032_s14   ;;  %s1659_s13 = sphi %s1695_s13, %s2031_s13   ;;  %s1655_s12 = sphi %s1693_s12, %s2030_s12  }
   0x4   : > { %p23_p0 = scmp.ge.s32.totalorder %s22_s17, 4  ;;  %p1265_p1 = scmp.ge.s32.totalorder %s1671_s16, 1 }
   0x5   : > { %p151_p2 = scmp.lt.s32.totalorder %s1671_s16, 9 }
   0x6   : > { %s2035_s17 = smov (%p23_p0, %s22_s17), 0  ;;  %s2037_s18 = smov (!%p23_p0, %s25_s18), %s1667_s15 }
   0x7   : > { %p152_p3 = pnand %p1265_p1, %p151_p2  ;;  %p27_p4 = scmp.ge.s32.totalorder %s2037_s18, 2 }
   0x8   : > { %p179_p5 = scmp.lt.s32.totalorder (!%p152_p3), %s1659_s13, 1  ;;  %s1270_s25 = sshll.u32 (!%p152_p3), %s1655_s12, 8 }
   0x9   : > { %s2039_s18 = smov (%p27_p4, %s2037_s18), 0  ;;  %155 = sbr.rel (%p152_p3) target bundleno = 354 (0x162), region = 32 }
   0xa   : > { %s235_s26 = sadd.s32 (!%p152_p3), 32, %s1270_s25  ;;  %s196_s27 = sshra.s32 (!%p152_p3), %s1270_s25, 3 }
   0xb   : > { %s236_s28 = sshra.s32 (!%p152_p3), %s235_s26, 3  ;;  %s1271_s29 = sshll.u32 (!%p152_p3), %s196_s27, 2 }
   0xc   : > { %s1272_s4 = sshll.u32 (!%p152_p3), %s236_s28, 2  ;;  %s736_s7 = sadd.s32 (!%p152_p3), 64, %s1270_s25 }
   0xd   : > { %s737_s22 = sshra.s32 (!%p152_p3), %s736_s7, 3  ;;  %s1267_s27 = sshll.u32 (!%p152_p3), %s1655_s12, 5 }
   0xe   : > { %v1275_v0 = vld [vmem:[%s2027_s1 + $0x14] sm:$0xf]  ;;  %v234_v1 = vld [vmem:[%s2027_s1 + $0x8] sm:$0xf]  ;;  %v1447_v4 = vld [vmem:[%s2027_s1 + $0x20] sm:$0xf] }
   0xf   : > { %v361_v2 = vunpack.c.l.b16 %v1275_v0  ;;  %v592_v3 = vunpack.c.l.b16 %v234_v1  ;;  %vm414_vm0 = vcmask 1043456   ;;  %v862_v5 = vunpack.c.l.b16 %v1447_v4  ;;  %s2041_s13 = smov (!%p179_p5, %s1659_s13), 1  ;;  %v1567_v12 = vld [vmem:[%s2027_s1 + $0xc] sm:$0xff]  ;;  %v1550_v13 = vld [vmem:[%s2027_s1] sm:$0xff]  ;;  %v1584_v14 = vld [vmem:[%s2027_s1 + $0x18] sm:$0xff]  ;;  %s1444_s25 = sshll.u32 %s737_s22, 2 }
  0x10   : > { %s1591_s30 = smul.u32 544, %s2041_s13  ;;  %vm365_vm1 = vcmask 195584   ;;  %p187_p6 = scmp.lt.s32.totalorder %s1267_s27, 127  ;;  %v1838_v55 = vld [vmem:[%s2028_s2] ss:$0 sm:$0xff]  ;;  %vm1138_vm2 = vcmask 125952  }
  0x11   : > { %v363_v6 = vpack.c.b16 %v361_v2, %v361_v2  ;;  %v594_v7 = vpack.c.b16 %v592_v3, %v592_v3  ;;  %v864_v8 = vpack.c.b16 %v862_v5, %v862_v5  ;;  %s1268_s28 = sshll.u32 %s2041_s13, 7 }
  0x12   : > { %s183_s21 = scalar_lea.vmem %s2026_s0, %s1591_s30  ;;  %s2043_s27 = smov (!%p187_p6, %s1267_s27), 127 }
  0x13   : > { %v416_v9 = vsel %vm414_vm0, %v363_v6, 0  ;;  %v645_v10 = vsel %vm414_vm0, %v594_v7, 0  ;;  %v915_v11 = vsel %vm414_vm0, %v864_v8, 0  ;;  %s1753_s23 = scalar_lea.vmem %s183_s21, %s1272_s4  ;;  %s1755_s24 = scalar_lea.vmem %s183_s21, %s1271_s29 }
  0x14   : > { %424 = vmatpush.bf16.msra.mxu0 %v416_v9  ;;  %1585 = vmatpush.bf16.msra.mxu3 %v416_v9  ;;  %v1551_v15 = vld [vmem:[%s1753_s23] sm:$0xff]  ;;  %s1760_s26 = scalar_lea.vmem %s183_s21, %s1444_s25  ;;  %v1552_v19 = vld [vmem:[%s1753_s23 + $0x8] sm:$0xff]  ;;  %v1553_v23 = vld [vmem:[%s1753_s23 + $0x10] sm:$0xff]  ;;  %s190_s30 = sadd.s32 %s1268_s28, %s2043_s27 }
  0x15   : > { %653 = vmatpush.bf16.msra.mxu1 %v645_v10  ;;  %923 = vmatpush.bf16.msra.mxu2 %v915_v11  ;;  %v1563_v16 = vld [vmem:[%s1753_s23 + $0x60] sm:$0xff]  ;;  %v1564_v20 = vld [vmem:[%s1753_s23 + $0x68] sm:$0xff]  ;;  %v1565_v24 = vld [vmem:[%s1753_s23 + $0x70] sm:$0xff]  ;;  %s1269_s4 = sshll.u32 %s190_s30, 2 }
  0x16   : > { %v1534_v17 = vld [vmem:[%s1755_s24] sm:$0xff]  ;;  %v1535_v21 = vld [vmem:[%s1755_s24 + $0x8] sm:$0xff]  ;;  %v1536_v25 = vld [vmem:[%s1755_s24 + $0x10] sm:$0xff]  ;;  %s1844_s6 = scalar_lea.vmem %s2029_s3, %s1269_s4 }
  0x17   : > { %v1568_v18 = vld [vmem:[%s1760_s26] sm:$0xff]  ;;  %v1569_v22 = vld [vmem:[%s1760_s26 + $0x8] sm:$0xff]  ;;  %v1570_v26 = vld [vmem:[%s1760_s26 + $0x10] sm:$0xff] }
  0x18   : > { %425 = vmatpush.bf16.msra.mxu0 %v1567_v12  ;;  %1586 = vmatpush.bf16.msra.mxu3 %v1567_v12  ;;  %v1554_v27 = vld [vmem:[%s1753_s23 + $0x18] sm:$0xff]  ;;  %v1555_v31 = vld [vmem:[%s1753_s23 + $0x20] sm:$0xff]  ;;  %v1556_v35 = vld [vmem:[%s1753_s23 + $0x28] sm:$0xff] }
  0x19   : > { %654 = vmatpush.bf16.msra.mxu1 %v1550_v13  ;;  %924 = vmatpush.bf16.msra.mxu2 %v1584_v14  ;;  %v1566_v28 = vld [vmem:[%s1753_s23 + $0x78] sm:$0xff]  ;;  %v1546_v32 = vld [vmem:[%s1755_s24 + $0x60] sm:$0xff]  ;;  %v1547_v36 = vld [vmem:[%s1755_s24 + $0x68] sm:$0xff] }
  0x1a   : > { %v1537_v29 = vld [vmem:[%s1755_s24 + $0x18] sm:$0xff]  ;;  %v1538_v33 = vld [vmem:[%s1755_s24 + $0x20] sm:$0xff]  ;;  %v1539_v37 = vld [vmem:[%s1755_s24 + $0x28] sm:$0xff] }
  0x1b   : > { %1344 = vmatmul.msk.bf16.vlgmr.msra.gmra.mxu0 %vm365_vm1, %v1551_v15  ;;  %1356 = vmatmul.msk.bf16.vlgmr.msra.gmra.mxu3 %vm365_vm1, %v1563_v16  ;;  %v1571_v30 = vld [vmem:[%s1760_s26 + $0x18] sm:$0xff]  ;;  %v1572_v34 = vld [vmem:[%s1760_s26 + $0x20] sm:$0xff]  ;;  %v1573_v38 = vld [vmem:[%s1760_s26 + $0x28] sm:$0xff] }
  0x1c   : > { %1587 = vmatpush.bf16.msrb.mxu3 %v645_v10  ;;  %1428 = vmatmul.msk.bf16.vlgmr.msra.gmra.mxu1 %vm365_vm1, %v1534_v17  ;;  %v1557_v39 = vld [vmem:[%s1753_s23 + $0x30] sm:$0xff]  ;;  %v1558_v43 = vld [vmem:[%s1753_s23 + $0x38] sm:$0xff]  ;;  %v1559_v47 = vld [vmem:[%s1753_s23 + $0x40] sm:$0xff] }
  0x1d   : > { %1516 = vmatmul.msk.bf16.vlgmr.msra.gmra.mxu2 %vm365_vm1, %v1568_v18  ;;  %v1548_v40 = vld [vmem:[%s1755_s24 + $0x70] sm:$0xff]  ;;  %v1549_v44 = vld [vmem:[%s1755_s24 + $0x78] sm:$0xff]  ;;  %v1580_v48 = vld [vmem:[%s1760_s26 + $0x60] sm:$0xff] }
  0x1e   : > { %v1540_v41 = vld [vmem:[%s1755_s24 + $0x30] sm:$0xff]  ;;  %v1541_v45 = vld [vmem:[%s1755_s24 + $0x38] sm:$0xff]  ;;  %v1542_v50 = vld [vmem:[%s1755_s24 + $0x40] sm:$0xff] }
  0x1f   : > { %v1574_v42 = vld [vmem:[%s1760_s26 + $0x30] sm:$0xff]  ;;  %v1575_v46 = vld [vmem:[%s1760_s26 + $0x38] sm:$0xff]  ;;  %v1576_v51 = vld [vmem:[%s1760_s26 + $0x40] sm:$0xff] }
  0x20   : > { %1588 = vmatpush.bf16.msrb.mxu3 %v1550_v13  ;;  %v1560_v2 = vld [vmem:[%s1753_s23 + $0x48] sm:$0xff] }
  0x21   : > { %v1581_v3 = vld [vmem:[%s1760_s26 + $0x68] sm:$0xff] }
  0x22   : > { %v1543_v6 = vld [vmem:[%s1755_s24 + $0x48] sm:$0xff] }
  0x23   : > { %v1577_v7 = vld [vmem:[%s1760_s26 + $0x48] sm:$0xff] }
  0x24   : > { %1589 = vmatpush.bf16.msra.mxu3 %v915_v11 }
  0x28   : > { %1590 = vmatpush.bf16.msra.mxu3 %v1584_v14 }
  0x2b   : > { %1345 = vmatmul.msk.bf16.gmra.mxu0 %vm365_vm1, %v1552_v19  ;;  %1357 = vmatmul.msk.bf16.gmra.mxu3 %vm365_vm1, %v1564_v20 }
  0x2c   : > { %1429 = vmatmul.msk.bf16.gmra.mxu1 %vm365_vm1, %v1535_v21 }
  0x2d   : > { %1517 = vmatmul.msk.bf16.gmra.mxu2 %vm365_vm1, %v1569_v22 }
  0x3b   : > { %1346 = vmatmul.msk.bf16.gmra.mxu0 %vm365_vm1, %v1553_v23  ;;  %1358 = vmatmul.msk.bf16.gmra.mxu3 %vm365_vm1, %v1565_v24  ;;  %v1561_v24 = vld [vmem:[%s1753_s23 + $0x50] sm:$0xff] }
  0x3c   : > { %1430 = vmatmul.msk.bf16.gmra.mxu1 %vm365_vm1, %v1536_v25  ;;  %v1582_v25 = vld [vmem:[%s1760_s26 + $0x70] sm:$0xff] }
  0x3d   : > { %1518 = vmatmul.msk.bf16.gmra.mxu2 %vm365_vm1, %v1570_v26 }
  0x4b   : > { %1347 = vmatmul.msk.bf16.gmra.mxu0 %vm365_vm1, %v1554_v27  ;;  %1359 = vmatmul.msk.bf16.gmra.mxu3 %vm365_vm1, %v1566_v28  ;;  %v1544_v28 = vld [vmem:[%s1755_s24 + $0x50] sm:$0xff] }
  0x4c   : > { %1431 = vmatmul.msk.bf16.gmra.mxu1 %vm365_vm1, %v1537_v29  ;;  %v1578_v29 = vld [vmem:[%s1760_s26 + $0x50] sm:$0xff] }
  0x4d   : > { %1519 = vmatmul.msk.bf16.gmra.mxu2 %vm365_vm1, %v1571_v30 }
  0x5b   : > { %1348 = vmatmul.msk.bf16.gmra.mxu0 %vm365_vm1, %v1555_v31  ;;  %1440 = vmatmul.msk.bf16.vlgmr.msrb.gmra.mxu3 %vm365_vm1, %v1546_v32 }
  0x5c   : > { %1432 = vmatmul.msk.bf16.gmra.mxu1 %vm365_vm1, %v1538_v33 }
  0x5d   : > { %1520 = vmatmul.msk.bf16.gmra.mxu2 %vm365_vm1, %v1572_v34 }
  0x6b   : > { %1349 = vmatmul.msk.bf16.gmra.mxu0 %vm365_vm1, %v1556_v35  ;;  %1441 = vmatmul.msk.bf16.gmra.mxu3 %vm365_vm1, %v1547_v36 }
  0x6c   : > { %1433 = vmatmul.msk.bf16.gmra.mxu1 %vm365_vm1, %v1539_v37 }
  0x6d   : > { %1521 = vmatmul.msk.bf16.gmra.mxu2 %vm365_vm1, %v1573_v38 }
  0x7b   : > { %1350 = vmatmul.msk.bf16.gmra.mxu0 %vm365_vm1, %v1557_v39  ;;  %1442 = vmatmul.msk.bf16.gmra.mxu3 %vm365_vm1, %v1548_v40 }
  0x7c   : > { %1434 = vmatmul.msk.bf16.gmra.mxu1 %vm365_vm1, %v1540_v41 }
  0x7d   : > { %1522 = vmatmul.msk.bf16.gmra.mxu2 %vm365_vm1, %v1574_v42 }
  0x8b   : > { %1351 = vmatmul.msk.bf16.gmra.mxu0 %vm365_vm1, %v1558_v43  ;;  %1443 = vmatmul.msk.bf16.gmra.mxu3 %vm365_vm1, %v1549_v44 }
  0x8c   : > { %1435 = vmatmul.msk.bf16.gmra.mxu1 %vm365_vm1, %v1541_v45 }
  0x8d   : > { %1523 = vmatmul.msk.bf16.gmra.mxu2 %vm365_vm1, %v1575_v46  ;;  %v1562_v46 = vld [vmem:[%s1753_s23 + $0x58] sm:$0xff] }
  0x98   : > { %v427_v49 = vpop.f32.mrf.mxu0 }
  0x99   : > { %v656_v52 = vpop.f32.mrf.mxu1 }
  0x9a   : > { %v657_v53 = vadd.f32 %v656_v52, %v427_v49 }
  0x9b   : > { %1352 = vmatmul.msk.bf16.gmra.mxu0 %vm365_vm1, %v1559_v47  ;;  %1528 = vmatmul.msk.bf16.vlgmr.msra.gmra.mxu3 %vm365_vm1, %v1580_v48  ;;  %v1583_v47 = vld [vmem:[%s1760_s26 + $0x78] sm:$0xff] }
  0x9c   : > { %1436 = vmatmul.msk.bf16.gmra.mxu1 %vm365_vm1, %v1542_v50  ;;  %v1545_v50 = vld [vmem:[%s1755_s24 + $0x58] sm:$0xff] }
  0x9d   : > { %1524 = vmatmul.msk.bf16.gmra.mxu2 %vm365_vm1, %v1576_v51  ;;  %v1579_v51 = vld [vmem:[%s1760_s26 + $0x58] sm:$0xff] }
  0x9e   : > { %v1833_v54 = vpop.f32.mrf.mxu3 }
  0xa0   : > { %v926_v56 = vpop.f32.mrf.mxu2  ;;  %v429_v58 = vpop.f32.mrf.mxu0 }
  0xa1   : > { %v1006_v57 = vadd.f32 %v926_v56, %v657_v53  ;;  %v658_v59 = vpop.f32.mrf.mxu1 }
  0xa2   : > { %v659_v63 = vadd.f32 %v658_v59, %v429_v58 }
  0xa3   : > { %v1042_v60 = vadd.f32 %v1838_v55, %v1006_v57 }
  0xa5   : > { %v1074_v61 = vmax.f32 %v1042_v60, 0.0 }
  0xa6   : > { %v1846_v0 = vpop.f32.mrf.mxu3 }
  0xa7   : > { %v1106_v62 = vpack.c.bf16 %v1074_v61, %v1074_v61 }
  0xa8   : > { %v928_v1 = vpop.f32.mrf.mxu2  ;;  %v432_v5 = vpop.f32.mrf.mxu0 }
  0xa9   : > { %1139 = vst.msk [vmem:[%s1844_s6] sm:$0xf] %vm1138_vm2, %v1106_v62  ;;  %v1007_v4 = vadd.f32 %v928_v1, %v659_v63  ;;  %v661_v8 = vpop.f32.mrf.mxu1 }
  0xaa   : > { %v662_v11 = vadd.f32 %v661_v8, %v432_v5 }
  0xab   : > { %v1043_v9 = vadd.f32 %v1838_v55, %v1007_v4  ;;  %1353 = vmatmul.msk.bf16.gmra.mxu0 %vm365_vm1, %v1560_v2  ;;  %1529 = vmatmul.msk.bf16.gmra.mxu3 %vm365_vm1, %v1581_v3 }
  0xac   : > { %1437 = vmatmul.msk.bf16.gmra.mxu1 %vm365_vm1, %v1543_v6 }
  0xad   : > { %v1075_v10 = vmax.f32 %v1043_v9, 0.0  ;;  %1525 = vmatmul.msk.bf16.gmra.mxu2 %vm365_vm1, %v1577_v7 }
  0xae   : > { %v1859_v13 = vpop.f32.mrf.mxu3 }
  0xaf   : > { %v1107_v12 = vpack.c.bf16 %v1075_v10, %v1075_v10 }
  0xb0   : > { %v931_v14 = vpop.f32.mrf.mxu2  ;;  %v434_v16 = vpop.f32.mrf.mxu0 }
  0xb1   : > { %1140 = vst.msk [vmem:[%s1844_s6 + $0x4] sm:$0xf] %vm1138_vm2, %v1107_v12  ;;  %v1008_v15 = vadd.f32 %v931_v14, %v662_v11  ;;  %v663_v17 = vpop.f32.mrf.mxu1 }
  0xb2   : > { %v664_v21 = vadd.f32 %v663_v17, %v434_v16 }
  0xb3   : > { %v1044_v18 = vadd.f32 %v1838_v55, %v1008_v15 }
  0xb5   : > { %v1076_v19 = vmax.f32 %v1044_v18, 0.0 }
  0xb6   : > { %v1864_v22 = vpop.f32.mrf.mxu3 }
  0xb7   : > { %v1108_v20 = vpack.c.bf16 %v1076_v19, %v1076_v19 }
  0xb8   : > { %v933_v23 = vpop.f32.mrf.mxu2  ;;  %v437_v27 = vpop.f32.mrf.mxu0 }
  0xb9   : > { %1141 = vst.msk [vmem:[%s1844_s6 + $0x8] sm:$0xf] %vm1138_vm2, %v1108_v20  ;;  %v1009_v26 = vadd.f32 %v933_v23, %v664_v21  ;;  %v666_v30 = vpop.f32.mrf.mxu1 }
  0xba   : > { %v667_v33 = vadd.f32 %v666_v30, %v437_v27 }
  0xbb   : > { %v1045_v31 = vadd.f32 %v1838_v55, %v1009_v26  ;;  %1354 = vmatmul.msk.bf16.gmra.mxu0 %vm365_vm1, %v1561_v24  ;;  %1530 = vmatmul.msk.bf16.gmra.mxu3 %vm365_vm1, %v1582_v25 }
  0xbc   : > { %1438 = vmatmul.msk.bf16.gmra.mxu1 %vm365_vm1, %v1544_v28 }
  0xbd   : > { %v1077_v32 = vmax.f32 %v1045_v31, 0.0  ;;  %1526 = vmatmul.msk.bf16.gmra.mxu2 %vm365_vm1, %v1578_v29 }
  0xbe   : > { %v1877_v35 = vpop.f32.mrf.mxu3 }
  0xbf   : > { %v1109_v34 = vpack.c.bf16 %v1077_v32, %v1077_v32 }
  0xc0   : > { %v936_v36 = vpop.f32.mrf.mxu2  ;;  %v439_v38 = vpop.f32.mrf.mxu0 }
  0xc1   : > { %1142 = vst.msk [vmem:[%s1844_s6 + $0xc] sm:$0xf] %vm1138_vm2, %v1109_v34  ;;  %v1010_v37 = vadd.f32 %v936_v36, %v667_v33  ;;  %v668_v39 = vpop.f32.mrf.mxu1 }
  0xc2   : > { %v669_v43 = vadd.f32 %v668_v39, %v439_v38 }
  0xc3   : > { %v1046_v40 = vadd.f32 %v1838_v55, %v1010_v37 }
  0xc5   : > { %v1078_v41 = vmax.f32 %v1046_v40, 0.0 }
  0xc6   : > { %v1882_v44 = vpop.f32.mrf.mxu3 }
  0xc7   : > { %v1110_v42 = vpack.c.bf16 %v1078_v41, %v1078_v41 }
  0xc8   : > { %v938_v45 = vpop.f32.mrf.mxu2  ;;  %v442_v49 = vpop.f32.mrf.mxu0 }
  0xc9   : > { %1143 = vst.msk [vmem:[%s1844_s6 + $0x10] sm:$0xf] %vm1138_vm2, %v1110_v42  ;;  %v1011_v48 = vadd.f32 %v938_v45, %v669_v43  ;;  %v671_v52 = vpop.f32.mrf.mxu1 }
  0xca   : > { %v672_v57 = vadd.f32 %v671_v52, %v442_v49 }
  0xcb   : > { %v1047_v53 = vadd.f32 %v1838_v55, %v1011_v48  ;;  %1355 = vmatmul.msk.bf16.gmra.mxu0 %vm365_vm1, %v1562_v46  ;;  %1531 = vmatmul.msk.bf16.gmra.mxu3 %vm365_vm1, %v1583_v47 }
  0xcc   : > { %1439 = vmatmul.msk.bf16.gmra.mxu1 %vm365_vm1, %v1545_v50 }
  0xcd   : > { %v1079_v56 = vmax.f32 %v1047_v53, 0.0  ;;  %1527 = vmatmul.msk.bf16.gmra.mxu2 %vm365_vm1, %v1579_v51 }
  0xce   : > { %v1895_v59 = vpop.f32.mrf.mxu3 }
  0xcf   : > { %v1111_v58 = vpack.c.bf16 %v1079_v56, %v1079_v56 }
  0xd0   : > { %v941_v60 = vpop.f32.mrf.mxu2  ;;  %v444_v62 = vpop.f32.mrf.mxu0 }
  0xd1   : > { %1144 = vst.msk [vmem:[%s1844_s6 + $0x14] sm:$0xf] %vm1138_vm2, %v1111_v58  ;;  %v1012_v61 = vadd.f32 %v941_v60, %v672_v57  ;;  %v673_v63 = vpop.f32.mrf.mxu1 }
  0xd2   : > { %v674_v4 = vadd.f32 %v673_v63, %v444_v62 }
  0xd3   : > { %v1048_v1 = vadd.f32 %v1838_v55, %v1012_v61 }
  0xd5   : > { %v1080_v2 = vmax.f32 %v1048_v1, 0.0 }
  0xd6   : > { %v1900_v5 = vpop.f32.mrf.mxu3 }
  0xd7   : > { %v1112_v3 = vpack.c.bf16 %v1080_v2, %v1080_v2 }
  0xd8   : > { %v943_v6 = vpop.f32.mrf.mxu2  ;;  %v447_v8 = vpop.f32.mrf.mxu0 }
  0xd9   : > { %1145 = vst.msk [vmem:[%s1844_s6 + $0x18] sm:$0xf] %vm1138_vm2, %v1112_v3  ;;  %v1013_v7 = vadd.f32 %v943_v6, %v674_v4  ;;  %v676_v9 = vpop.f32.mrf.mxu1 }
  0xda   : > { %v677_v12 = vadd.f32 %v676_v9, %v447_v8 }
  0xdb   : > { %v1049_v10 = vadd.f32 %v1838_v55, %v1013_v7 }
  0xdd   : > { %v1081_v11 = vmax.f32 %v1049_v10, 0.0 }
  0xde   : > { %v1905_v15 = vpop.f32.mrf.mxu3 }
  0xdf   : > { %v1113_v14 = vpack.c.bf16 %v1081_v11, %v1081_v11 }
  0xe0   : > { %v946_v16 = vpop.f32.mrf.mxu2  ;;  %v449_v18 = vpop.f32.mrf.mxu0 }
  0xe1   : > { %1146 = vst.msk [vmem:[%s1844_s6 + $0x1c] sm:$0xf] %vm1138_vm2, %v1113_v14  ;;  %v1014_v17 = vadd.f32 %v946_v16, %v677_v12  ;;  %v678_v19 = vpop.f32.mrf.mxu1 }
  0xe2   : > { %v679_v24 = vadd.f32 %v678_v19, %v449_v18 }
  0xe3   : > { %v1050_v20 = vadd.f32 %v1838_v55, %v1014_v17 }
  0xe5   : > { %v1082_v21 = vmax.f32 %v1050_v20, 0.0 }
  0xe6   : > { %v1910_v25 = vpop.f32.mrf.mxu3 }
  0xe7   : > { %v1114_v23 = vpack.c.bf16 %v1082_v21, %v1082_v21 }
  0xe8   : > { %v948_v26 = vpop.f32.mrf.mxu2  ;;  %v452_v28 = vpop.f32.mrf.mxu0 }
  0xe9   : > { %1147 = vst.msk [vmem:[%s1844_s6 + $0x20] sm:$0xf] %vm1138_vm2, %v1114_v23  ;;  %v1015_v27 = vadd.f32 %v948_v26, %v679_v24  ;;  %v681_v29 = vpop.f32.mrf.mxu1 }
  0xea   : > { %v682_v32 = vadd.f32 %v681_v29, %v452_v28 }
  0xeb   : > { %v1051_v30 = vadd.f32 %v1838_v55, %v1015_v27 }
  0xed   : > { %v1083_v31 = vmax.f32 %v1051_v30, 0.0 }
  0xee   : > { %v1915_v34 = vpop.f32.mrf.mxu3 }
  0xef   : > { %v1115_v33 = vpack.c.bf16 %v1083_v31, %v1083_v31 }
  0xf0   : > { %v951_v36 = vpop.f32.mrf.mxu2  ;;  %v454_v38 = vpop.f32.mrf.mxu0 }
  0xf1   : > { %1148 = vst.msk [vmem:[%s1844_s6 + $0x24] sm:$0xf] %vm1138_vm2, %v1115_v33  ;;  %v1016_v37 = vadd.f32 %v951_v36, %v682_v32  ;;  %v683_v39 = vpop.f32.mrf.mxu1  ;;  %v717_v36 = vadd.f32 %v1905_v15, %v1833_v54  ;;  %v719_v54 = vadd.f32 %v1910_v25, %v1846_v0 }
  0xf2   : > { %v684_v43 = vadd.f32 %v683_v39, %v454_v38 }
  0xf3   : > { %v1052_v40 = vadd.f32 %v1838_v55, %v1016_v37 }
  0xf5   : > { %v1084_v41 = vmax.f32 %v1052_v40, 0.0 }
  0xf6   : > { %v1920_v45 = vpop.f32.mrf.mxu3 }
  0xf7   : > { %v1116_v42 = vpack.c.bf16 %v1084_v41, %v1084_v41 }
  0xf8   : > { %v953_v46 = vpop.f32.mrf.mxu2  ;;  %v457_v48 = vpop.f32.mrf.mxu0 }
  0xf9   : > { %1149 = vst.msk [vmem:[%s1844_s6 + $0x28] sm:$0xf] %vm1138_vm2, %v1116_v42  ;;  %v1017_v47 = vadd.f32 %v953_v46, %v684_v43  ;;  %v686_v49 = vpop.f32.mrf.mxu1 }
  0xfa   : > { %v687_v52 = vadd.f32 %v686_v49, %v457_v48 }
  0xfb   : > { %v1053_v50 = vadd.f32 %v1838_v55, %v1017_v47 }
  0xfd   : > { %v1085_v51 = vmax.f32 %v1053_v50, 0.0 }
  0xfe   : > { %v1925_v56 = vpop.f32.mrf.mxu3 }
  0xff   : > { %v1117_v53 = vpack.c.bf16 %v1085_v51, %v1085_v51 }
 0x100   : > { %v956_v57 = vpop.f32.mrf.mxu2  ;;  %v459_v60 = vpop.f32.mrf.mxu0 }
 0x101   : > { %1150 = vst.msk [vmem:[%s1844_s6 + $0x2c] sm:$0xf] %vm1138_vm2, %v1117_v53  ;;  %v1018_v58 = vadd.f32 %v956_v57, %v687_v52  ;;  %v688_v61 = vpop.f32.mrf.mxu1 }
 0x102   : > { %v689_v2 = vadd.f32 %v688_v61, %v459_v60 }
 0x103   : > { %v1054_v62 = vadd.f32 %v1838_v55, %v1018_v58 }
 0x105   : > { %v1086_v63 = vmax.f32 %v1054_v62, 0.0 }
 0x106   : > { %v1930_v3 = vpop.f32.mrf.mxu3 }
 0x107   : > { %v1118_v1 = vpack.c.bf16 %v1086_v63, %v1086_v63 }
 0x108   : > { %v958_v4 = vpop.f32.mrf.mxu2  ;;  %v462_v7 = vpop.f32.mrf.mxu0 }
 0x109   : > { %1151 = vst.msk [vmem:[%s1844_s6 + $0x30] sm:$0xf] %vm1138_vm2, %v1118_v1  ;;  %v1019_v6 = vadd.f32 %v958_v4, %v689_v2  ;;  %v691_v8 = vpop.f32.mrf.mxu1  ;;  %v722_v2 = vadd.f32 %v1915_v34, %v1859_v13  ;;  %v724_v34 = vadd.f32 %v1920_v45, %v1864_v22 }
 0x10a   : > { %v692_v11 = vadd.f32 %v691_v8, %v462_v7 }
 0x10b   : > { %v1055_v9 = vadd.f32 %v1838_v55, %v1019_v6 }
 0x10d   : > { %v1087_v10 = vmax.f32 %v1055_v9, 0.0 }
 0x10e   : > { %v1935_v14 = vpop.f32.mrf.mxu3 }
 0x10f   : > { %v1119_v12 = vpack.c.bf16 %v1087_v10, %v1087_v10 }
 0x110   : > { %v961_v16 = vpop.f32.mrf.mxu2  ;;  %v464_v18 = vpop.f32.mrf.mxu0 }
 0x111   : > { %1152 = vst.msk [vmem:[%s1844_s6 + $0x34] sm:$0xf] %vm1138_vm2, %v1119_v12  ;;  %v1020_v17 = vadd.f32 %v961_v16, %v692_v11  ;;  %v693_v19 = vpop.f32.mrf.mxu1 }
 0x112   : > { %v694_v24 = vadd.f32 %v693_v19, %v464_v18 }
 0x113   : > { %v1056_v20 = vadd.f32 %v1838_v55, %v1020_v17 }
 0x115   : > { %v1088_v21 = vmax.f32 %v1056_v20, 0.0 }
 0x116   : > { %v1940_v26 = vpop.f32.mrf.mxu3 }
 0x117   : > { %v1120_v23 = vpack.c.bf16 %v1088_v21, %v1088_v21 }
 0x118   : > { %v963_v27 = vpop.f32.mrf.mxu2  ;;  %v467_v29 = vpop.f32.mrf.mxu0 }
 0x119   : > { %1153 = vst.msk [vmem:[%s1844_s6 + $0x38] sm:$0xf] %vm1138_vm2, %v1120_v23  ;;  %v1021_v28 = vadd.f32 %v963_v27, %v694_v24  ;;  %v696_v30 = vpop.f32.mrf.mxu1 }
 0x11a   : > { %v697_v33 = vadd.f32 %v696_v30, %v467_v29 }
 0x11b   : > { %v1057_v31 = vadd.f32 %v1838_v55, %v1021_v28 }
 0x11d   : > { %v1089_v32 = vmax.f32 %v1057_v31, 0.0 }
 0x11e   : > { %v986_v38 = vpop.f32.mrf.mxu3 }
 0x11f   : > { %v1121_v37 = vpack.c.bf16 %v1089_v32, %v1089_v32  ;;  %v1030_v40 = vadd.f32 %v986_v38, %v717_v36  ;;  %v727_v36 = vadd.f32 %v1925_v56, %v1877_v35  ;;  %v729_v56 = vadd.f32 %v1930_v3, %v1882_v44 }
 0x120   : > { %v966_v39 = vpop.f32.mrf.mxu2  ;;  %v469_v42 = vpop.f32.mrf.mxu0 }
 0x121   : > { %1154 = vst.msk [vmem:[%s1844_s6 + $0x3c] sm:$0xf] %vm1138_vm2, %v1121_v37  ;;  %v1022_v41 = vadd.f32 %v966_v39, %v697_v33  ;;  %v1066_v43 = vadd.f32 %v1838_v55, %v1030_v40  ;;  %v698_v46 = vpop.f32.mrf.mxu1 }
 0x122   : > { %v699_v51 = vadd.f32 %v698_v46, %v469_v42 }
 0x123   : > { %v1058_v47 = vadd.f32 %v1838_v55, %v1022_v41  ;;  %v1098_v48 = vmax.f32 %v1066_v43, 0.0 }
 0x125   : > { %v1090_v49 = vmax.f32 %v1058_v47, 0.0  ;;  %v1130_v15 = vpack.c.bf16 %v1098_v48, %v1098_v48 }
 0x126   : > { %v988_v52 = vpop.f32.mrf.mxu3 }
 0x127   : > { %v1122_v50 = vpack.c.bf16 %v1090_v49, %v1090_v49  ;;  %1163 = vst.msk [vmem:[%s1844_s6 + $0x60] sm:$0xf] %vm1138_vm2, %v1130_v15  ;;  %v1031_v57 = vadd.f32 %v988_v52, %v719_v54 }
 0x128   : > { %v968_v53 = vpop.f32.mrf.mxu2  ;;  %v472_v60 = vpop.f32.mrf.mxu0 }
 0x129   : > { %1155 = vst.msk [vmem:[%s1844_s6 + $0x40] sm:$0xf] %vm1138_vm2, %v1122_v50  ;;  %v1023_v58 = vadd.f32 %v968_v53, %v699_v51  ;;  %v1067_v61 = vadd.f32 %v1838_v55, %v1031_v57  ;;  %v701_v62 = vpop.f32.mrf.mxu1 }
 0x12a   : > { %v702_v1 = vadd.f32 %v701_v62, %v472_v60 }
 0x12b   : > { %v1059_v63 = vadd.f32 %v1838_v55, %v1023_v58  ;;  %v1099_v0 = vmax.f32 %v1067_v61, 0.0 }
 0x12d   : > { %v1091_v25 = vmax.f32 %v1059_v63, 0.0  ;;  %v1131_v4 = vpack.c.bf16 %v1099_v0, %v1099_v0  ;;  %v732_v0 = vadd.f32 %v1935_v14, %v1895_v59  ;;  %v734_v14 = vadd.f32 %v1940_v26, %v1900_v5 }
 0x12e   : > { %v991_v7 = vpop.f32.mrf.mxu3 }
 0x12f   : > { %v1123_v6 = vpack.c.bf16 %v1091_v25, %v1091_v25  ;;  %1164 = vst.msk [vmem:[%s1844_s6 + $0x64] sm:$0xf] %vm1138_vm2, %v1131_v4  ;;  %v1032_v9 = vadd.f32 %v991_v7, %v722_v2 }
 0x130   : > { %v971_v8 = vpop.f32.mrf.mxu2  ;;  %v474_v11 = vpop.f32.mrf.mxu0 }
 0x131   : > { %1156 = vst.msk [vmem:[%s1844_s6 + $0x44] sm:$0xf] %vm1138_vm2, %v1123_v6  ;;  %v1024_v10 = vadd.f32 %v971_v8, %v702_v1  ;;  %v1068_v12 = vadd.f32 %v1838_v55, %v1032_v9  ;;  %v703_v16 = vpop.f32.mrf.mxu1 }
 0x132   : > { %v704_v21 = vadd.f32 %v703_v16, %v474_v11 }
 0x133   : > { %v1060_v17 = vadd.f32 %v1838_v55, %v1024_v10  ;;  %v1100_v18 = vmax.f32 %v1068_v12, 0.0 }
 0x135   : > { %v1092_v13 = vmax.f32 %v1060_v17, 0.0  ;;  %v1132_v19 = vpack.c.bf16 %v1100_v18, %v1100_v18 }
 0x136   : > { %v993_v23 = vpop.f32.mrf.mxu3 }
 0x137   : > { %v1124_v20 = vpack.c.bf16 %v1092_v13, %v1092_v13  ;;  %1165 = vst.msk [vmem:[%s1844_s6 + $0x68] sm:$0xf] %vm1138_vm2, %v1132_v19  ;;  %v1033_v27 = vadd.f32 %v993_v23, %v724_v34 }
 0x138   : > { %v973_v24 = vpop.f32.mrf.mxu2  ;;  %v477_v29 = vpop.f32.mrf.mxu0 }
 0x139   : > { %1157 = vst.msk [vmem:[%s1844_s6 + $0x48] sm:$0xf] %vm1138_vm2, %v1124_v20  ;;  %v1025_v28 = vadd.f32 %v973_v24, %v704_v21  ;;  %v1069_v30 = vadd.f32 %v1838_v55, %v1033_v27  ;;  %v706_v31 = vpop.f32.mrf.mxu1 }
 0x13a   : > { %v707_v33 = vadd.f32 %v706_v31, %v477_v29 }
 0x13b   : > { %v1061_v32 = vadd.f32 %v1838_v55, %v1025_v28  ;;  %v1101_v22 = vmax.f32 %v1069_v30, 0.0 }
 0x13d   : > { %v1093_v45 = vmax.f32 %v1061_v32, 0.0  ;;  %v1133_v37 = vpack.c.bf16 %v1101_v22, %v1101_v22 }
 0x13e   : > { %v996_v39 = vpop.f32.mrf.mxu3 }
 0x13f   : > { %v1125_v38 = vpack.c.bf16 %v1093_v45, %v1093_v45  ;;  %1166 = vst.msk [vmem:[%s1844_s6 + $0x6c] sm:$0xf] %vm1138_vm2, %v1133_v37  ;;  %v1034_v41 = vadd.f32 %v996_v39, %v727_v36 }
 0x140   : > { %v976_v40 = vpop.f32.mrf.mxu2  ;;  %v479_v43 = vpop.f32.mrf.mxu0 }
 0x141   : > { %1158 = vst.msk [vmem:[%s1844_s6 + $0x4c] sm:$0xf] %vm1138_vm2, %v1125_v38  ;;  %v1026_v42 = vadd.f32 %v976_v40, %v707_v33  ;;  %v1070_v46 = vadd.f32 %v1838_v55, %v1034_v41  ;;  %v708_v47 = vpop.f32.mrf.mxu1 }
 0x142   : > { %v709_v50 = vadd.f32 %v708_v47, %v479_v43 }
 0x143   : > { %v1062_v48 = vadd.f32 %v1838_v55, %v1026_v42  ;;  %v1102_v49 = vmax.f32 %v1070_v46, 0.0 }
 0x145   : > { %v1094_v35 = vmax.f32 %v1062_v48, 0.0  ;;  %v1134_v54 = vpack.c.bf16 %v1102_v49, %v1102_v49 }
 0x146   : > { %v998_v51 = vpop.f32.mrf.mxu3 }
 0x147   : > { %v1126_v15 = vpack.c.bf16 %v1094_v35, %v1094_v35  ;;  %1167 = vst.msk [vmem:[%s1844_s6 + $0x70] sm:$0xf] %vm1138_vm2, %v1134_v54  ;;  %v1035_v53 = vadd.f32 %v998_v51, %v729_v56 }
 0x148   : > { %v978_v52 = vpop.f32.mrf.mxu2  ;;  %v482_v60 = vpop.f32.mrf.mxu0 }
 0x149   : > { %1159 = vst.msk [vmem:[%s1844_s6 + $0x50] sm:$0xf] %vm1138_vm2, %v1126_v15  ;;  %v1027_v57 = vadd.f32 %v978_v52, %v709_v50  ;;  %v1071_v58 = vadd.f32 %v1838_v55, %v1035_v53  ;;  %v711_v61 = vpop.f32.mrf.mxu1 }
 0x14a   : > { %v712_v63 = vadd.f32 %v711_v61, %v482_v60 }
 0x14b   : > { %v1063_v62 = vadd.f32 %v1838_v55, %v1027_v57  ;;  %v1103_v44 = vmax.f32 %v1071_v58, 0.0 }
 0x14d   : > { %v1095_v3 = vmax.f32 %v1063_v62, 0.0  ;;  %v1135_v25 = vpack.c.bf16 %v1103_v44, %v1103_v44 }
 0x14e   : > { %v1001_v2 = vpop.f32.mrf.mxu3 }
 0x14f   : > { %v1127_v1 = vpack.c.bf16 %v1095_v3, %v1095_v3  ;;  %1168 = vst.msk [vmem:[%s1844_s6 + $0x74] sm:$0xf] %vm1138_vm2, %v1135_v25  ;;  %v1036_v6 = vadd.f32 %v1001_v2, %v732_v0 }
 0x150   : > { %v981_v4 = vpop.f32.mrf.mxu2  ;;  %v484_v11 = vpop.f32.mrf.mxu0 }
 0x151   : > { %1160 = vst.msk [vmem:[%s1844_s6 + $0x54] sm:$0xf] %vm1138_vm2, %v1127_v1  ;;  %v1028_v7 = vadd.f32 %v981_v4, %v712_v63  ;;  %v1072_v8 = vadd.f32 %v1838_v55, %v1036_v6  ;;  %v713_v12 = vpop.f32.mrf.mxu1 }
 0x152   : > { %v714_v18 = vadd.f32 %v713_v12, %v484_v11 }
 0x153   : > { %v1064_v9 = vadd.f32 %v1838_v55, %v1028_v7  ;;  %v1104_v10 = vmax.f32 %v1072_v8, 0.0 }
 0x155   : > { %v1096_v59 = vmax.f32 %v1064_v9, 0.0  ;;  %v1136_v16 = vpack.c.bf16 %v1104_v10, %v1104_v10 }
 0x156   : > { %v1003_v13 = vpop.f32.mrf.mxu3 }
 0x157   : > { %v1128_v17 = vpack.c.bf16 %v1096_v59, %v1096_v59  ;;  %1169 = vst.msk [vmem:[%s1844_s6 + $0x78] sm:$0xf] %vm1138_vm2, %v1136_v16  ;;  %v1037_v19 = vadd.f32 %v1003_v13, %v734_v14 }
 0x158   : > { %v983_v34 = vpop.f32.mrf.mxu2 }
 0x159   : > { %1161 = vst.msk [vmem:[%s1844_s6 + $0x58] sm:$0xf] %vm1138_vm2, %v1128_v17  ;;  %v1029_v20 = vadd.f32 %v983_v34, %v714_v18  ;;  %v1073_v21 = vadd.f32 %v1838_v55, %v1037_v19 }
 0x15b   : > { %v1065_v23 = vadd.f32 %v1838_v55, %v1029_v20  ;;  %v1105_v24 = vmax.f32 %v1073_v21, 0.0 }
 0x15d   : > { %v1097_v27 = vmax.f32 %v1065_v23, 0.0  ;;  %v1137_v5 = vpack.c.bf16 %v1105_v24, %v1105_v24 }
 0x15f   : > { %v1129_v26 = vpack.c.bf16 %v1097_v27, %v1097_v27  ;;  %1170 = vst.msk [vmem:[%s1844_s6 + $0x7c] sm:$0xf] %vm1138_vm2, %v1137_v5 }
 0x161   : > { %1162 = vst.msk [vmem:[%s1844_s6 + $0x5c] sm:$0xf] %vm1138_vm2, %v1129_v26 }
 0x162 PF: > { %s13_s16 = sadd.s32 1, %s1671_s16   ;;  %s2030_s12 = smov %s1663_s14 }
 0x163   : > { %p10_p7 = scmp.ge.s32.totalorder %s13_s16, 10   ;;  %s2031_s13 = smov %s1667_s15 }
 0x164   : > { %s2032_s14 = smov %s2035_s17  ;;  %s2033_s15 = smov %s2039_s18 }
 0x165   :  { %12 = sbr.rel (!%p10_p7) target bundleno = 3 (0x3), region = 67 }

// kernel: ssd_forward.9
= control target key start
LH: loop header
LB: loop body
LE: loop exit
PB: predicated region body
PF: predicated region fallthrough
CT: control target
= control target key end

     0   :  { %s1783_s12 = smov 0   ;;  %s1785_s13 = smov 0   ;;  %s2096_s0 = inlined_call_operand.vmem [shape: bf16[2,288,48], index: 0, kind: input, shape index: {}]   ;;  %s2097_s1 = inlined_call_operand.vmem [shape: bf16[3,48,32], index: 1, kind: input, shape index: {}]   ;;  %s2098_s2 = inlined_call_operand.vmem [shape: f32[1,32], index: 2, kind: input, shape index: {}]   ;;  %s2099_s3 = inlined_call_operand.vmem [shape: bf16[2,256,32], index: 3, kind: output, shape index: {}]  }
   0x1   :  { %s1787_s14 = smov 0  }
   0x2 LB: > { %s25_s15 = sadd.s32 1, %s1757_s13  ;;  %p1288_p0 = scmp.ge.s32.totalorder %s1761_s14, 1  ;;  %s1761_s14 = sphi %s1787_s14, %s13_s14   ;;  %s1757_s13 = sphi %s1785_s13, %s2101_s13   ;;  %s1753_s12 = sphi %s1783_s12, %s2100_s12  }
   0x3   : > { %p27_p1 = scmp.ge.s32.totalorder %s25_s15, 2  ;;  %p151_p2 = scmp.lt.s32.totalorder %s1761_s14, 3 }
   0x5   : > { %s2103_s15 = smov (%p27_p1, %s25_s15), 0  ;;  %p152_p3 = pnand %p1288_p0, %p151_p2 }
   0x6   : > { %p179_p4 = scmp.lt.s32.totalorder (!%p152_p3), %s1753_s12, 1 }
   0x7   : > { %155 = sbr.rel (%p152_p3) target bundleno = 351 (0x15f), region = 32 }
   0xc   : > { %v1684_v0 = vld [vmem:[%s2097_s1 + $0x28] sm:$0xff]  ;;  %v1665_v1 = vld [vmem:[%s2097_s1 + $0x10] sm:$0xff]  ;;  %v1703_v2 = vld [vmem:[%s2097_s1 + $0x40] sm:$0xff]  ;;  %s2105_s12 = smov (!%p179_p4, %s1753_s12), 1  ;;  %vm380_vm0 = vcmask 392192   ;;  %vm1164_vm1 = vcmask 257024  }
   0xd   : > { %434 = vmatpush.bf16.msra.mxu0 %v1684_v0  ;;  %1704 = vmatpush.bf16.msra.mxu3 %v1684_v0  ;;  %v1683_v3 = vld [vmem:[%s2097_s1 + $0x20] sm:$0xff]  ;;  %v1664_v4 = vld [vmem:[%s2097_s1 + $0x8] sm:$0xff]  ;;  %v1702_v5 = vld [vmem:[%s2097_s1 + $0x38] sm:$0xff]  ;;  %s1713_s28 = smul.u32 144, %s2105_s12  ;;  %s1646_s17 = sshll.u32 %s2105_s12, 7 }
   0xe   : > { %669 = vmatpush.bf16.msra.mxu1 %v1665_v1  ;;  %948 = vmatpush.bf16.msra.mxu2 %v1703_v2  ;;  %v1682_v6 = vld [vmem:[%s2097_s1 + $0x18] sm:$0xff]  ;;  %v1663_v7 = vld [vmem:[%s2097_s1] sm:$0xff]  ;;  %v1701_v8 = vld [vmem:[%s2097_s1 + $0x30] sm:$0xff]  ;;  %s1920_s20 = scalar_lea.vmem %s2099_s3, %s1646_s17 }
   0xf   : > { %s1828_s6 = scalar_lea.vmem %s2096_s0, %s1713_s28  ;;  %v1913_v49 = vld [vmem:[%s2098_s2] ss:$0 sm:$0xff] }
  0x10   : > { %v1666_v9 = vld [vmem:[%s1828_s6 + $0x8] sm:$0xff]  ;;  %v1647_v11 = vld [vmem:[%s1828_s6] sm:$0xff]  ;;  %v1685_v12 = vld [vmem:[%s1828_s6 + $0x10] sm:$0xff] }
  0x11   : > { %435 = vmatpush.bf16.msra.mxu0 %v1683_v3  ;;  %1705 = vmatpush.bf16.msra.mxu3 %v1683_v3  ;;  %v1678_v10 = vld [vmem:[%s1828_s6 + $0x68] sm:$0xff]  ;;  %v1667_v13 = vld [vmem:[%s1828_s6 + $0x10] sm:$0xff]  ;;  %v1686_v16 = vld [vmem:[%s1828_s6 + $0x18] sm:$0xff] }
  0x12   : > { %670 = vmatpush.bf16.msra.mxu1 %v1664_v4  ;;  %949 = vmatpush.bf16.msra.mxu2 %v1702_v5  ;;  %v1679_v14 = vld [vmem:[%s1828_s6 + $0x70] sm:$0xff]  ;;  %v1648_v15 = vld [vmem:[%s1828_s6 + $0x8] sm:$0xff]  ;;  %v1668_v17 = vld [vmem:[%s1828_s6 + $0x18] sm:$0xff] }
  0x13   : > { %v1680_v18 = vld [vmem:[%s1828_s6 + $0x78] sm:$0xff]  ;;  %v1649_v19 = vld [vmem:[%s1828_s6 + $0x10] sm:$0xff]  ;;  %v1687_v20 = vld [vmem:[%s1828_s6 + $0x20] sm:$0xff] }
  0x14   : > { %v1669_v21 = vld [vmem:[%s1828_s6 + $0x20] sm:$0xff]  ;;  %v1650_v23 = vld [vmem:[%s1828_s6 + $0x18] sm:$0xff]  ;;  %v1688_v24 = vld [vmem:[%s1828_s6 + $0x28] sm:$0xff] }
  0x15   : > { %436 = vmatpush.bf16.msra.mxu0 %v1682_v6  ;;  %1706 = vmatpush.bf16.msra.mxu3 %v1682_v6  ;;  %v1681_v22 = vld [vmem:[%s1828_s6 + $0x80] sm:$0xff]  ;;  %v1670_v25 = vld [vmem:[%s1828_s6 + $0x28] sm:$0xff]  ;;  %v1689_v28 = vld [vmem:[%s1828_s6 + $0x30] sm:$0xff] }
  0x16   : > { %671 = vmatpush.bf16.msra.mxu1 %v1663_v7  ;;  %950 = vmatpush.bf16.msra.mxu2 %v1701_v8  ;;  %v1659_v26 = vld [vmem:[%s1828_s6 + $0x60] sm:$0xff]  ;;  %v1671_v29 = vld [vmem:[%s1828_s6 + $0x30] sm:$0xff]  ;;  %v1660_v30 = vld [vmem:[%s1828_s6 + $0x68] sm:$0xff] }
  0x17   : > { %v1651_v27 = vld [vmem:[%s1828_s6 + $0x20] sm:$0xff]  ;;  %v1652_v31 = vld [vmem:[%s1828_s6 + $0x28] sm:$0xff]  ;;  %v1690_v32 = vld [vmem:[%s1828_s6 + $0x38] sm:$0xff] }
  0x18   : > { %1406 = vmatmul.msk.bf16.vlgmr.msra.gmra.mxu0 %vm380_vm0, %v1666_v9  ;;  %1418 = vmatmul.msk.bf16.vlgmr.msra.gmra.mxu3 %vm380_vm0, %v1678_v10  ;;  %v1672_v33 = vld [vmem:[%s1828_s6 + $0x38] sm:$0xff]  ;;  %v1661_v34 = vld [vmem:[%s1828_s6 + $0x70] sm:$0xff]  ;;  %v1691_v36 = vld [vmem:[%s1828_s6 + $0x40] sm:$0xff] }
  0x19   : > { %1707 = vmatpush.bf16.msrb.mxu3 %v1665_v1  ;;  %1498 = vmatmul.msk.bf16.vlgmr.msra.gmra.mxu1 %vm380_vm0, %v1647_v11  ;;  %v1653_v35 = vld [vmem:[%s1828_s6 + $0x30] sm:$0xff]  ;;  %v1673_v37 = vld [vmem:[%s1828_s6 + $0x40] sm:$0xff]  ;;  %v1662_v38 = vld [vmem:[%s1828_s6 + $0x78] sm:$0xff] }
  0x1a   : > { %1628 = vmatmul.msk.bf16.vlgmr.msra.gmra.mxu2 %vm380_vm0, %v1685_v12  ;;  %v1654_v39 = vld [vmem:[%s1828_s6 + $0x38] sm:$0xff]  ;;  %v1692_v40 = vld [vmem:[%s1828_s6 + $0x48] sm:$0xff]  ;;  %v1697_v42 = vld [vmem:[%s1828_s6 + $0x70] sm:$0xff] }
  0x1b   : > { %v1674_v41 = vld [vmem:[%s1828_s6 + $0x48] sm:$0xff]  ;;  %v1655_v44 = vld [vmem:[%s1828_s6 + $0x40] sm:$0xff]  ;;  %v1693_v45 = vld [vmem:[%s1828_s6 + $0x50] sm:$0xff] }
  0x1c   : > { %v1675_v60 = vld [vmem:[%s1828_s6 + $0x50] sm:$0xff]  ;;  %v1698_v61 = vld [vmem:[%s1828_s6 + $0x78] sm:$0xff]  ;;  %v1656_v0 = vld [vmem:[%s1828_s6 + $0x48] sm:$0xff] }
  0x1d   : > { %1708 = vmatpush.bf16.msrb.mxu3 %v1664_v4  ;;  %v1694_v1 = vld [vmem:[%s1828_s6 + $0x58] sm:$0xff] }
  0x21   : > { %1709 = vmatpush.bf16.msrb.mxu3 %v1663_v7 }
  0x25   : > { %1710 = vmatpush.bf16.msra.mxu3 %v1703_v2 }
  0x28   : > { %1407 = vmatmul.msk.bf16.gmra.mxu0 %vm380_vm0, %v1667_v13  ;;  %1419 = vmatmul.msk.bf16.gmra.mxu3 %vm380_vm0, %v1679_v14 }
  0x29   : > { %1711 = vmatpush.bf16.msra.mxu3 %v1702_v5  ;;  %1499 = vmatmul.msk.bf16.gmra.mxu1 %vm380_vm0, %v1648_v15 }
  0x2a   : > { %1629 = vmatmul.msk.bf16.gmra.mxu2 %vm380_vm0, %v1686_v16 }
  0x2d   : > { %1712 = vmatpush.bf16.msra.mxu3 %v1701_v8 }
  0x38   : > { %1408 = vmatmul.msk.bf16.gmra.mxu0 %vm380_vm0, %v1668_v17  ;;  %1420 = vmatmul.msk.bf16.gmra.mxu3 %vm380_vm0, %v1680_v18  ;;  %v1676_v18 = vld [vmem:[%s1828_s6 + $0x58] sm:$0xff] }
  0x39   : > { %1500 = vmatmul.msk.bf16.gmra.mxu1 %vm380_vm0, %v1649_v19  ;;  %v1699_v19 = vld [vmem:[%s1828_s6 + $0x80] sm:$0xff] }
  0x3a   : > { %1630 = vmatmul.msk.bf16.gmra.mxu2 %vm380_vm0, %v1687_v20 }
  0x48   : > { %1409 = vmatmul.msk.bf16.gmra.mxu0 %vm380_vm0, %v1669_v21  ;;  %1421 = vmatmul.msk.bf16.gmra.mxu3 %vm380_vm0, %v1681_v22  ;;  %v1657_v22 = vld [vmem:[%s1828_s6 + $0x50] sm:$0xff] }
  0x49   : > { %1501 = vmatmul.msk.bf16.gmra.mxu1 %vm380_vm0, %v1650_v23  ;;  %v1695_v23 = vld [vmem:[%s1828_s6 + $0x60] sm:$0xff] }
  0x4a   : > { %1631 = vmatmul.msk.bf16.gmra.mxu2 %vm380_vm0, %v1688_v24 }
  0x58   : > { %1410 = vmatmul.msk.bf16.gmra.mxu0 %vm380_vm0, %v1670_v25  ;;  %1510 = vmatmul.msk.bf16.vlgmr.msrb.gmra.mxu3 %vm380_vm0, %v1659_v26 }
  0x59   : > { %1502 = vmatmul.msk.bf16.gmra.mxu1 %vm380_vm0, %v1651_v27 }
  0x5a   : > { %1632 = vmatmul.msk.bf16.gmra.mxu2 %vm380_vm0, %v1689_v28 }
  0x68   : > { %1411 = vmatmul.msk.bf16.gmra.mxu0 %vm380_vm0, %v1671_v29  ;;  %1511 = vmatmul.msk.bf16.gmra.mxu3 %vm380_vm0, %v1660_v30 }
  0x69   : > { %1503 = vmatmul.msk.bf16.gmra.mxu1 %vm380_vm0, %v1652_v31 }
  0x6a   : > { %1633 = vmatmul.msk.bf16.gmra.mxu2 %vm380_vm0, %v1690_v32 }
  0x78   : > { %1412 = vmatmul.msk.bf16.gmra.mxu0 %vm380_vm0, %v1672_v33  ;;  %1512 = vmatmul.msk.bf16.gmra.mxu3 %vm380_vm0, %v1661_v34 }
  0x79   : > { %1504 = vmatmul.msk.bf16.gmra.mxu1 %vm380_vm0, %v1653_v35 }
  0x7a   : > { %1634 = vmatmul.msk.bf16.gmra.mxu2 %vm380_vm0, %v1691_v36 }
  0x88   : > { %1413 = vmatmul.msk.bf16.gmra.mxu0 %vm380_vm0, %v1673_v37  ;;  %1513 = vmatmul.msk.bf16.gmra.mxu3 %vm380_vm0, %v1662_v38 }
  0x89   : > { %1505 = vmatmul.msk.bf16.gmra.mxu1 %vm380_vm0, %v1654_v39 }
  0x8a   : > { %1635 = vmatmul.msk.bf16.gmra.mxu2 %vm380_vm0, %v1692_v40  ;;  %v1677_v40 = vld [vmem:[%s1828_s6 + $0x60] sm:$0xff] }
  0x95   : > { %v438_v43 = vpop.f32.mrf.mxu0 }
  0x96   : > { %v673_v46 = vpop.f32.mrf.mxu1 }
  0x97   : > { %v674_v47 = vadd.f32 %v673_v46, %v438_v43 }
  0x98   : > { %1414 = vmatmul.msk.bf16.gmra.mxu0 %vm380_vm0, %v1674_v41  ;;  %1640 = vmatmul.msk.bf16.vlgmr.msra.gmra.mxu3 %vm380_vm0, %v1697_v42  ;;  %v1700_v41 = vld [vmem:[%s1828_s6 + $0x88] sm:$0xff] }
  0x99   : > { %1506 = vmatmul.msk.bf16.gmra.mxu1 %vm380_vm0, %v1655_v44  ;;  %v1658_v44 = vld [vmem:[%s1828_s6 + $0x58] sm:$0xff] }
  0x9a   : > { %1636 = vmatmul.msk.bf16.gmra.mxu2 %vm380_vm0, %v1693_v45  ;;  %v1696_v45 = vld [vmem:[%s1828_s6 + $0x68] sm:$0xff] }
  0x9b   : > { %v1908_v48 = vpop.f32.mrf.mxu3 }
  0x9d   : > { %v952_v50 = vpop.f32.mrf.mxu2  ;;  %v440_v52 = vpop.f32.mrf.mxu0 }
  0x9e   : > { %v1032_v51 = vadd.f32 %v952_v50, %v674_v47  ;;  %v675_v53 = vpop.f32.mrf.mxu1 }
  0x9f   : > { %v676_v57 = vadd.f32 %v675_v53, %v440_v52 }
  0xa0   : > { %v1068_v54 = vadd.f32 %v1913_v49, %v1032_v51 }
  0xa2   : > { %v1100_v55 = vmax.f32 %v1068_v54, 0.0 }
  0xa3   : > { %v1922_v58 = vpop.f32.mrf.mxu3 }
  0xa4   : > { %v1132_v56 = vpack.c.bf16 %v1100_v55, %v1100_v55 }
  0xa5   : > { %v954_v59 = vpop.f32.mrf.mxu2  ;;  %v443_v63 = vpop.f32.mrf.mxu0 }
  0xa6   : > { %1165 = vst.msk [vmem:[%s1920_s20] sm:$0xf] %vm1164_vm1, %v1132_v56  ;;  %v1033_v62 = vadd.f32 %v954_v59, %v676_v57  ;;  %v678_v2 = vpop.f32.mrf.mxu1 }
  0xa7   : > { %v679_v5 = vadd.f32 %v678_v2, %v443_v63 }
  0xa8   : > { %v1069_v3 = vadd.f32 %v1913_v49, %v1033_v62  ;;  %1415 = vmatmul.msk.bf16.gmra.mxu0 %vm380_vm0, %v1675_v60  ;;  %1641 = vmatmul.msk.bf16.gmra.mxu3 %vm380_vm0, %v1698_v61 }
  0xa9   : > { %1507 = vmatmul.msk.bf16.gmra.mxu1 %vm380_vm0, %v1656_v0 }
  0xaa   : > { %v1101_v4 = vmax.f32 %v1069_v3, 0.0  ;;  %1637 = vmatmul.msk.bf16.gmra.mxu2 %vm380_vm0, %v1694_v1 }
  0xab   : > { %v1935_v7 = vpop.f32.mrf.mxu3 }
  0xac   : > { %v1133_v6 = vpack.c.bf16 %v1101_v4, %v1101_v4 }
  0xad   : > { %v957_v8 = vpop.f32.mrf.mxu2  ;;  %v445_v10 = vpop.f32.mrf.mxu0 }
  0xae   : > { %1166 = vst.msk [vmem:[%s1920_s20 + $0x4] sm:$0xf] %vm1164_vm1, %v1133_v6  ;;  %v1034_v9 = vadd.f32 %v957_v8, %v679_v5  ;;  %v680_v11 = vpop.f32.mrf.mxu1 }
  0xaf   : > { %v681_v15 = vadd.f32 %v680_v11, %v445_v10 }
  0xb0   : > { %v1070_v12 = vadd.f32 %v1913_v49, %v1034_v9 }
  0xb2   : > { %v1102_v13 = vmax.f32 %v1070_v12, 0.0 }
  0xb3   : > { %v1940_v16 = vpop.f32.mrf.mxu3 }
  0xb4   : > { %v1134_v14 = vpack.c.bf16 %v1102_v13, %v1102_v13 }
  0xb5   : > { %v959_v17 = vpop.f32.mrf.mxu2  ;;  %v448_v21 = vpop.f32.mrf.mxu0 }
  0xb6   : > { %1167 = vst.msk [vmem:[%s1920_s20 + $0x8] sm:$0xf] %vm1164_vm1, %v1134_v14  ;;  %v1035_v20 = vadd.f32 %v959_v17, %v681_v15  ;;  %v683_v24 = vpop.f32.mrf.mxu1 }
  0xb7   : > { %v684_v27 = vadd.f32 %v683_v24, %v448_v21 }
  0xb8   : > { %v1071_v25 = vadd.f32 %v1913_v49, %v1035_v20  ;;  %1416 = vmatmul.msk.bf16.gmra.mxu0 %vm380_vm0, %v1676_v18  ;;  %1642 = vmatmul.msk.bf16.gmra.mxu3 %vm380_vm0, %v1699_v19 }
  0xb9   : > { %1508 = vmatmul.msk.bf16.gmra.mxu1 %vm380_vm0, %v1657_v22 }
  0xba   : > { %v1103_v26 = vmax.f32 %v1071_v25, 0.0  ;;  %1638 = vmatmul.msk.bf16.gmra.mxu2 %vm380_vm0, %v1695_v23 }
  0xbb   : > { %v1953_v29 = vpop.f32.mrf.mxu3 }
  0xbc   : > { %v1135_v28 = vpack.c.bf16 %v1103_v26, %v1103_v26 }
  0xbd   : > { %v962_v30 = vpop.f32.mrf.mxu2  ;;  %v450_v32 = vpop.f32.mrf.mxu0 }
  0xbe   : > { %1168 = vst.msk [vmem:[%s1920_s20 + $0xc] sm:$0xf] %vm1164_vm1, %v1135_v28  ;;  %v1036_v31 = vadd.f32 %v962_v30, %v684_v27  ;;  %v685_v33 = vpop.f32.mrf.mxu1 }
  0xbf   : > { %v686_v37 = vadd.f32 %v685_v33, %v450_v32 }
  0xc0   : > { %v1072_v34 = vadd.f32 %v1913_v49, %v1036_v31 }
  0xc2   : > { %v1104_v35 = vmax.f32 %v1072_v34, 0.0 }
  0xc3   : > { %v1958_v38 = vpop.f32.mrf.mxu3 }
  0xc4   : > { %v1136_v36 = vpack.c.bf16 %v1104_v35, %v1104_v35 }
  0xc5   : > { %v964_v39 = vpop.f32.mrf.mxu2  ;;  %v453_v43 = vpop.f32.mrf.mxu0 }
  0xc6   : > { %1169 = vst.msk [vmem:[%s1920_s20 + $0x10] sm:$0xf] %vm1164_vm1, %v1136_v36  ;;  %v1037_v42 = vadd.f32 %v964_v39, %v686_v37  ;;  %v688_v46 = vpop.f32.mrf.mxu1 }
  0xc7   : > { %v689_v51 = vadd.f32 %v688_v46, %v453_v43 }
  0xc8   : > { %v1073_v47 = vadd.f32 %v1913_v49, %v1037_v42  ;;  %1417 = vmatmul.msk.bf16.gmra.mxu0 %vm380_vm0, %v1677_v40  ;;  %1643 = vmatmul.msk.bf16.gmra.mxu3 %vm380_vm0, %v1700_v41 }
  0xc9   : > { %1509 = vmatmul.msk.bf16.gmra.mxu1 %vm380_vm0, %v1658_v44 }
  0xca   : > { %v1105_v50 = vmax.f32 %v1073_v47, 0.0  ;;  %1639 = vmatmul.msk.bf16.gmra.mxu2 %vm380_vm0, %v1696_v45 }
  0xcb   : > { %v1971_v53 = vpop.f32.mrf.mxu3 }
  0xcc   : > { %v1137_v52 = vpack.c.bf16 %v1105_v50, %v1105_v50 }
  0xcd   : > { %v967_v54 = vpop.f32.mrf.mxu2  ;;  %v455_v56 = vpop.f32.mrf.mxu0 }
  0xce   : > { %1170 = vst.msk [vmem:[%s1920_s20 + $0x14] sm:$0xf] %vm1164_vm1, %v1137_v52  ;;  %v1038_v55 = vadd.f32 %v967_v54, %v689_v51  ;;  %v690_v57 = vpop.f32.mrf.mxu1 }
  0xcf   : > { %v691_v62 = vadd.f32 %v690_v57, %v455_v56 }
  0xd0   : > { %v1074_v59 = vadd.f32 %v1913_v49, %v1038_v55 }
  0xd2   : > { %v1106_v60 = vmax.f32 %v1074_v59, 0.0 }
  0xd3   : > { %v1976_v63 = vpop.f32.mrf.mxu3 }
  0xd4   : > { %v1138_v61 = vpack.c.bf16 %v1106_v60, %v1106_v60 }
  0xd5   : > { %v969_v0 = vpop.f32.mrf.mxu2  ;;  %v458_v2 = vpop.f32.mrf.mxu0 }
  0xd6   : > { %1171 = vst.msk [vmem:[%s1920_s20 + $0x18] sm:$0xf] %vm1164_vm1, %v1138_v61  ;;  %v1039_v1 = vadd.f32 %v969_v0, %v691_v62  ;;  %v693_v3 = vpop.f32.mrf.mxu1 }
  0xd7   : > { %v694_v6 = vadd.f32 %v693_v3, %v458_v2 }
  0xd8   : > { %v1075_v4 = vadd.f32 %v1913_v49, %v1039_v1 }
  0xda   : > { %v1107_v5 = vmax.f32 %v1075_v4, 0.0 }
  0xdb   : > { %v1981_v9 = vpop.f32.mrf.mxu3 }
  0xdc   : > { %v1139_v8 = vpack.c.bf16 %v1107_v5, %v1107_v5 }
  0xdd   : > { %v972_v10 = vpop.f32.mrf.mxu2  ;;  %v460_v12 = vpop.f32.mrf.mxu0 }
  0xde   : > { %1172 = vst.msk [vmem:[%s1920_s20 + $0x1c] sm:$0xf] %vm1164_vm1, %v1139_v8  ;;  %v1040_v11 = vadd.f32 %v972_v10, %v694_v6  ;;  %v695_v13 = vpop.f32.mrf.mxu1 }
  0xdf   : > { %v696_v18 = vadd.f32 %v695_v13, %v460_v12 }
  0xe0   : > { %v1076_v14 = vadd.f32 %v1913_v49, %v1040_v11 }
  0xe2   : > { %v1108_v15 = vmax.f32 %v1076_v14, 0.0 }
  0xe3   : > { %v1986_v19 = vpop.f32.mrf.mxu3 }
  0xe4   : > { %v1140_v17 = vpack.c.bf16 %v1108_v15, %v1108_v15 }
  0xe5   : > { %v974_v20 = vpop.f32.mrf.mxu2  ;;  %v463_v22 = vpop.f32.mrf.mxu0 }
  0xe6   : > { %1173 = vst.msk [vmem:[%s1920_s20 + $0x20] sm:$0xf] %vm1164_vm1, %v1140_v17  ;;  %v1041_v21 = vadd.f32 %v974_v20, %v696_v18  ;;  %v698_v23 = vpop.f32.mrf.mxu1 }
  0xe7   : > { %v699_v26 = vadd.f32 %v698_v23, %v463_v22 }
  0xe8   : > { %v1077_v24 = vadd.f32 %v1913_v49, %v1041_v21 }
  0xea   : > { %v1109_v25 = vmax.f32 %v1077_v24, 0.0 }
  0xeb   : > { %v1991_v28 = vpop.f32.mrf.mxu3 }
  0xec   : > { %v1141_v27 = vpack.c.bf16 %v1109_v25, %v1109_v25 }
  0xed   : > { %v977_v30 = vpop.f32.mrf.mxu2  ;;  %v465_v32 = vpop.f32.mrf.mxu0 }
  0xee   : > { %1174 = vst.msk [vmem:[%s1920_s20 + $0x24] sm:$0xf] %vm1164_vm1, %v1141_v27  ;;  %v1042_v31 = vadd.f32 %v977_v30, %v699_v26  ;;  %v700_v33 = vpop.f32.mrf.mxu1  ;;  %v734_v30 = vadd.f32 %v1981_v9, %v1908_v48  ;;  %v736_v48 = vadd.f32 %v1986_v19, %v1922_v58 }
  0xef   : > { %v701_v37 = vadd.f32 %v700_v33, %v465_v32 }
  0xf0   : > { %v1078_v34 = vadd.f32 %v1913_v49, %v1042_v31 }
  0xf2   : > { %v1110_v35 = vmax.f32 %v1078_v34, 0.0 }
  0xf3   : > { %v1996_v39 = vpop.f32.mrf.mxu3 }
  0xf4   : > { %v1142_v36 = vpack.c.bf16 %v1110_v35, %v1110_v35 }
  0xf5   : > { %v979_v40 = vpop.f32.mrf.mxu2  ;;  %v468_v42 = vpop.f32.mrf.mxu0 }
  0xf6   : > { %1175 = vst.msk [vmem:[%s1920_s20 + $0x28] sm:$0xf] %vm1164_vm1, %v1142_v36  ;;  %v1043_v41 = vadd.f32 %v979_v40, %v701_v37  ;;  %v703_v43 = vpop.f32.mrf.mxu1 }
  0xf7   : > { %v704_v46 = vadd.f32 %v703_v43, %v468_v42 }
  0xf8   : > { %v1079_v44 = vadd.f32 %v1913_v49, %v1043_v41 }
  0xfa   : > { %v1111_v45 = vmax.f32 %v1079_v44, 0.0 }
  0xfb   : > { %v2001_v50 = vpop.f32.mrf.mxu3 }
  0xfc   : > { %v1143_v47 = vpack.c.bf16 %v1111_v45, %v1111_v45 }
  0xfd   : > { %v982_v51 = vpop.f32.mrf.mxu2  ;;  %v470_v54 = vpop.f32.mrf.mxu0 }
  0xfe   : > { %1176 = vst.msk [vmem:[%s1920_s20 + $0x2c] sm:$0xf] %vm1164_vm1, %v1143_v47  ;;  %v1044_v52 = vadd.f32 %v982_v51, %v704_v46  ;;  %v705_v55 = vpop.f32.mrf.mxu1 }
  0xff   : > { %v706_v60 = vadd.f32 %v705_v55, %v470_v54 }
 0x100   : > { %v1080_v56 = vadd.f32 %v1913_v49, %v1044_v52 }
 0x102   : > { %v1112_v57 = vmax.f32 %v1080_v56, 0.0 }
 0x103   : > { %v2006_v61 = vpop.f32.mrf.mxu3 }
 0x104   : > { %v1144_v59 = vpack.c.bf16 %v1112_v57, %v1112_v57 }
 0x105   : > { %v984_v62 = vpop.f32.mrf.mxu2  ;;  %v473_v1 = vpop.f32.mrf.mxu0 }
 0x106   : > { %1177 = vst.msk [vmem:[%s1920_s20 + $0x30] sm:$0xf] %vm1164_vm1, %v1144_v59  ;;  %v1045_v0 = vadd.f32 %v984_v62, %v706_v60  ;;  %v708_v2 = vpop.f32.mrf.mxu1  ;;  %v739_v60 = vadd.f32 %v1991_v28, %v1935_v7  ;;  %v741_v28 = vadd.f32 %v1996_v39, %v1940_v16 }
 0x107   : > { %v709_v5 = vadd.f32 %v708_v2, %v473_v1 }
 0x108   : > { %v1081_v3 = vadd.f32 %v1913_v49, %v1045_v0 }
 0x10a   : > { %v1113_v4 = vmax.f32 %v1081_v3, 0.0 }
 0x10b   : > { %v2011_v8 = vpop.f32.mrf.mxu3 }
 0x10c   : > { %v1145_v6 = vpack.c.bf16 %v1113_v4, %v1113_v4 }
 0x10d   : > { %v987_v10 = vpop.f32.mrf.mxu2  ;;  %v475_v12 = vpop.f32.mrf.mxu0 }
 0x10e   : > { %1178 = vst.msk [vmem:[%s1920_s20 + $0x34] sm:$0xf] %vm1164_vm1, %v1145_v6  ;;  %v1046_v11 = vadd.f32 %v987_v10, %v709_v5  ;;  %v710_v13 = vpop.f32.mrf.mxu1 }
 0x10f   : > { %v711_v18 = vadd.f32 %v710_v13, %v475_v12 }
 0x110   : > { %v1082_v14 = vadd.f32 %v1913_v49, %v1046_v11 }
 0x112   : > { %v1114_v15 = vmax.f32 %v1082_v14, 0.0 }
 0x113   : > { %v2016_v20 = vpop.f32.mrf.mxu3 }
 0x114   : > { %v1146_v17 = vpack.c.bf16 %v1114_v15, %v1114_v15 }
 0x115   : > { %v989_v21 = vpop.f32.mrf.mxu2  ;;  %v478_v23 = vpop.f32.mrf.mxu0 }
 0x116   : > { %1179 = vst.msk [vmem:[%s1920_s20 + $0x38] sm:$0xf] %vm1164_vm1, %v1146_v17  ;;  %v1047_v22 = vadd.f32 %v989_v21, %v711_v18  ;;  %v713_v24 = vpop.f32.mrf.mxu1 }
 0x117   : > { %v714_v27 = vadd.f32 %v713_v24, %v478_v23 }
 0x118   : > { %v1083_v25 = vadd.f32 %v1913_v49, %v1047_v22 }
 0x11a   : > { %v1115_v26 = vmax.f32 %v1083_v25, 0.0 }
 0x11b   : > { %v1012_v32 = vpop.f32.mrf.mxu3 }
 0x11c   : > { %v1147_v31 = vpack.c.bf16 %v1115_v26, %v1115_v26  ;;  %v1056_v34 = vadd.f32 %v1012_v32, %v734_v30  ;;  %v744_v30 = vadd.f32 %v2001_v50, %v1953_v29  ;;  %v746_v50 = vadd.f32 %v2006_v61, %v1958_v38 }
 0x11d   : > { %v992_v33 = vpop.f32.mrf.mxu2  ;;  %v480_v36 = vpop.f32.mrf.mxu0 }
 0x11e   : > { %1180 = vst.msk [vmem:[%s1920_s20 + $0x3c] sm:$0xf] %vm1164_vm1, %v1147_v31  ;;  %v1048_v35 = vadd.f32 %v992_v33, %v714_v27  ;;  %v1092_v37 = vadd.f32 %v1913_v49, %v1056_v34  ;;  %v715_v40 = vpop.f32.mrf.mxu1 }
 0x11f   : > { %v716_v45 = vadd.f32 %v715_v40, %v480_v36 }
 0x120   : > { %v1084_v41 = vadd.f32 %v1913_v49, %v1048_v35  ;;  %v1124_v42 = vmax.f32 %v1092_v37, 0.0 }
 0x122   : > { %v1116_v43 = vmax.f32 %v1084_v41, 0.0  ;;  %v1156_v9 = vpack.c.bf16 %v1124_v42, %v1124_v42 }
 0x123   : > { %v1014_v46 = vpop.f32.mrf.mxu3 }
 0x124   : > { %v1148_v44 = vpack.c.bf16 %v1116_v43, %v1116_v43  ;;  %1189 = vst.msk [vmem:[%s1920_s20 + $0x60] sm:$0xf] %vm1164_vm1, %v1156_v9  ;;  %v1057_v51 = vadd.f32 %v1014_v46, %v736_v48 }
 0x125   : > { %v994_v47 = vpop.f32.mrf.mxu2  ;;  %v483_v54 = vpop.f32.mrf.mxu0 }
 0x126   : > { %1181 = vst.msk [vmem:[%s1920_s20 + $0x40] sm:$0xf] %vm1164_vm1, %v1148_v44  ;;  %v1049_v52 = vadd.f32 %v994_v47, %v716_v45  ;;  %v1093_v55 = vadd.f32 %v1913_v49, %v1057_v51  ;;  %v718_v56 = vpop.f32.mrf.mxu1 }
 0x127   : > { %v719_v59 = vadd.f32 %v718_v56, %v483_v54 }
 0x128   : > { %v1085_v57 = vadd.f32 %v1913_v49, %v1049_v52  ;;  %v1125_v58 = vmax.f32 %v1093_v55, 0.0 }
 0x12a   : > { %v1117_v19 = vmax.f32 %v1085_v57, 0.0  ;;  %v1157_v62 = vpack.c.bf16 %v1125_v58, %v1125_v58  ;;  %v749_v58 = vadd.f32 %v2011_v8, %v1971_v53  ;;  %v751_v8 = vadd.f32 %v2016_v20, %v1976_v63 }
 0x12b   : > { %v1017_v1 = vpop.f32.mrf.mxu3 }
 0x12c   : > { %v1149_v0 = vpack.c.bf16 %v1117_v19, %v1117_v19  ;;  %1190 = vst.msk [vmem:[%s1920_s20 + $0x64] sm:$0xf] %vm1164_vm1, %v1157_v62  ;;  %v1058_v3 = vadd.f32 %v1017_v1, %v739_v60 }
 0x12d   : > { %v997_v2 = vpop.f32.mrf.mxu2  ;;  %v485_v5 = vpop.f32.mrf.mxu0 }
 0x12e   : > { %1182 = vst.msk [vmem:[%s1920_s20 + $0x44] sm:$0xf] %vm1164_vm1, %v1149_v0  ;;  %v1050_v4 = vadd.f32 %v997_v2, %v719_v59  ;;  %v1094_v6 = vadd.f32 %v1913_v49, %v1058_v3  ;;  %v720_v10 = vpop.f32.mrf.mxu1 }
 0x12f   : > { %v721_v15 = vadd.f32 %v720_v10, %v485_v5 }
 0x130   : > { %v1086_v11 = vadd.f32 %v1913_v49, %v1050_v4  ;;  %v1126_v12 = vmax.f32 %v1094_v6, 0.0 }
 0x132   : > { %v1118_v7 = vmax.f32 %v1086_v11, 0.0  ;;  %v1158_v13 = vpack.c.bf16 %v1126_v12, %v1126_v12 }
 0x133   : > { %v1019_v17 = vpop.f32.mrf.mxu3 }
 0x134   : > { %v1150_v14 = vpack.c.bf16 %v1118_v7, %v1118_v7  ;;  %1191 = vst.msk [vmem:[%s1920_s20 + $0x68] sm:$0xf] %vm1164_vm1, %v1158_v13  ;;  %v1059_v21 = vadd.f32 %v1019_v17, %v741_v28 }
 0x135   : > { %v999_v18 = vpop.f32.mrf.mxu2  ;;  %v488_v23 = vpop.f32.mrf.mxu0 }
 0x136   : > { %1183 = vst.msk [vmem:[%s1920_s20 + $0x48] sm:$0xf] %vm1164_vm1, %v1150_v14  ;;  %v1051_v22 = vadd.f32 %v999_v18, %v721_v15  ;;  %v1095_v24 = vadd.f32 %v1913_v49, %v1059_v21  ;;  %v723_v25 = vpop.f32.mrf.mxu1 }
 0x137   : > { %v724_v27 = vadd.f32 %v723_v25, %v488_v23 }
 0x138   : > { %v1087_v26 = vadd.f32 %v1913_v49, %v1051_v22  ;;  %v1127_v16 = vmax.f32 %v1095_v24, 0.0 }
 0x13a   : > { %v1119_v39 = vmax.f32 %v1087_v26, 0.0  ;;  %v1159_v31 = vpack.c.bf16 %v1127_v16, %v1127_v16 }
 0x13b   : > { %v1022_v33 = vpop.f32.mrf.mxu3 }
 0x13c   : > { %v1151_v32 = vpack.c.bf16 %v1119_v39, %v1119_v39  ;;  %1192 = vst.msk [vmem:[%s1920_s20 + $0x6c] sm:$0xf] %vm1164_vm1, %v1159_v31  ;;  %v1060_v35 = vadd.f32 %v1022_v33, %v744_v30 }
 0x13d   : > { %v1002_v34 = vpop.f32.mrf.mxu2  ;;  %v490_v37 = vpop.f32.mrf.mxu0 }
 0x13e   : > { %1184 = vst.msk [vmem:[%s1920_s20 + $0x4c] sm:$0xf] %vm1164_vm1, %v1151_v32  ;;  %v1052_v36 = vadd.f32 %v1002_v34, %v724_v27  ;;  %v1096_v40 = vadd.f32 %v1913_v49, %v1060_v35  ;;  %v725_v41 = vpop.f32.mrf.mxu1 }
 0x13f   : > { %v726_v44 = vadd.f32 %v725_v41, %v490_v37 }
 0x140   : > { %v1088_v42 = vadd.f32 %v1913_v49, %v1052_v36  ;;  %v1128_v43 = vmax.f32 %v1096_v40, 0.0 }
 0x142   : > { %v1120_v29 = vmax.f32 %v1088_v42, 0.0  ;;  %v1160_v48 = vpack.c.bf16 %v1128_v43, %v1128_v43 }
 0x143   : > { %v1024_v45 = vpop.f32.mrf.mxu3 }
 0x144   : > { %v1152_v9 = vpack.c.bf16 %v1120_v29, %v1120_v29  ;;  %1193 = vst.msk [vmem:[%s1920_s20 + $0x70] sm:$0xf] %vm1164_vm1, %v1160_v48  ;;  %v1061_v47 = vadd.f32 %v1024_v45, %v746_v50 }
 0x145   : > { %v1004_v46 = vpop.f32.mrf.mxu2  ;;  %v493_v54 = vpop.f32.mrf.mxu0 }
 0x146   : > { %1185 = vst.msk [vmem:[%s1920_s20 + $0x50] sm:$0xf] %vm1164_vm1, %v1152_v9  ;;  %v1053_v51 = vadd.f32 %v1004_v46, %v726_v44  ;;  %v1097_v52 = vadd.f32 %v1913_v49, %v1061_v47  ;;  %v728_v55 = vpop.f32.mrf.mxu1 }
 0x147   : > { %v729_v57 = vadd.f32 %v728_v55, %v493_v54 }
 0x148   : > { %v1089_v56 = vadd.f32 %v1913_v49, %v1053_v51  ;;  %v1129_v38 = vmax.f32 %v1097_v52, 0.0 }
 0x14a   : > { %v1121_v61 = vmax.f32 %v1089_v56, 0.0  ;;  %v1161_v19 = vpack.c.bf16 %v1129_v38, %v1129_v38 }
 0x14b   : > { %v1027_v60 = vpop.f32.mrf.mxu3 }
 0x14c   : > { %v1153_v59 = vpack.c.bf16 %v1121_v61, %v1121_v61  ;;  %1194 = vst.msk [vmem:[%s1920_s20 + $0x74] sm:$0xf] %vm1164_vm1, %v1161_v19  ;;  %v1062_v0 = vadd.f32 %v1027_v60, %v749_v58 }
 0x14d   : > { %v1007_v62 = vpop.f32.mrf.mxu2  ;;  %v495_v5 = vpop.f32.mrf.mxu0 }
 0x14e   : > { %1186 = vst.msk [vmem:[%s1920_s20 + $0x54] sm:$0xf] %vm1164_vm1, %v1153_v59  ;;  %v1054_v1 = vadd.f32 %v1007_v62, %v729_v57  ;;  %v1098_v2 = vadd.f32 %v1913_v49, %v1062_v0  ;;  %v730_v6 = vpop.f32.mrf.mxu1 }
 0x14f   : > { %v731_v12 = vadd.f32 %v730_v6, %v495_v5 }
 0x150   : > { %v1090_v3 = vadd.f32 %v1913_v49, %v1054_v1  ;;  %v1130_v4 = vmax.f32 %v1098_v2, 0.0 }
 0x152   : > { %v1122_v53 = vmax.f32 %v1090_v3, 0.0  ;;  %v1162_v10 = vpack.c.bf16 %v1130_v4, %v1130_v4 }
 0x153   : > { %v1029_v7 = vpop.f32.mrf.mxu3 }
 0x154   : > { %v1154_v11 = vpack.c.bf16 %v1122_v53, %v1122_v53  ;;  %1195 = vst.msk [vmem:[%s1920_s20 + $0x78] sm:$0xf] %vm1164_vm1, %v1162_v10  ;;  %v1063_v13 = vadd.f32 %v1029_v7, %v751_v8 }
 0x155   : > { %v1009_v28 = vpop.f32.mrf.mxu2 }
 0x156   : > { %1187 = vst.msk [vmem:[%s1920_s20 + $0x58] sm:$0xf] %vm1164_vm1, %v1154_v11  ;;  %v1055_v14 = vadd.f32 %v1009_v28, %v731_v12  ;;  %v1099_v15 = vadd.f32 %v1913_v49, %v1063_v13 }
 0x158   : > { %v1091_v17 = vadd.f32 %v1913_v49, %v1055_v14  ;;  %v1131_v18 = vmax.f32 %v1099_v15, 0.0 }
 0x15a   : > { %v1123_v21 = vmax.f32 %v1091_v17, 0.0  ;;  %v1163_v63 = vpack.c.bf16 %v1131_v18, %v1131_v18 }
 0x15c   : > { %v1155_v20 = vpack.c.bf16 %v1123_v21, %v1123_v21  ;;  %1196 = vst.msk [vmem:[%s1920_s20 + $0x7c] sm:$0xf] %vm1164_vm1, %v1163_v63 }
 0x15e   : > { %1188 = vst.msk [vmem:[%s1920_s20 + $0x5c] sm:$0xf] %vm1164_vm1, %v1155_v20 }
 0x15f PF: > { %s13_s14 = sadd.s32 1, %s1761_s14   ;;  %s2100_s12 = smov %s1757_s13 }
 0x160   : > { %p10_p5 = scmp.ge.s32.totalorder %s13_s14, 4   ;;  %s2101_s13 = smov %s2103_s15 }
 0x162   :  { %12 = sbr.rel (!%p10_p5) target bundleno = 2 (0x2), region = 67 }

// kernel: ssd_forward.10
= control target key start
LH: loop header
LB: loop body
LE: loop exit
PB: predicated region body
PF: predicated region fallthrough
CT: control target
= control target key end

     0   :  { %vm315_vm0 = vcmask 261120   ;;  %vm519_vm1 = vcmask 519168   ;;  %s1086_s1 = inlined_call_operand.vmem [shape: bf16[288,64], index: 1, kind: input, shape index: {}]   ;;  %s1087_s0 = inlined_call_operand.vmem [shape: bf16[128,288], index: 0, kind: input, shape index: {}]   ;;  %s1088_s2 = inlined_call_operand.vmem [shape: f32[1,64], index: 2, kind: input, shape index: {}]   ;;  %s1089_s3 = inlined_call_operand.vmem [shape: bf16[128,64], index: 3, kind: output, shape index: {}]  }
   0x1   :  { %v747_v0 = vld [vmem:[%s1086_s1 + $0x38] sm:$0xff]  ;;  %v757_v1 = vld [vmem:[%s1086_s1 + $0x88] sm:$0xff]  ;;  %v746_v3 = vld [vmem:[%s1086_s1 + $0x30] sm:$0xff] }
   0x2   :  { %v755_v2 = vld [vmem:[%s1086_s1 + $0x78] sm:$0xff]  ;;  %340 = vmatpush.bf16.msra.mxu0 %v747_v0  ;;  %758 = vmatpush.bf16.msra.mxu3 %v747_v0  ;;  %v756_v4 = vld [vmem:[%s1086_s1 + $0x80] sm:$0xff]  ;;  %v754_v5 = vld [vmem:[%s1086_s1 + $0x70] sm:$0xff] }
   0x3   :  { %444 = vmatpush.bf16.msra.mxu2 %v757_v1  ;;  %389 = vmatpush.bf16.msra.mxu1 %v755_v2  ;;  %v550_v6 = vld [vmem:[%s1087_s0 + $0x8] sm:$0xf]  ;;  %v718_v7 = vld [vmem:[%s1087_s0 + $0x10] sm:$0xf0]  ;;  %v744_v11 = vld [vmem:[%s1086_s1 + $0x20] sm:$0xff] }
   0x4   :  { %v551_v8 = vor.u32 %v718_v7, %v550_v6  ;;  %v745_v9 = vld [vmem:[%s1086_s1 + $0x28] sm:$0xff]  ;;  %v752_v12 = vld [vmem:[%s1086_s1 + $0x60] sm:$0xff]  ;;  %v743_v13 = vld [vmem:[%s1086_s1 + $0x18] sm:$0xff] }
   0x5   :  { %v753_v10 = vld [vmem:[%s1086_s1 + $0x68] sm:$0xff]  ;;  %v751_v14 = vld [vmem:[%s1086_s1 + $0x58] sm:$0xff]  ;;  %v742_v15 = vld [vmem:[%s1086_s1 + $0x10] sm:$0xff] }
   0x6   :  { %341 = vmatpush.bf16.msra.mxu0 %v746_v3  ;;  %759 = vmatpush.bf16.msra.mxu3 %v746_v3  ;;  %v750_v16 = vld [vmem:[%s1086_s1 + $0x50] sm:$0xff]  ;;  %v562_v17 = vld [vmem:[%s1087_s0 + $0x20] sm:$0xf]  ;;  %v721_v18 = vld [vmem:[%s1087_s0 + $0x28] sm:$0xf0] }
   0x7   :  { %445 = vmatpush.bf16.msra.mxu2 %v756_v4  ;;  %390 = vmatpush.bf16.msra.mxu1 %v754_v5  ;;  %v563_v19 = vor.u32 %v721_v18, %v562_v17  ;;  %v741_v20 = vld [vmem:[%s1086_s1 + $0x8] sm:$0xff]  ;;  %v740_v22 = vld [vmem:[%s1086_s1] sm:$0xff]  ;;  %v614_v26 = vld [vmem:[%s1087_s0 + $0x90] sm:$0xf] }
   0x8   :  { %v749_v21 = vld [vmem:[%s1086_s1 + $0x48] sm:$0xff]  ;;  %v748_v23 = vld [vmem:[%s1086_s1 + $0x40] sm:$0xff]  ;;  %v735_v27 = vld [vmem:[%s1087_s0 + $0x98] sm:$0xf0] }
   0x9   :  { %v542_v24 = vld [vmem:[%s1087_s0] sm:$0xf]  ;;  %v717_v25 = vld [vmem:[%s1087_s0 + $0x8] sm:$0xf0]  ;;  %v716_v28 = vld [vmem:[%s1087_s0 + $0x4] sm:$0xf]  ;;  %v615_v31 = vor.u32 %v735_v27, %v614_v26 }
   0xa   :  { %708 = vmatmul.msk.bf16.vlgmr.msra.gmra.mxu2 %vm315_vm0, %v551_v8  ;;  %342 = vmatpush.bf16.msra.mxu0 %v745_v9  ;;  %v544_v29 = vld [vmem:[%s1087_s0 + $0xc] sm:$0xf0]  ;;  %v543_v30 = vor.u32 %v717_v25, %v542_v24  ;;  %v574_v33 = vld [vmem:[%s1087_s0 + $0x38] sm:$0xf]  ;;  %v724_v34 = vld [vmem:[%s1087_s0 + $0x40] sm:$0xf0] }
   0xb   :  { %760 = vmatpush.bf16.msra.mxu3 %v745_v9  ;;  %391 = vmatpush.bf16.msra.mxu1 %v753_v10  ;;  %v547_v32 = vor.u32 %v716_v28, %v544_v29  ;;  %v575_v35 = vor.u32 %v724_v34, %v574_v33  ;;  %v554_v36 = vld [vmem:[%s1087_s0 + $0x18] sm:$0xf]  ;;  %v720_v37 = vld [vmem:[%s1087_s0 + $0x20] sm:$0xf0]  ;;  %v626_v38 = vld [vmem:[%s1087_s0 + $0xa8] sm:$0xf] }
   0xc   :  { %v738_v39 = vld [vmem:[%s1087_s0 + $0xb0] sm:$0xf0]  ;;  %v719_v40 = vld [vmem:[%s1087_s0 + $0x1c] sm:$0xf]  ;;  %v556_v41 = vld [vmem:[%s1087_s0 + $0x24] sm:$0xf0]  ;;  %v555_v42 = vor.u32 %v720_v37, %v554_v36 }
   0xd   :  { %v627_v43 = vor.u32 %v738_v39, %v626_v38  ;;  %v559_v44 = vor.u32 %v719_v40, %v556_v41  ;;  %v586_v45 = vld [vmem:[%s1087_s0 + $0x50] sm:$0xf]  ;;  %v727_v46 = vld [vmem:[%s1087_s0 + $0x58] sm:$0xf0]  ;;  %v734_v50 = vld [vmem:[%s1087_s0 + $0x94] sm:$0xf] }
   0xe   :  { %343 = vmatpush.bf16.msra.mxu0 %v744_v11  ;;  %v587_v47 = vor.u32 %v727_v46, %v586_v45  ;;  %v566_v48 = vld [vmem:[%s1087_s0 + $0x30] sm:$0xf]  ;;  %v723_v49 = vld [vmem:[%s1087_s0 + $0x38] sm:$0xf0]  ;;  %v616_v51 = vld [vmem:[%s1087_s0 + $0x9c] sm:$0xf0] }
   0xf   :  { %761 = vmatpush.bf16.msra.mxu3 %v744_v11  ;;  %392 = vmatpush.bf16.msra.mxu1 %v752_v12  ;;  %v722_v52 = vld [vmem:[%s1087_s0 + $0x34] sm:$0xf]  ;;  %v568_v53 = vld [vmem:[%s1087_s0 + $0x3c] sm:$0xf0]  ;;  %v567_v54 = vor.u32 %v723_v49, %v566_v48  ;;  %v619_v55 = vor.u32 %v734_v50, %v616_v51  ;;  %v598_v57 = vld [vmem:[%s1087_s0 + $0x68] sm:$0xf] }
  0x10   :  { %v571_v56 = vor.u32 %v722_v52, %v568_v53  ;;  %v730_v58 = vld [vmem:[%s1087_s0 + $0x70] sm:$0xf0]  ;;  %v578_v60 = vld [vmem:[%s1087_s0 + $0x48] sm:$0xf]  ;;  %v737_v62 = vld [vmem:[%s1087_s0 + $0xac] sm:$0xf] }
  0x11   :  { %v599_v59 = vor.u32 %v730_v58, %v598_v57  ;;  %v726_v61 = vld [vmem:[%s1087_s0 + $0x50] sm:$0xf0]  ;;  %v628_v63 = vld [vmem:[%s1087_s0 + $0xb4] sm:$0xf0]  ;;  %v725_v0 = vld [vmem:[%s1087_s0 + $0x4c] sm:$0xf] }
  0x12   :  { %344 = vmatpush.bf16.msra.mxu0 %v743_v13  ;;  %v580_v1 = vld [vmem:[%s1087_s0 + $0x54] sm:$0xf0]  ;;  %v631_v3 = vor.u32 %v737_v62, %v628_v63  ;;  %v733_v6 = vld [vmem:[%s1087_s0 + $0x88] sm:$0xf0]  ;;  %v590_v8 = vld [vmem:[%s1087_s0 + $0x60] sm:$0xf] }
  0x13   :  { %762 = vmatpush.bf16.msra.mxu3 %v743_v13  ;;  %393 = vmatpush.bf16.msra.mxu1 %v751_v14  ;;  %v583_v4 = vor.u32 %v725_v0, %v580_v1  ;;  %v729_v9 = vld [vmem:[%s1087_s0 + $0x68] sm:$0xf0]  ;;  %v592_v11 = vld [vmem:[%s1087_s0 + $0x6c] sm:$0xf0]  ;;  %v602_v17 = vld [vmem:[%s1087_s0 + $0x78] sm:$0xf] }
  0x14   :  { %v732_v18 = vld [vmem:[%s1087_s0 + $0x80] sm:$0xf0]  ;;  %v739_v24 = vld [vmem:[%s1087_s0 + $0xb8] sm:$0xf0]  ;;  %v1004_v28 = vld [vmem:[%s1088_s2] ss:$0 sm:$0xff] }
  0x16   :  { %345 = vmatpush.bf16.msra.mxu0 %v742_v15 }
  0x17   :  { %763 = vmatpush.bf16.msra.mxu3 %v742_v15  ;;  %394 = vmatpush.bf16.msra.mxu1 %v750_v16  ;;  %v736_v15 = vld [vmem:[%s1087_s0 + $0xa0] sm:$0xf0] }
  0x1a   :  { %709 = vmatmul.msk.bf16.gmra.mxu2 %vm315_vm0, %v563_v19  ;;  %346 = vmatpush.bf16.msra.mxu0 %v741_v20  ;;  %v731_v19 = vld [vmem:[%s1087_s0 + $0x7c] sm:$0xf] }
  0x1b   :  { %764 = vmatpush.bf16.msra.mxu3 %v741_v20  ;;  %395 = vmatpush.bf16.msra.mxu1 %v749_v21  ;;  %v604_v20 = vld [vmem:[%s1087_s0 + $0x84] sm:$0xf0] }
  0x1e   :  { %347 = vmatpush.bf16.msra.mxu0 %v740_v22 }
  0x1f   :  { %765 = vmatpush.bf16.msra.mxu3 %v740_v22  ;;  %396 = vmatpush.bf16.msra.mxu1 %v748_v23  ;;  %v607_v22 = vor.u32 %v731_v19, %v604_v20 }
  0x21   :  { %348 = vmatmul.bf16.vlgmr.msra.gmra.mxu0 %v543_v30 }
  0x22   :  { %378 = vmatmul.bf16.vlgmr.msra.gmra.mxu3 %v615_v31  ;;  %397 = vmatmul.bf16.vlgmr.msra.gmra.mxu1 %v547_v32 }
  0x23   :  { %766 = vmatpush.bf16.msrb.mxu3 %v755_v2  ;;  %v579_v2 = vor.u32 %v726_v61, %v578_v60 }
  0x27   :  { %767 = vmatpush.bf16.msrb.mxu3 %v754_v5  ;;  %v610_v5 = vld [vmem:[%s1087_s0 + $0x80] sm:$0xf] }
  0x28   :  { %v611_v7 = vor.u32 %v733_v6, %v610_v5 }
  0x2a   :  { %710 = vmatmul.msk.bf16.gmra.mxu2 %vm315_vm0, %v575_v35 }
  0x2b   :  { %768 = vmatpush.bf16.msrb.mxu3 %v753_v10  ;;  %v728_v10 = vld [vmem:[%s1087_s0 + $0x64] sm:$0xf] }
  0x2c   :  { %v595_v13 = vor.u32 %v728_v10, %v592_v11 }
  0x2f   :  { %769 = vmatpush.bf16.msrb.mxu3 %v752_v12  ;;  %v591_v12 = vor.u32 %v729_v9, %v590_v8 }
  0x31   :  { %353 = vmatmul.bf16.gmra.mxu0 %v555_v42 }
  0x32   :  { %383 = vmatmul.bf16.gmra.mxu3 %v627_v43  ;;  %402 = vmatmul.bf16.gmra.mxu1 %v559_v44 }
  0x33   :  { %770 = vmatpush.bf16.msrb.mxu3 %v751_v14  ;;  %v622_v14 = vld [vmem:[%s1087_s0 + $0x98] sm:$0xf] }
  0x37   :  { %771 = vmatpush.bf16.msrb.mxu3 %v750_v16  ;;  %v623_v16 = vor.u32 %v736_v15, %v622_v14 }
  0x3a   :  { %711 = vmatmul.msk.bf16.gmra.mxu2 %vm315_vm0, %v587_v47 }
  0x3b   :  { %772 = vmatpush.bf16.msrb.mxu3 %v749_v21  ;;  %v603_v21 = vor.u32 %v732_v18, %v602_v17 }
  0x3f   :  { %773 = vmatpush.bf16.msrb.mxu3 %v748_v23  ;;  %v634_v23 = vld [vmem:[%s1087_s0 + $0xb0] sm:$0xf] }
  0x40   :  { %v635_v25 = vor.u32 %v739_v24, %v634_v23 }
  0x41   :  { %358 = vmatmul.bf16.gmra.mxu0 %v567_v54 }
  0x42   :  { %427 = vmatmul.bf16.vlgmr.msrb.gmra.mxu3 %v619_v55  ;;  %407 = vmatmul.bf16.gmra.mxu1 %v571_v56 }
  0x4a   :  { %712 = vmatmul.msk.bf16.gmra.mxu2 %vm315_vm0, %v599_v59 }
  0x51   :  { %363 = vmatmul.bf16.gmra.mxu0 %v579_v2 }
  0x52   :  { %432 = vmatmul.bf16.gmra.mxu3 %v631_v3  ;;  %412 = vmatmul.bf16.gmra.mxu1 %v583_v4 }
  0x5a   :  { %713 = vmatmul.msk.bf16.gmra.mxu2 %vm315_vm0, %v611_v7 }
  0x61   :  { %368 = vmatmul.bf16.gmra.mxu0 %v591_v12 }
  0x62   :  { %417 = vmatmul.bf16.gmra.mxu1 %v595_v13 }
  0x6a   :  { %714 = vmatmul.msk.bf16.gmra.mxu2 %vm315_vm0, %v623_v16 }
  0x71   :  { %373 = vmatmul.bf16.gmra.mxu0 %v603_v21 }
  0x72   :  { %422 = vmatmul.bf16.gmra.mxu1 %v607_v22 }
  0x7a   :  { %715 = vmatmul.msk.bf16.gmra.mxu2 %vm315_vm0, %v635_v25 }
  0x8d   :  { %v447_v26 = vpop.f32.mrf.mxu2 }
  0x95   :  { %v449_v27 = vpop.f32.mrf.mxu2 }
  0x9d   :  { %v452_v29 = vpop.f32.mrf.mxu2 }
  0x9e   :  { %v349_v30 = vpop.f32.mrf.mxu0 }
  0x9f   :  { %v350_v31 = vadd.f32 %v1004_v28, %v349_v30  ;;  %v398_v32 = vpop.f32.mrf.mxu1 }
  0xa1   :  { %v399_v33 = vadd.f32 %v398_v32, %v350_v31 }
  0xa3   :  { %v448_v34 = vadd.f32 %v447_v26, %v399_v33 }
  0xa5   :  { %v487_v35 = vmax.f32 %v448_v34, 0.0  ;;  %v454_v36 = vpop.f32.mrf.mxu2  ;;  %v379_v58 = vpop.f32.mrf.mxu3 }
  0xa6   :  { %v351_v37 = vpop.f32.mrf.mxu0 }
  0xa7   :  { %v503_v38 = vpack.c.bf16 %v487_v35, %v487_v35  ;;  %v352_v39 = vadd.f32 %v1004_v28, %v351_v37  ;;  %v400_v40 = vpop.f32.mrf.mxu1 }
  0xa9   :  { %520 = vst.msk [vmem:[%s1089_s3] sm:$0xf] %vm519_vm1, %v503_v38  ;;  %v401_v41 = vadd.f32 %v400_v40, %v352_v39 }
  0xab   :  { %v450_v42 = vadd.f32 %v449_v27, %v401_v41 }
  0xad   :  { %v488_v43 = vmax.f32 %v450_v42, 0.0  ;;  %v457_v44 = vpop.f32.mrf.mxu2  ;;  %v381_v4 = vpop.f32.mrf.mxu3 }
  0xae   :  { %v354_v45 = vpop.f32.mrf.mxu0 }
  0xaf   :  { %v504_v46 = vpack.c.bf16 %v488_v43, %v488_v43  ;;  %v355_v47 = vadd.f32 %v1004_v28, %v354_v45  ;;  %v403_v48 = vpop.f32.mrf.mxu1 }
  0xb1   :  { %521 = vst.msk [vmem:[%s1089_s3 + $0x4] sm:$0xf] %vm519_vm1, %v504_v46  ;;  %v404_v49 = vadd.f32 %v403_v48, %v355_v47  ;;  %v380_v47 = vadd.f32 %v1004_v28, %v379_v58 }
  0xb3   :  { %v453_v50 = vadd.f32 %v452_v29, %v404_v49 }
  0xb5   :  { %v489_v51 = vmax.f32 %v453_v50, 0.0  ;;  %v459_v52 = vpop.f32.mrf.mxu2  ;;  %v384_v16 = vpop.f32.mrf.mxu3 }
  0xb6   :  { %v356_v53 = vpop.f32.mrf.mxu0 }
  0xb7   :  { %v505_v54 = vpack.c.bf16 %v489_v51, %v489_v51  ;;  %v357_v55 = vadd.f32 %v1004_v28, %v356_v53  ;;  %v405_v56 = vpop.f32.mrf.mxu1 }
  0xb9   :  { %522 = vst.msk [vmem:[%s1089_s3 + $0x8] sm:$0xf] %vm519_vm1, %v505_v54  ;;  %v406_v57 = vadd.f32 %v405_v56, %v357_v55 }
  0xbb   :  { %v455_v59 = vadd.f32 %v454_v36, %v406_v57 }
  0xbd   :  { %v490_v60 = vmax.f32 %v455_v59, 0.0  ;;  %v462_v61 = vpop.f32.mrf.mxu2  ;;  %v386_v29 = vpop.f32.mrf.mxu3 }
  0xbe   :  { %v359_v62 = vpop.f32.mrf.mxu0 }
  0xbf   :  { %v506_v63 = vpack.c.bf16 %v490_v60, %v490_v60  ;;  %v360_v0 = vadd.f32 %v1004_v28, %v359_v62  ;;  %v408_v1 = vpop.f32.mrf.mxu1  ;;  %v382_v60 = vadd.f32 %v1004_v28, %v381_v4 }
  0xc1   :  { %523 = vst.msk [vmem:[%s1089_s3 + $0xc] sm:$0xf] %vm519_vm1, %v506_v63  ;;  %v409_v2 = vadd.f32 %v408_v1, %v360_v0 }
  0xc3   :  { %v458_v3 = vadd.f32 %v457_v44, %v409_v2 }
  0xc5   :  { %v491_v5 = vmax.f32 %v458_v3, 0.0  ;;  %v464_v6 = vpop.f32.mrf.mxu2  ;;  %v428_v39 = vpop.f32.mrf.mxu3 }
  0xc6   :  { %v361_v7 = vpop.f32.mrf.mxu0  ;;  %v429_v50 = vadd.f32 %v428_v39, %v380_v47 }
  0xc7   :  { %v507_v8 = vpack.c.bf16 %v491_v5, %v491_v5  ;;  %v362_v9 = vadd.f32 %v1004_v28, %v361_v7  ;;  %v410_v10 = vpop.f32.mrf.mxu1 }
  0xc9   :  { %524 = vst.msk [vmem:[%s1089_s3 + $0x10] sm:$0xf] %vm519_vm1, %v507_v8  ;;  %v411_v11 = vadd.f32 %v410_v10, %v362_v9  ;;  %v385_v9 = vadd.f32 %v1004_v28, %v384_v16  ;;  %v387_v16 = vadd.f32 %v1004_v28, %v386_v29 }
  0xcb   :  { %v460_v12 = vadd.f32 %v459_v52, %v411_v11 }
  0xcd   :  { %v492_v13 = vmax.f32 %v460_v12, 0.0  ;;  %v467_v14 = vpop.f32.mrf.mxu2  ;;  %v430_v51 = vpop.f32.mrf.mxu3 }
  0xce   :  { %v364_v15 = vpop.f32.mrf.mxu0  ;;  %v431_v0 = vadd.f32 %v430_v51, %v382_v60 }
  0xcf   :  { %v508_v17 = vpack.c.bf16 %v492_v13, %v492_v13  ;;  %v365_v18 = vadd.f32 %v1004_v28, %v364_v15  ;;  %v413_v19 = vpop.f32.mrf.mxu1 }
  0xd1   :  { %525 = vst.msk [vmem:[%s1089_s3 + $0x14] sm:$0xf] %vm519_vm1, %v508_v17  ;;  %v414_v20 = vadd.f32 %v413_v19, %v365_v18 }
  0xd3   :  { %v463_v21 = vadd.f32 %v462_v61, %v414_v20 }
  0xd5   :  { %v493_v22 = vmax.f32 %v463_v21, 0.0  ;;  %v469_v23 = vpop.f32.mrf.mxu2  ;;  %v433_v4 = vpop.f32.mrf.mxu3 }
  0xd6   :  { %v366_v24 = vpop.f32.mrf.mxu0 }
  0xd7   :  { %v509_v25 = vpack.c.bf16 %v493_v22, %v493_v22  ;;  %v367_v26 = vadd.f32 %v1004_v28, %v366_v24  ;;  %v415_v27 = vpop.f32.mrf.mxu1 }
  0xd9   :  { %526 = vst.msk [vmem:[%s1089_s3 + $0x18] sm:$0xf] %vm519_vm1, %v509_v25  ;;  %v416_v30 = vadd.f32 %v415_v27, %v367_v26 }
  0xdb   :  { %v465_v31 = vadd.f32 %v464_v6, %v416_v30 }
  0xdd   :  { %v494_v32 = vmax.f32 %v465_v31, 0.0  ;;  %v472_v33 = vpop.f32.mrf.mxu2  ;;  %v435_v21 = vpop.f32.mrf.mxu3 }
  0xde   :  { %v369_v34 = vpop.f32.mrf.mxu0 }
  0xdf   :  { %v510_v35 = vpack.c.bf16 %v494_v32, %v494_v32  ;;  %v370_v36 = vadd.f32 %v1004_v28, %v369_v34  ;;  %v418_v37 = vpop.f32.mrf.mxu1 }
  0xe1   :  { %527 = vst.msk [vmem:[%s1089_s3 + $0x1c] sm:$0xf] %vm519_vm1, %v510_v35  ;;  %v419_v38 = vadd.f32 %v418_v37, %v370_v36 }
  0xe3   :  { %v468_v40 = vadd.f32 %v467_v14, %v419_v38  ;;  %v434_v14 = vadd.f32 %v433_v4, %v385_v9 }
  0xe5   :  { %v495_v41 = vmax.f32 %v468_v40, 0.0  ;;  %v474_v42 = vpop.f32.mrf.mxu2 }
  0xe6   :  { %v371_v43 = vpop.f32.mrf.mxu0 }
  0xe7   :  { %v511_v44 = vpack.c.bf16 %v495_v41, %v495_v41  ;;  %v372_v45 = vadd.f32 %v1004_v28, %v371_v43  ;;  %v420_v46 = vpop.f32.mrf.mxu1 }
  0xe9   :  { %528 = vst.msk [vmem:[%s1089_s3 + $0x20] sm:$0xf] %vm519_vm1, %v511_v44  ;;  %v421_v48 = vadd.f32 %v420_v46, %v372_v45 }
  0xeb   :  { %v470_v49 = vadd.f32 %v469_v23, %v421_v48  ;;  %v436_v23 = vadd.f32 %v435_v21, %v387_v16 }
  0xed   :  { %v496_v52 = vmax.f32 %v470_v49, 0.0  ;;  %v477_v53 = vpop.f32.mrf.mxu2 }
  0xee   :  { %v478_v54 = vadd.f32 %v477_v53, %v429_v50  ;;  %v374_v55 = vpop.f32.mrf.mxu0 }
  0xef   :  { %v512_v56 = vpack.c.bf16 %v496_v52, %v496_v52  ;;  %v375_v57 = vadd.f32 %v1004_v28, %v374_v55  ;;  %v423_v59 = vpop.f32.mrf.mxu1 }
  0xf0   :  { %v499_v58 = vmax.f32 %v478_v54, 0.0 }
  0xf1   :  { %529 = vst.msk [vmem:[%s1089_s3 + $0x24] sm:$0xf] %vm519_vm1, %v512_v56  ;;  %v424_v61 = vadd.f32 %v423_v59, %v375_v57 }
  0xf2   :  { %v515_v62 = vpack.c.bf16 %v499_v58, %v499_v58 }
  0xf3   :  { %v473_v63 = vadd.f32 %v472_v33, %v424_v61 }
  0xf4   :  { %532 = vst.msk [vmem:[%s1089_s3 + $0x30] sm:$0xf] %vm519_vm1, %v515_v62 }
  0xf5   :  { %v497_v1 = vmax.f32 %v473_v63, 0.0  ;;  %v479_v2 = vpop.f32.mrf.mxu2 }
  0xf6   :  { %v480_v3 = vadd.f32 %v479_v2, %v431_v0  ;;  %v376_v5 = vpop.f32.mrf.mxu0 }
  0xf7   :  { %v513_v6 = vpack.c.bf16 %v497_v1, %v497_v1  ;;  %v377_v7 = vadd.f32 %v1004_v28, %v376_v5  ;;  %v425_v8 = vpop.f32.mrf.mxu1 }
  0xf8   :  { %v500_v10 = vmax.f32 %v480_v3, 0.0 }
  0xf9   :  { %530 = vst.msk [vmem:[%s1089_s3 + $0x28] sm:$0xf] %vm519_vm1, %v513_v6  ;;  %v426_v11 = vadd.f32 %v425_v8, %v377_v7 }
  0xfa   :  { %v516_v12 = vpack.c.bf16 %v500_v10, %v500_v10 }
  0xfb   :  { %v475_v13 = vadd.f32 %v474_v42, %v426_v11 }
  0xfc   :  { %533 = vst.msk [vmem:[%s1089_s3 + $0x34] sm:$0xf] %vm519_vm1, %v516_v12 }
  0xfd   :  { %v498_v15 = vmax.f32 %v475_v13, 0.0  ;;  %v482_v17 = vpop.f32.mrf.mxu2 }
  0xfe   :  { %v483_v18 = vadd.f32 %v482_v17, %v434_v14 }
  0xff   :  { %v514_v19 = vpack.c.bf16 %v498_v15, %v498_v15 }
 0x100   :  { %v501_v20 = vmax.f32 %v483_v18, 0.0 }
 0x101   :  { %531 = vst.msk [vmem:[%s1089_s3 + $0x2c] sm:$0xf] %vm519_vm1, %v514_v19 }
 0x102   :  { %v517_v22 = vpack.c.bf16 %v501_v20, %v501_v20 }
 0x104   :  { %534 = vst.msk [vmem:[%s1089_s3 + $0x38] sm:$0xf] %vm519_vm1, %v517_v22 }
 0x105   :  { %v484_v24 = vpop.f32.mrf.mxu2 }
 0x106   :  { %v485_v25 = vadd.f32 %v484_v24, %v436_v23 }
 0x108   :  { %v502_v26 = vmax.f32 %v485_v25, 0.0 }
 0x10a   :  { %v518_v27 = vpack.c.bf16 %v502_v26, %v502_v26 }
 0x10c   :  { %535 = vst.msk [vmem:[%s1089_s3 + $0x3c] sm:$0xf] %vm519_vm1, %v518_v27 }

// kernel: ssd_forward.13
= control target key start
LH: loop header
LB: loop body
LE: loop exit
PB: predicated region body
PF: predicated region fallthrough
CT: control target
= control target key end

     0   :  { %vm555_vm0 = vcmask 523264   ;;  %vm841_vm1 = vcmask 519168   ;;  %s1772_s1 = inlined_call_operand.vmem [shape: bf16[576,64], index: 1, kind: input, shape index: {}]   ;;  %s1773_s2 = inlined_call_operand.vmem [shape: f32[1,64], index: 2, kind: input, shape index: {}]   ;;  %s1774_s0 = inlined_call_operand.vmem [shape: bf16[128,576], index: 0, kind: input, shape index: {}]   ;;  %s1775_s3 = inlined_call_operand.vmem [shape: bf16[128,64], index: 3, kind: output, shape index: {}]  }
   0x1   :  { %v1221_v0 = vld [vmem:[%s1772_s1 + $0x38] sm:$0xff]  ;;  %v1220_v1 = vld [vmem:[%s1772_s1 + $0x30] sm:$0xff]  ;;  %v1219_v2 = vld [vmem:[%s1772_s1 + $0x28] sm:$0xff] }
   0x2   :  { %1250 = vmatpush.bf16.msra.mxu1 %v1221_v0  ;;  %1251 = vmatpush.bf16.msra.mxu2 %v1221_v0  ;;  %v1218_v3 = vld [vmem:[%s1772_s1 + $0x20] sm:$0xff]  ;;  %v1217_v4 = vld [vmem:[%s1772_s1 + $0x18] sm:$0xff]  ;;  %v1216_v5 = vld [vmem:[%s1772_s1 + $0x10] sm:$0xff] }
   0x3   :  { %1252 = vmatpush.bf16.msra.mxu3 %v1221_v0  ;;  %580 = vmatpush.bf16.msra.mxu0 %v1221_v0  ;;  %v1215_v6 = vld [vmem:[%s1772_s1 + $0x8] sm:$0xff]  ;;  %v1214_v7 = vld [vmem:[%s1772_s1] sm:$0xff]  ;;  %v904_v8 = vld [vmem:[%s1774_s0 + $0x50] sm:$0xf] }
   0x4   :  { %v1186_v9 = vld [vmem:[%s1774_s0 + $0x60] sm:$0xf0]  ;;  %v944_v10 = vld [vmem:[%s1774_s0 + $0xa0] sm:$0xf]  ;;  %v1196_v11 = vld [vmem:[%s1774_s0 + $0xb0] sm:$0xf0] }
   0x5   :  { %v984_v12 = vld [vmem:[%s1774_s0 + $0xf0] sm:$0xf]  ;;  %v1206_v13 = vld [vmem:[%s1774_s0 + $0x100] sm:$0xf0]  ;;  %v864_v14 = vld [vmem:[%s1774_s0] sm:$0xf]  ;;  %v905_v18 = vor.u32 %v1186_v9, %v904_v8  ;;  %v945_v19 = vor.u32 %v1196_v11, %v944_v10 }
   0x6   :  { %1253 = vmatpush.bf16.msra.mxu1 %v1220_v1  ;;  %1254 = vmatpush.bf16.msra.mxu2 %v1220_v1  ;;  %v1176_v15 = vld [vmem:[%s1774_s0 + $0x10] sm:$0xf0]  ;;  %v1237_v16 = vld [vmem:[%s1772_s1 + $0xb8] sm:$0xff]  ;;  %v985_v20 = vor.u32 %v1206_v13, %v984_v12  ;;  %v1235_v28 = vld [vmem:[%s1772_s1 + $0xa8] sm:$0xff] }
   0x7   :  { %1255 = vmatpush.bf16.msra.mxu3 %v1220_v1  ;;  %581 = vmatpush.bf16.msra.mxu0 %v1220_v1  ;;  %v1229_v17 = vld [vmem:[%s1772_s1 + $0x78] sm:$0xff]  ;;  %v865_v21 = vor.u32 %v1176_v15, %v864_v14  ;;  %v1236_v24 = vld [vmem:[%s1772_s1 + $0xb0] sm:$0xff]  ;;  %v1227_v29 = vld [vmem:[%s1772_s1 + $0x68] sm:$0xff] }
   0x8   :  { %v1245_v22 = vld [vmem:[%s1772_s1 + $0xf8] sm:$0xff]  ;;  %v1228_v25 = vld [vmem:[%s1772_s1 + $0x70] sm:$0xff]  ;;  %v1243_v30 = vld [vmem:[%s1772_s1 + $0xe8] sm:$0xff] }
   0x9   :  { %v1249_v23 = vld [vmem:[%s1772_s1 + $0x118] sm:$0xff]  ;;  %v1244_v26 = vld [vmem:[%s1772_s1 + $0xf0] sm:$0xff]  ;;  %v1247_v31 = vld [vmem:[%s1772_s1 + $0x108] sm:$0xff] }
   0xa   :  { %1256 = vmatpush.bf16.msra.mxu1 %v1219_v2  ;;  %1257 = vmatpush.bf16.msra.mxu2 %v1219_v2  ;;  %v1248_v27 = vld [vmem:[%s1772_s1 + $0x110] sm:$0xff]  ;;  %v1234_v32 = vld [vmem:[%s1772_s1 + $0xa0] sm:$0xff]  ;;  %v924_v35 = vld [vmem:[%s1774_s0 + $0x78] sm:$0xf] }
   0xb   :  { %1258 = vmatpush.bf16.msra.mxu3 %v1219_v2  ;;  %582 = vmatpush.bf16.msra.mxu0 %v1219_v2  ;;  %v1226_v33 = vld [vmem:[%s1772_s1 + $0x60] sm:$0xff]  ;;  %v1191_v36 = vld [vmem:[%s1774_s0 + $0x88] sm:$0xf0]  ;;  %v964_v37 = vld [vmem:[%s1774_s0 + $0xc8] sm:$0xf] }
   0xc   :  { %v1242_v34 = vld [vmem:[%s1772_s1 + $0xe0] sm:$0xff]  ;;  %v1201_v38 = vld [vmem:[%s1774_s0 + $0xd8] sm:$0xf0]  ;;  %v1004_v39 = vld [vmem:[%s1774_s0 + $0x118] sm:$0xf]  ;;  %v925_v46 = vor.u32 %v1191_v36, %v924_v35 }
   0xd   :  { %v1211_v40 = vld [vmem:[%s1774_s0 + $0x128] sm:$0xf0]  ;;  %v884_v41 = vld [vmem:[%s1774_s0 + $0x28] sm:$0xf]  ;;  %v1181_v42 = vld [vmem:[%s1774_s0 + $0x38] sm:$0xf0]  ;;  %v965_v47 = vor.u32 %v1201_v38, %v964_v37 }
   0xe   :  { %1259 = vmatpush.bf16.msra.mxu1 %v1218_v3  ;;  %1260 = vmatpush.bf16.msra.mxu2 %v1218_v3  ;;  %v1246_v43 = vld [vmem:[%s1772_s1 + $0x100] sm:$0xff]  ;;  %v1233_v44 = vld [vmem:[%s1772_s1 + $0x98] sm:$0xff]  ;;  %v1005_v48 = vor.u32 %v1211_v40, %v1004_v39  ;;  %v885_v49 = vor.u32 %v1181_v42, %v884_v41  ;;  %v1232_v51 = vld [vmem:[%s1772_s1 + $0x90] sm:$0xff] }
   0xf   :  { %1261 = vmatpush.bf16.msra.mxu3 %v1218_v3  ;;  %583 = vmatpush.bf16.msra.mxu0 %v1218_v3  ;;  %v1225_v45 = vld [vmem:[%s1772_s1 + $0x58] sm:$0xff]  ;;  %v1224_v52 = vld [vmem:[%s1772_s1 + $0x50] sm:$0xff]  ;;  %v1231_v54 = vld [vmem:[%s1772_s1 + $0x88] sm:$0xff] }
  0x10   :  { %v1241_v50 = vld [vmem:[%s1772_s1 + $0xd8] sm:$0xff]  ;;  %v1240_v53 = vld [vmem:[%s1772_s1 + $0xd0] sm:$0xff]  ;;  %v1223_v55 = vld [vmem:[%s1772_s1 + $0x48] sm:$0xff] }
  0x11   :  { %v1239_v56 = vld [vmem:[%s1772_s1 + $0xc8] sm:$0xff]  ;;  %v1230_v57 = vld [vmem:[%s1772_s1 + $0x80] sm:$0xff]  ;;  %v866_v61 = vld [vmem:[%s1774_s0 + $0x14] sm:$0xf0] }
  0x12   :  { %1262 = vmatpush.bf16.msra.mxu1 %v1217_v4  ;;  %1263 = vmatpush.bf16.msra.mxu2 %v1217_v4  ;;  %v1222_v58 = vld [vmem:[%s1772_s1 + $0x40] sm:$0xff]  ;;  %v872_v62 = vld [vmem:[%s1774_s0 + $0x8] sm:$0xf]  ;;  %v1177_v63 = vld [vmem:[%s1774_s0 + $0x18] sm:$0xf0] }
  0x13   :  { %1264 = vmatpush.bf16.msra.mxu3 %v1217_v4  ;;  %584 = vmatpush.bf16.msra.mxu0 %v1217_v4  ;;  %v1238_v59 = vld [vmem:[%s1772_s1 + $0xc0] sm:$0xff]  ;;  %v1175_v0 = vld [vmem:[%s1774_s0 + $0xc] sm:$0xf]  ;;  %v880_v2 = vld [vmem:[%s1774_s0 + $0x10] sm:$0xf] }
  0x14   :  { %v1174_v60 = vld [vmem:[%s1774_s0 + $0x4] sm:$0xf]  ;;  %v874_v1 = vld [vmem:[%s1774_s0 + $0x1c] sm:$0xf0]  ;;  %v1179_v8 = vld [vmem:[%s1774_s0 + $0x2c] sm:$0xf] }
  0x15   :  { %v1178_v3 = vld [vmem:[%s1774_s0 + $0x20] sm:$0xf0]  ;;  %v869_v4 = vor.u32 %v1174_v60, %v866_v61  ;;  %v886_v9 = vld [vmem:[%s1774_s0 + $0x3c] sm:$0xf0]  ;;  %v892_v10 = vld [vmem:[%s1774_s0 + $0x30] sm:$0xf] }
  0x16   :  { %1265 = vmatpush.bf16.msra.mxu1 %v1216_v5  ;;  %1266 = vmatpush.bf16.msra.mxu2 %v1216_v5  ;;  %v1182_v11 = vld [vmem:[%s1774_s0 + $0x40] sm:$0xf0]  ;;  %v1180_v12 = vld [vmem:[%s1774_s0 + $0x34] sm:$0xf]  ;;  %v894_v13 = vld [vmem:[%s1774_s0 + $0x44] sm:$0xf0] }
  0x17   :  { %1267 = vmatpush.bf16.msra.mxu3 %v1216_v5  ;;  %585 = vmatpush.bf16.msra.mxu0 %v1216_v5  ;;  %v873_v5 = vor.u32 %v1177_v63, %v872_v62  ;;  %v900_v14 = vld [vmem:[%s1774_s0 + $0x38] sm:$0xf]  ;;  %v1183_v15 = vld [vmem:[%s1774_s0 + $0x48] sm:$0xf0]  ;;  %v1192_v35 = vld [vmem:[%s1774_s0 + $0x90] sm:$0xf0] }
  0x18   :  { %v1190_v36 = vld [vmem:[%s1774_s0 + $0x84] sm:$0xf]  ;;  %v934_v37 = vld [vmem:[%s1774_s0 + $0x94] sm:$0xf0]  ;;  %v940_v38 = vld [vmem:[%s1774_s0 + $0x88] sm:$0xf] }
  0x19   :  { %v1193_v39 = vld [vmem:[%s1774_s0 + $0x98] sm:$0xf0]  ;;  %v937_v42 = vor.u32 %v1190_v36, %v934_v37  ;;  %v1200_v60 = vld [vmem:[%s1774_s0 + $0xd4] sm:$0xf]  ;;  %v974_v61 = vld [vmem:[%s1774_s0 + $0xe4] sm:$0xf0] }
  0x1a   :  { %1268 = vmatpush.bf16.msra.mxu1 %v1215_v6  ;;  %1269 = vmatpush.bf16.msra.mxu2 %v1215_v6  ;;  %v980_v62 = vld [vmem:[%s1774_s0 + $0xd8] sm:$0xf]  ;;  %v1203_v63 = vld [vmem:[%s1774_s0 + $0xe8] sm:$0xf0] }
  0x1b   :  { %1270 = vmatpush.bf16.msra.mxu3 %v1215_v6  ;;  %586 = vmatpush.bf16.msra.mxu0 %v1215_v6  ;;  %v877_v6 = vor.u32 %v1175_v0, %v874_v1 }
  0x1e   :  { %1271 = vmatpush.bf16.msra.mxu1 %v1214_v7  ;;  %1272 = vmatpush.bf16.msra.mxu2 %v1214_v7 }
  0x1f   :  { %1273 = vmatpush.bf16.msra.mxu3 %v1214_v7  ;;  %587 = vmatpush.bf16.msra.mxu0 %v1214_v7  ;;  %v881_v7 = vor.u32 %v1178_v3, %v880_v2  ;;  %v977_v2 = vor.u32 %v1200_v60, %v974_v61  ;;  %v981_v3 = vor.u32 %v1203_v63, %v980_v62 }
  0x21   :  { %598 = vmatmul.bf16.vlgmr.msra.gmra.mxu1 %v905_v18  ;;  %608 = vmatmul.bf16.vlgmr.msra.gmra.mxu2 %v945_v19  ;;  %v897_v18 = vor.u32 %v1180_v12, %v894_v13  ;;  %v901_v19 = vor.u32 %v1183_v15, %v900_v14 }
  0x22   :  { %678 = vmatpush.bf16.msrb.mxu2 %v1237_v16  ;;  %629 = vmatpush.bf16.msrb.mxu1 %v1229_v17  ;;  %v889_v16 = vor.u32 %v1179_v8, %v886_v9  ;;  %v893_v17 = vor.u32 %v1182_v11, %v892_v10  ;;  %v1205_v8 = vld [vmem:[%s1774_s0 + $0xfc] sm:$0xf]  ;;  %v994_v9 = vld [vmem:[%s1774_s0 + $0x10c] sm:$0xf0]  ;;  %v1000_v10 = vld [vmem:[%s1774_s0 + $0x100] sm:$0xf] }
  0x23   :  { %618 = vmatmul.bf16.vlgmr.msra.gmra.mxu3 %v985_v20  ;;  %588 = vmatmul.bf16.vlgmr.msra.gmra.mxu0 %v865_v21  ;;  %v1184_v20 = vld [vmem:[%s1774_s0 + $0x54] sm:$0xf]  ;;  %v906_v21 = vld [vmem:[%s1774_s0 + $0x64] sm:$0xf0]  ;;  %v997_v15 = vor.u32 %v1205_v8, %v994_v9 }
  0x24   :  { %727 = vmatpush.bf16.msrb.mxu3 %v1245_v22  ;;  %780 = vmatpush.bf16.msrb.mxu0 %v1249_v23  ;;  %v912_v22 = vld [vmem:[%s1774_s0 + $0x58] sm:$0xf]  ;;  %v1187_v23 = vld [vmem:[%s1774_s0 + $0x68] sm:$0xf0]  ;;  %v1208_v11 = vld [vmem:[%s1774_s0 + $0x110] sm:$0xf0] }
  0x26   :  { %679 = vmatpush.bf16.msrb.mxu2 %v1236_v24  ;;  %630 = vmatpush.bf16.msrb.mxu1 %v1228_v25  ;;  %v1185_v24 = vld [vmem:[%s1774_s0 + $0x5c] sm:$0xf]  ;;  %v914_v25 = vld [vmem:[%s1774_s0 + $0x6c] sm:$0xf0] }
  0x28   :  { %728 = vmatpush.bf16.msrb.mxu3 %v1244_v26  ;;  %781 = vmatpush.bf16.msrb.mxu0 %v1248_v27  ;;  %v920_v26 = vld [vmem:[%s1774_s0 + $0x60] sm:$0xf]  ;;  %v1188_v27 = vld [vmem:[%s1774_s0 + $0x70] sm:$0xf0] }
  0x2a   :  { %680 = vmatpush.bf16.msrb.mxu2 %v1235_v28  ;;  %631 = vmatpush.bf16.msrb.mxu1 %v1227_v29  ;;  %v909_v28 = vor.u32 %v1184_v20, %v906_v21  ;;  %v913_v29 = vor.u32 %v1187_v23, %v912_v22 }
  0x2c   :  { %729 = vmatpush.bf16.msrb.mxu3 %v1243_v30  ;;  %782 = vmatpush.bf16.msrb.mxu0 %v1247_v31  ;;  %v917_v30 = vor.u32 %v1185_v24, %v914_v25  ;;  %v921_v31 = vor.u32 %v1188_v27, %v920_v26  ;;  %v1209_v25 = vld [vmem:[%s1774_s0 + $0x11c] sm:$0xf]  ;;  %v1006_v26 = vld [vmem:[%s1774_s0 + $0x12c] sm:$0xf0]  ;;  %v1012_v27 = vld [vmem:[%s1774_s0 + $0x120] sm:$0xf] }
  0x2d   :  { %v1009_v36 = vor.u32 %v1209_v25, %v1006_v26 }
  0x2e   :  { %681 = vmatpush.bf16.msrb.mxu2 %v1234_v32  ;;  %632 = vmatpush.bf16.msrb.mxu1 %v1226_v33  ;;  %v1189_v32 = vld [vmem:[%s1774_s0 + $0x7c] sm:$0xf]  ;;  %v926_v33 = vld [vmem:[%s1774_s0 + $0x8c] sm:$0xf0] }
  0x2f   :  { %v929_v40 = vor.u32 %v1189_v32, %v926_v33  ;;  %v1213_v32 = vld [vmem:[%s1774_s0 + $0x138] sm:$0xf0] }
  0x30   :  { %730 = vmatpush.bf16.msrb.mxu3 %v1242_v34  ;;  %783 = vmatpush.bf16.msrb.mxu0 %v1246_v43  ;;  %v932_v34 = vld [vmem:[%s1774_s0 + $0x80] sm:$0xf]  ;;  %v941_v43 = vor.u32 %v1193_v39, %v940_v38 }
  0x31   :  { %603 = vmatmul.bf16.gmra.mxu1 %v925_v46  ;;  %613 = vmatmul.bf16.gmra.mxu2 %v965_v47  ;;  %v933_v41 = vor.u32 %v1192_v35, %v932_v34  ;;  %v952_v46 = vld [vmem:[%s1774_s0 + $0xa8] sm:$0xf]  ;;  %v1197_v47 = vld [vmem:[%s1774_s0 + $0xb8] sm:$0xf0] }
  0x32   :  { %682 = vmatpush.bf16.msrb.mxu2 %v1233_v44  ;;  %633 = vmatpush.bf16.msrb.mxu1 %v1225_v45  ;;  %v1194_v44 = vld [vmem:[%s1774_s0 + $0xa4] sm:$0xf]  ;;  %v946_v45 = vld [vmem:[%s1774_s0 + $0xb4] sm:$0xf0] }
  0x33   :  { %623 = vmatmul.bf16.gmra.mxu3 %v1005_v48  ;;  %593 = vmatmul.bf16.gmra.mxu0 %v885_v49  ;;  %v1195_v48 = vld [vmem:[%s1774_s0 + $0xac] sm:$0xf]  ;;  %v954_v49 = vld [vmem:[%s1774_s0 + $0xbc] sm:$0xf0] }
  0x34   :  { %731 = vmatpush.bf16.msrb.mxu3 %v1241_v50  ;;  %v960_v50 = vld [vmem:[%s1774_s0 + $0xb0] sm:$0xf] }
  0x36   :  { %683 = vmatpush.bf16.msrb.mxu2 %v1232_v51  ;;  %634 = vmatpush.bf16.msrb.mxu1 %v1224_v52  ;;  %v1198_v51 = vld [vmem:[%s1774_s0 + $0xc0] sm:$0xf0]  ;;  %v949_v52 = vor.u32 %v1194_v44, %v946_v45 }
  0x38   :  { %732 = vmatpush.bf16.msrb.mxu3 %v1240_v53  ;;  %v953_v53 = vor.u32 %v1197_v47, %v952_v46 }
  0x3a   :  { %684 = vmatpush.bf16.msrb.mxu2 %v1231_v54  ;;  %635 = vmatpush.bf16.msrb.mxu1 %v1223_v55  ;;  %v957_v54 = vor.u32 %v1195_v48, %v954_v49  ;;  %v961_v55 = vor.u32 %v1198_v51, %v960_v50 }
  0x3c   :  { %733 = vmatpush.bf16.msrb.mxu3 %v1239_v56  ;;  %v1199_v56 = vld [vmem:[%s1774_s0 + $0xcc] sm:$0xf] }
  0x3e   :  { %685 = vmatpush.bf16.msrb.mxu2 %v1230_v57  ;;  %636 = vmatpush.bf16.msrb.mxu1 %v1222_v58  ;;  %v966_v57 = vld [vmem:[%s1774_s0 + $0xdc] sm:$0xf0]  ;;  %v972_v58 = vld [vmem:[%s1774_s0 + $0xd0] sm:$0xf] }
  0x3f   :  { %v969_v0 = vor.u32 %v1199_v56, %v966_v57 }
  0x40   :  { %734 = vmatpush.bf16.msrb.mxu3 %v1238_v59  ;;  %v1202_v59 = vld [vmem:[%s1774_s0 + $0xe0] sm:$0xf0] }
  0x41   :  { %637 = vmatmul.bf16.vlgmr.msrb.gmra.mxu1 %v869_v4  ;;  %686 = vmatmul.bf16.vlgmr.msrb.gmra.mxu2 %v873_v5  ;;  %v973_v1 = vor.u32 %v1202_v59, %v972_v58  ;;  %v1204_v4 = vld [vmem:[%s1774_s0 + $0xf4] sm:$0xf]  ;;  %v986_v5 = vld [vmem:[%s1774_s0 + $0x104] sm:$0xf0] }
  0x42   :  { %v989_v12 = vor.u32 %v1204_v4, %v986_v5 }
  0x43   :  { %735 = vmatmul.bf16.vlgmr.msrb.gmra.mxu3 %v877_v6  ;;  %1166 = vmatmul.msk.bf16.vlgmr.msrb.gmra.mxu0 %vm555_vm0, %v881_v7  ;;  %v992_v6 = vld [vmem:[%s1774_s0 + $0xf8] sm:$0xf]  ;;  %v1207_v7 = vld [vmem:[%s1774_s0 + $0x108] sm:$0xf0] }
  0x44   :  { %v993_v13 = vor.u32 %v1207_v7, %v992_v6 }
  0x51   :  { %642 = vmatmul.bf16.gmra.mxu1 %v889_v16  ;;  %691 = vmatmul.bf16.gmra.mxu2 %v893_v17  ;;  %v1001_v16 = vor.u32 %v1208_v11, %v1000_v10 }
  0x53   :  { %740 = vmatmul.bf16.gmra.mxu3 %v897_v18  ;;  %1167 = vmatmul.msk.bf16.gmra.mxu0 %vm555_vm0, %v901_v19  ;;  %v1631_v18 = vld [vmem:[%s1773_s2] ss:$0 sm:$0xff] }
  0x61   :  { %647 = vmatmul.bf16.gmra.mxu1 %v909_v28  ;;  %696 = vmatmul.bf16.gmra.mxu2 %v913_v29  ;;  %v1212_v28 = vld [vmem:[%s1774_s0 + $0x130] sm:$0xf0]  ;;  %v1210_v29 = vld [vmem:[%s1774_s0 + $0x124] sm:$0xf] }
  0x62   :  { %v1013_v37 = vor.u32 %v1212_v28, %v1012_v27 }
  0x63   :  { %745 = vmatmul.bf16.gmra.mxu3 %v917_v30  ;;  %1168 = vmatmul.msk.bf16.gmra.mxu0 %vm555_vm0, %v921_v31  ;;  %v1014_v30 = vld [vmem:[%s1774_s0 + $0x134] sm:$0xf0]  ;;  %v1020_v31 = vld [vmem:[%s1774_s0 + $0x128] sm:$0xf] }
  0x71   :  { %652 = vmatmul.bf16.gmra.mxu1 %v929_v40  ;;  %701 = vmatmul.bf16.gmra.mxu2 %v933_v41  ;;  %v1017_v40 = vor.u32 %v1210_v29, %v1014_v30  ;;  %v1021_v41 = vor.u32 %v1213_v32, %v1020_v31 }
  0x73   :  { %750 = vmatmul.bf16.gmra.mxu3 %v937_v42  ;;  %1169 = vmatmul.msk.bf16.gmra.mxu0 %vm555_vm0, %v941_v43 }
  0x81   :  { %657 = vmatmul.bf16.gmra.mxu1 %v949_v52  ;;  %706 = vmatmul.bf16.gmra.mxu2 %v953_v53 }
  0x83   :  { %755 = vmatmul.bf16.gmra.mxu3 %v957_v54  ;;  %1170 = vmatmul.msk.bf16.gmra.mxu0 %vm555_vm0, %v961_v55 }
  0x91   :  { %662 = vmatmul.bf16.gmra.mxu1 %v969_v0  ;;  %711 = vmatmul.bf16.gmra.mxu2 %v973_v1 }
  0x93   :  { %760 = vmatmul.bf16.gmra.mxu3 %v977_v2  ;;  %1171 = vmatmul.msk.bf16.gmra.mxu0 %vm555_vm0, %v981_v3 }
  0x9e   :  { %v1625_v14 = vpop.f32.mrf.mxu1 }
  0xa0   :  { %v589_v17 = vpop.f32.mrf.mxu0 }
  0xa1   :  { %667 = vmatmul.bf16.gmra.mxu1 %v989_v12  ;;  %716 = vmatmul.bf16.gmra.mxu2 %v993_v13  ;;  %v590_v55 = vadd.f32 %v1631_v18, %v589_v17 }
  0xa3   :  { %765 = vmatmul.bf16.gmra.mxu3 %v997_v15  ;;  %1172 = vmatmul.msk.bf16.gmra.mxu0 %vm555_vm0, %v1001_v16 }
  0xa4   :  { %v609_v19 = vpop.f32.mrf.mxu2 }
  0xa5   :  { %v1634_v20 = vadd.f32 %v1631_v18, %v609_v19 }
  0xa6   :  { %v619_v21 = vpop.f32.mrf.mxu3  ;;  %v1639_v23 = vpop.f32.mrf.mxu1 }
  0xa7   :  { %v1637_v22 = vadd.f32 %v1631_v18, %v619_v21 }
  0xa8   :  { %v591_v24 = vpop.f32.mrf.mxu0 }
  0xa9   :  { %v592_v63 = vadd.f32 %v1631_v18, %v591_v24 }
  0xac   :  { %v611_v33 = vpop.f32.mrf.mxu2 }
  0xad   :  { %v1666_v34 = vadd.f32 %v1631_v18, %v611_v33 }
  0xae   :  { %v621_v35 = vpop.f32.mrf.mxu3  ;;  %v1671_v39 = vpop.f32.mrf.mxu1 }
  0xaf   :  { %v1669_v38 = vadd.f32 %v1631_v18, %v621_v35  ;;  %v600_v35 = vadd.f32 %v1631_v18, %v1625_v14 }
  0xb0   :  { %v594_v42 = vpop.f32.mrf.mxu0 }
  0xb1   :  { %672 = vmatmul.bf16.gmra.mxu1 %v1009_v36  ;;  %721 = vmatmul.bf16.gmra.mxu2 %v1013_v37  ;;  %v595_v9 = vadd.f32 %v1631_v18, %v594_v42 }
  0xb3   :  { %770 = vmatmul.bf16.gmra.mxu3 %v1017_v40  ;;  %1173 = vmatmul.msk.bf16.gmra.mxu0 %vm555_vm0, %v1021_v41 }
  0xb4   :  { %v614_v43 = vpop.f32.mrf.mxu2 }
  0xb5   :  { %v1675_v44 = vadd.f32 %v1631_v18, %v614_v43 }
  0xb6   :  { %v624_v45 = vpop.f32.mrf.mxu3  ;;  %v1680_v47 = vpop.f32.mrf.mxu1 }
  0xb7   :  { %v1678_v46 = vadd.f32 %v1631_v18, %v624_v45 }
  0xb8   :  { %v596_v48 = vpop.f32.mrf.mxu0 }
  0xb9   :  { %v597_v24 = vadd.f32 %v1631_v18, %v596_v48 }
  0xbc   :  { %v616_v49 = vpop.f32.mrf.mxu2 }
  0xbd   :  { %v1683_v50 = vadd.f32 %v1631_v18, %v616_v49 }
  0xbe   :  { %v626_v51 = vpop.f32.mrf.mxu3  ;;  %v638_v53 = vpop.f32.mrf.mxu1 }
  0xbf   :  { %v1686_v52 = vadd.f32 %v1631_v18, %v626_v51  ;;  %v639_v56 = vadd.f32 %v638_v53, %v590_v55  ;;  %v602_v51 = vadd.f32 %v1631_v18, %v1639_v23 }
  0xc0   :  { %v785_v54 = vpop.f32.mrf.mxu0 }
  0xc4   :  { %v687_v57 = vpop.f32.mrf.mxu2 }
  0xc5   :  { %v688_v58 = vadd.f32 %v687_v57, %v639_v56 }
  0xc6   :  { %v736_v59 = vpop.f32.mrf.mxu3  ;;  %v640_v60 = vpop.f32.mrf.mxu1 }
  0xc7   :  { %v737_v61 = vadd.f32 %v736_v59, %v688_v58  ;;  %v641_v2 = vadd.f32 %v640_v60, %v592_v63 }
  0xc8   :  { %v787_v62 = vpop.f32.mrf.mxu0 }
  0xc9   :  { %v786_v0 = vadd.f32 %v785_v54, %v737_v61  ;;  %v605_v61 = vadd.f32 %v1631_v18, %v1671_v39 }
  0xcb   :  { %v825_v1 = vpack.c.bf16 %v786_v0, %v786_v0 }
  0xcc   :  { %v689_v3 = vpop.f32.mrf.mxu2 }
  0xcd   :  { %842 = vst.msk [vmem:[%s1775_s3] sm:$0xf] %vm841_vm1, %v825_v1  ;;  %v690_v4 = vadd.f32 %v689_v3, %v641_v2 }
  0xce   :  { %v738_v5 = vpop.f32.mrf.mxu3  ;;  %v643_v6 = vpop.f32.mrf.mxu1 }
  0xcf   :  { %v739_v7 = vadd.f32 %v738_v5, %v690_v4  ;;  %v644_v12 = vadd.f32 %v643_v6, %v595_v9  ;;  %v607_v6 = vadd.f32 %v1631_v18, %v1680_v47 }
  0xd0   :  { %v790_v8 = vpop.f32.mrf.mxu0 }
  0xd1   :  { %v788_v10 = vadd.f32 %v787_v62, %v739_v7 }
  0xd3   :  { %v826_v11 = vpack.c.bf16 %v788_v10, %v788_v10 }
  0xd4   :  { %v692_v13 = vpop.f32.mrf.mxu2 }
  0xd5   :  { %843 = vst.msk [vmem:[%s1775_s3 + $0x4] sm:$0xf] %vm841_vm1, %v826_v11  ;;  %v693_v15 = vadd.f32 %v692_v13, %v644_v12 }
  0xd6   :  { %v741_v16 = vpop.f32.mrf.mxu3  ;;  %v645_v17 = vpop.f32.mrf.mxu1 }
  0xd7   :  { %v742_v19 = vadd.f32 %v741_v16, %v693_v15  ;;  %v646_v27 = vadd.f32 %v645_v17, %v597_v24 }
  0xd8   :  { %v792_v21 = vpop.f32.mrf.mxu0 }
  0xd9   :  { %v791_v25 = vadd.f32 %v790_v8, %v742_v19 }
  0xdb   :  { %v827_v26 = vpack.c.bf16 %v791_v25, %v791_v25 }
  0xdc   :  { %v694_v28 = vpop.f32.mrf.mxu2 }
  0xdd   :  { %844 = vst.msk [vmem:[%s1775_s3 + $0x8] sm:$0xf] %vm841_vm1, %v827_v26  ;;  %v695_v29 = vadd.f32 %v694_v28, %v646_v27 }
  0xde   :  { %v743_v30 = vpop.f32.mrf.mxu3  ;;  %v648_v31 = vpop.f32.mrf.mxu1 }
  0xdf   :  { %v744_v32 = vadd.f32 %v743_v30, %v695_v29  ;;  %v649_v40 = vadd.f32 %v648_v31, %v600_v35 }
  0xe0   :  { %v795_v33 = vpop.f32.mrf.mxu0 }
  0xe1   :  { %v793_v36 = vadd.f32 %v792_v21, %v744_v32 }
  0xe3   :  { %v828_v37 = vpack.c.bf16 %v793_v36, %v793_v36 }
  0xe4   :  { %v697_v41 = vpop.f32.mrf.mxu2 }
  0xe5   :  { %845 = vst.msk [vmem:[%s1775_s3 + $0xc] sm:$0xf] %vm841_vm1, %v828_v37  ;;  %v698_v42 = vadd.f32 %v697_v41, %v649_v40 }
  0xe6   :  { %v746_v43 = vpop.f32.mrf.mxu3  ;;  %v650_v45 = vpop.f32.mrf.mxu1 }
  0xe7   :  { %v747_v48 = vadd.f32 %v746_v43, %v698_v42  ;;  %v651_v14 = vadd.f32 %v650_v45, %v602_v51 }
  0xe8   :  { %v797_v49 = vpop.f32.mrf.mxu0 }
  0xe9   :  { %v796_v53 = vadd.f32 %v795_v33, %v747_v48 }
  0xeb   :  { %v829_v54 = vpack.c.bf16 %v796_v53, %v796_v53 }
  0xec   :  { %v699_v55 = vpop.f32.mrf.mxu2 }
  0xed   :  { %846 = vst.msk [vmem:[%s1775_s3 + $0x10] sm:$0xf] %vm841_vm1, %v829_v54  ;;  %v700_v56 = vadd.f32 %v699_v55, %v651_v14 }
  0xee   :  { %v748_v57 = vpop.f32.mrf.mxu3  ;;  %v653_v58 = vpop.f32.mrf.mxu1 }
  0xef   :  { %v749_v59 = vadd.f32 %v748_v57, %v700_v56  ;;  %v654_v23 = vadd.f32 %v653_v58, %v605_v61 }
  0xf0   :  { %v800_v60 = vpop.f32.mrf.mxu0 }
  0xf1   :  { %v798_v62 = vadd.f32 %v797_v49, %v749_v59 }
  0xf3   :  { %v830_v63 = vpack.c.bf16 %v798_v62, %v798_v62 }
  0xf4   :  { %v702_v0 = vpop.f32.mrf.mxu2 }
  0xf5   :  { %847 = vst.msk [vmem:[%s1775_s3 + $0x14] sm:$0xf] %vm841_vm1, %v830_v63  ;;  %v703_v1 = vadd.f32 %v702_v0, %v654_v23 }
  0xf6   :  { %v751_v2 = vpop.f32.mrf.mxu3  ;;  %v655_v3 = vpop.f32.mrf.mxu1 }
  0xf7   :  { %v752_v4 = vadd.f32 %v751_v2, %v703_v1  ;;  %v656_v39 = vadd.f32 %v655_v3, %v607_v6 }
  0xf8   :  { %v802_v5 = vpop.f32.mrf.mxu0 }
  0xf9   :  { %v801_v7 = vadd.f32 %v800_v60, %v752_v4 }
  0xfb   :  { %v831_v8 = vpack.c.bf16 %v801_v7, %v801_v7 }
  0xfc   :  { %v704_v9 = vpop.f32.mrf.mxu2 }
  0xfd   :  { %848 = vst.msk [vmem:[%s1775_s3 + $0x18] sm:$0xf] %vm841_vm1, %v831_v8  ;;  %v705_v10 = vadd.f32 %v704_v9, %v656_v39 }
  0xfe   :  { %v753_v11 = vpop.f32.mrf.mxu3  ;;  %v658_v12 = vpop.f32.mrf.mxu1 }
  0xff   :  { %v754_v13 = vadd.f32 %v753_v11, %v705_v10  ;;  %v659_v19 = vadd.f32 %v658_v12, %v1634_v20 }
 0x100   :  { %v805_v15 = vpop.f32.mrf.mxu0 }
 0x101   :  { %v803_v16 = vadd.f32 %v802_v5, %v754_v13 }
 0x103   :  { %v832_v17 = vpack.c.bf16 %v803_v16, %v803_v16 }
 0x104   :  { %v707_v21 = vpop.f32.mrf.mxu2 }
 0x105   :  { %849 = vst.msk [vmem:[%s1775_s3 + $0x1c] sm:$0xf] %vm841_vm1, %v832_v17  ;;  %v708_v18 = vadd.f32 %v707_v21, %v659_v19 }
 0x106   :  { %v756_v47 = vpop.f32.mrf.mxu3  ;;  %v660_v24 = vpop.f32.mrf.mxu1 }
 0x107   :  { %v757_v25 = vadd.f32 %v756_v47, %v708_v18  ;;  %v661_v29 = vadd.f32 %v660_v24, %v1666_v34 }
 0x108   :  { %v807_v26 = vpop.f32.mrf.mxu0 }
 0x109   :  { %v806_v27 = vadd.f32 %v805_v15, %v757_v25 }
 0x10b   :  { %v833_v28 = vpack.c.bf16 %v806_v27, %v806_v27 }
 0x10c   :  { %v709_v30 = vpop.f32.mrf.mxu2 }
 0x10d   :  { %850 = vst.msk [vmem:[%s1775_s3 + $0x20] sm:$0xf] %vm841_vm1, %v833_v28  ;;  %v710_v20 = vadd.f32 %v709_v30, %v661_v29 }
 0x10e   :  { %v758_v31 = vpop.f32.mrf.mxu3  ;;  %v663_v32 = vpop.f32.mrf.mxu1 }
 0x10f   :  { %v759_v33 = vadd.f32 %v758_v31, %v710_v20  ;;  %v664_v40 = vadd.f32 %v663_v32, %v1675_v44 }
 0x110   :  { %v810_v35 = vpop.f32.mrf.mxu0 }
 0x111   :  { %v808_v36 = vadd.f32 %v807_v26, %v759_v33 }
 0x113   :  { %v834_v37 = vpack.c.bf16 %v808_v36, %v808_v36 }
 0x114   :  { %v712_v41 = vpop.f32.mrf.mxu2 }
 0x115   :  { %851 = vst.msk [vmem:[%s1775_s3 + $0x24] sm:$0xf] %vm841_vm1, %v834_v37  ;;  %v713_v34 = vadd.f32 %v712_v41, %v664_v40 }
 0x116   :  { %v761_v42 = vpop.f32.mrf.mxu3  ;;  %v665_v43 = vpop.f32.mrf.mxu1 }
 0x117   :  { %v762_v45 = vadd.f32 %v761_v42, %v713_v34  ;;  %v666_v53 = vadd.f32 %v665_v43, %v1683_v50 }
 0x118   :  { %v812_v48 = vpop.f32.mrf.mxu0 }
 0x119   :  { %v811_v49 = vadd.f32 %v810_v35, %v762_v45 }
 0x11b   :  { %v835_v51 = vpack.c.bf16 %v811_v49, %v811_v49 }
 0x11c   :  { %v714_v54 = vpop.f32.mrf.mxu2 }
 0x11d   :  { %852 = vst.msk [vmem:[%s1775_s3 + $0x28] sm:$0xf] %vm841_vm1, %v835_v51  ;;  %v715_v44 = vadd.f32 %v714_v54, %v666_v53 }
 0x11e   :  { %v763_v14 = vpop.f32.mrf.mxu3  ;;  %v668_v55 = vpop.f32.mrf.mxu1 }
 0x11f   :  { %v764_v56 = vadd.f32 %v763_v14, %v715_v44  ;;  %v669_v60 = vadd.f32 %v668_v55, %v1637_v22 }
 0x120   :  { %v815_v58 = vpop.f32.mrf.mxu0 }
 0x121   :  { %v813_v57 = vadd.f32 %v812_v48, %v764_v56 }
 0x123   :  { %v836_v59 = vpack.c.bf16 %v813_v57, %v813_v57 }
 0x124   :  { %v717_v61 = vpop.f32.mrf.mxu2 }
 0x125   :  { %853 = vst.msk [vmem:[%s1775_s3 + $0x2c] sm:$0xf] %vm841_vm1, %v836_v59  ;;  %v718_v50 = vadd.f32 %v717_v61, %v669_v60 }
 0x126   :  { %v766_v62 = vpop.f32.mrf.mxu3  ;;  %v670_v63 = vpop.f32.mrf.mxu1 }
 0x127   :  { %v767_v23 = vadd.f32 %v766_v62, %v718_v50  ;;  %v671_v2 = vadd.f32 %v670_v63, %v1669_v38 }
 0x128   :  { %v817_v3 = vpop.f32.mrf.mxu0 }
 0x129   :  { %v816_v0 = vadd.f32 %v815_v58, %v767_v23 }
 0x12b   :  { %v837_v1 = vpack.c.bf16 %v816_v0, %v816_v0 }
 0x12c   :  { %v719_v4 = vpop.f32.mrf.mxu2 }
 0x12d   :  { %854 = vst.msk [vmem:[%s1775_s3 + $0x30] sm:$0xf] %vm841_vm1, %v837_v1  ;;  %v720_v22 = vadd.f32 %v719_v4, %v671_v2 }
 0x12e   :  { %v768_v5 = vpop.f32.mrf.mxu3  ;;  %v673_v6 = vpop.f32.mrf.mxu1 }
 0x12f   :  { %v769_v7 = vadd.f32 %v768_v5, %v720_v22  ;;  %v674_v9 = vadd.f32 %v673_v6, %v1678_v46 }
 0x130   :  { %v820_v12 = vpop.f32.mrf.mxu0 }
 0x131   :  { %v818_v8 = vadd.f32 %v817_v3, %v769_v7 }
 0x133   :  { %v838_v39 = vpack.c.bf16 %v818_v8, %v818_v8 }
 0x134   :  { %v722_v10 = vpop.f32.mrf.mxu2 }
 0x135   :  { %855 = vst.msk [vmem:[%s1775_s3 + $0x34] sm:$0xf] %vm841_vm1, %v838_v39  ;;  %v723_v38 = vadd.f32 %v722_v10, %v674_v9 }
 0x136   :  { %v771_v11 = vpop.f32.mrf.mxu3  ;;  %v675_v15 = vpop.f32.mrf.mxu1 }
 0x137   :  { %v772_v13 = vadd.f32 %v771_v11, %v723_v38  ;;  %v676_v19 = vadd.f32 %v675_v15, %v1686_v52 }
 0x138   :  { %v822_v24 = vpop.f32.mrf.mxu0 }
 0x139   :  { %v821_v16 = vadd.f32 %v820_v12, %v772_v13 }
 0x13b   :  { %v839_v17 = vpack.c.bf16 %v821_v16, %v821_v16 }
 0x13c   :  { %v724_v21 = vpop.f32.mrf.mxu2 }
 0x13d   :  { %856 = vst.msk [vmem:[%s1775_s3 + $0x38] sm:$0xf] %vm841_vm1, %v839_v17  ;;  %v725_v46 = vadd.f32 %v724_v21, %v676_v19 }
 0x13e   :  { %v773_v18 = vpop.f32.mrf.mxu3 }
 0x13f   :  { %v774_v47 = vadd.f32 %v773_v18, %v725_v46 }
 0x141   :  { %v823_v25 = vadd.f32 %v822_v24, %v774_v47 }
 0x143   :  { %v840_v26 = vpack.c.bf16 %v823_v25, %v823_v25 }
 0x145   :  { %857 = vst.msk [vmem:[%s1775_s3 + $0x3c] sm:$0xf] %vm841_vm1, %v840_v26 }

// kernel: ssd_forward.11
= control target key start
LH: loop header
LB: loop body
LE: loop exit
PB: predicated region body
PF: predicated region fallthrough
CT: control target
= control target key end

     0   :  { %vm369_vm0 = vcmask 523264   ;;  %vm479_vm1 = vcmask 519168   ;;  %s932_s1 = inlined_call_operand.vmem [shape: bf16[576,64], index: 1, kind: input, shape index: {}]   ;;  %s933_s2 = inlined_call_operand.vmem [shape: f32[1,64], index: 2, kind: input, shape index: {}]   ;;  %s934_s0 = inlined_call_operand.vmem [shape: bf16[32,576], index: 0, kind: input, shape index: {}]   ;;  %s935_s3 = inlined_call_operand.vmem [shape: bf16[32,64], index: 3, kind: output, shape index: {}]  }
   0x1   :  { %v691_v0 = vld [vmem:[%s932_s1 + $0x38] sm:$0xff]  ;;  %v690_v4 = vld [vmem:[%s932_s1 + $0x30] sm:$0xff]  ;;  %v689_v8 = vld [vmem:[%s932_s1 + $0x28] sm:$0xff] }
   0x2   :  { %v699_v1 = vld [vmem:[%s932_s1 + $0x78] sm:$0xff]  ;;  %376 = vmatpush.bf16.msra.mxu0 %v691_v0  ;;  %v698_v5 = vld [vmem:[%s932_s1 + $0x70] sm:$0xff]  ;;  %v697_v9 = vld [vmem:[%s932_s1 + $0x68] sm:$0xff] }
   0x3   :  { %v707_v2 = vld [vmem:[%s932_s1 + $0xb8] sm:$0xff]  ;;  %395 = vmatpush.bf16.msra.mxu1 %v699_v1  ;;  %v706_v6 = vld [vmem:[%s932_s1 + $0xb0] sm:$0xff]  ;;  %v705_v10 = vld [vmem:[%s932_s1 + $0xa8] sm:$0xff] }
   0x4   :  { %v715_v3 = vld [vmem:[%s932_s1 + $0xf8] sm:$0xff]  ;;  %414 = vmatpush.bf16.msra.mxu2 %v707_v2  ;;  %v714_v7 = vld [vmem:[%s932_s1 + $0xf0] sm:$0xff]  ;;  %v713_v11 = vld [vmem:[%s932_s1 + $0xe8] sm:$0xff] }
   0x5   :  { %433 = vmatpush.bf16.msra.mxu3 %v715_v3  ;;  %v688_v12 = vld [vmem:[%s932_s1 + $0x20] sm:$0xff]  ;;  %v687_v16 = vld [vmem:[%s932_s1 + $0x18] sm:$0xff]  ;;  %v686_v20 = vld [vmem:[%s932_s1 + $0x10] sm:$0xff] }
   0x6   :  { %377 = vmatpush.bf16.msra.mxu0 %v690_v4  ;;  %v696_v13 = vld [vmem:[%s932_s1 + $0x60] sm:$0xff]  ;;  %v695_v17 = vld [vmem:[%s932_s1 + $0x58] sm:$0xff]  ;;  %v694_v21 = vld [vmem:[%s932_s1 + $0x50] sm:$0xff] }
   0x7   :  { %396 = vmatpush.bf16.msra.mxu1 %v698_v5  ;;  %v704_v14 = vld [vmem:[%s932_s1 + $0xa0] sm:$0xff]  ;;  %v703_v18 = vld [vmem:[%s932_s1 + $0x98] sm:$0xff]  ;;  %v702_v22 = vld [vmem:[%s932_s1 + $0x90] sm:$0xff] }
   0x8   :  { %415 = vmatpush.bf16.msra.mxu2 %v706_v6  ;;  %v712_v15 = vld [vmem:[%s932_s1 + $0xe0] sm:$0xff]  ;;  %v711_v19 = vld [vmem:[%s932_s1 + $0xd8] sm:$0xff]  ;;  %v710_v23 = vld [vmem:[%s932_s1 + $0xd0] sm:$0xff] }
   0x9   :  { %434 = vmatpush.bf16.msra.mxu3 %v714_v7  ;;  %v685_v24 = vld [vmem:[%s932_s1 + $0x8] sm:$0xff]  ;;  %v684_v28 = vld [vmem:[%s932_s1] sm:$0xff]  ;;  %v676_v33 = vld [vmem:[%s934_s0 + $0x10] sm:$0xf0] }
   0xa   :  { %378 = vmatpush.bf16.msra.mxu0 %v689_v8  ;;  %v693_v25 = vld [vmem:[%s932_s1 + $0x48] sm:$0xff]  ;;  %v692_v29 = vld [vmem:[%s932_s1 + $0x40] sm:$0xff]  ;;  %v492_v35 = vld [vmem:[%s934_s0 + $0x14] sm:$0xf0] }
   0xb   :  { %397 = vmatpush.bf16.msra.mxu1 %v697_v9  ;;  %v701_v26 = vld [vmem:[%s932_s1 + $0x88] sm:$0xff]  ;;  %v700_v30 = vld [vmem:[%s932_s1 + $0x80] sm:$0xff]  ;;  %v677_v37 = vld [vmem:[%s934_s0 + $0x18] sm:$0xf0] }
   0xc   :  { %416 = vmatpush.bf16.msra.mxu2 %v705_v10  ;;  %v709_v27 = vld [vmem:[%s932_s1 + $0xc8] sm:$0xff]  ;;  %v708_v31 = vld [vmem:[%s932_s1 + $0xc0] sm:$0xff]  ;;  %v719_v40 = vld [vmem:[%s932_s1 + $0x118] sm:$0xff] }
   0xd   :  { %435 = vmatpush.bf16.msra.mxu3 %v713_v11  ;;  %v490_v32 = vld [vmem:[%s934_s0] sm:$0xf]  ;;  %v674_v34 = vld [vmem:[%s934_s0 + $0x4] sm:$0xf]  ;;  %v498_v36 = vld [vmem:[%s934_s0 + $0x8] sm:$0xf] }
   0xe   :  { %379 = vmatpush.bf16.msra.mxu0 %v688_v12  ;;  %v675_v38 = vld [vmem:[%s934_s0 + $0xc] sm:$0xf]  ;;  %v500_v39 = vld [vmem:[%s934_s0 + $0x1c] sm:$0xf0]  ;;  %v491_v41 = vor.u32 %v676_v33, %v490_v32  ;;  %v495_v42 = vor.u32 %v674_v34, %v492_v35  ;;  %v499_v43 = vor.u32 %v677_v37, %v498_v36  ;;  %v718_v45 = vld [vmem:[%s932_s1 + $0x110] sm:$0xff] }
   0xf   :  { %398 = vmatpush.bf16.msra.mxu1 %v696_v13  ;;  %v503_v44 = vor.u32 %v675_v38, %v500_v39  ;;  %v717_v46 = vld [vmem:[%s932_s1 + $0x108] sm:$0xff]  ;;  %v716_v47 = vld [vmem:[%s932_s1 + $0x100] sm:$0xff]  ;;  %v681_v49 = vld [vmem:[%s934_s0 + $0x38] sm:$0xf0] }
  0x10   :  { %417 = vmatpush.bf16.msra.mxu2 %v704_v14  ;;  %v510_v48 = vld [vmem:[%s934_s0 + $0x28] sm:$0xf]  ;;  %v679_v50 = vld [vmem:[%s934_s0 + $0x2c] sm:$0xf]  ;;  %v512_v51 = vld [vmem:[%s934_s0 + $0x3c] sm:$0xf0] }
  0x11   :  { %436 = vmatpush.bf16.msra.mxu3 %v712_v15  ;;  %v518_v52 = vld [vmem:[%s934_s0 + $0x30] sm:$0xf]  ;;  %v682_v53 = vld [vmem:[%s934_s0 + $0x40] sm:$0xf0]  ;;  %v680_v54 = vld [vmem:[%s934_s0 + $0x34] sm:$0xf]  ;;  %v511_v56 = vor.u32 %v681_v49, %v510_v48  ;;  %v515_v57 = vor.u32 %v679_v50, %v512_v51 }
  0x12   :  { %380 = vmatpush.bf16.msra.mxu0 %v687_v16  ;;  %v520_v55 = vld [vmem:[%s934_s0 + $0x44] sm:$0xf0]  ;;  %v519_v58 = vor.u32 %v682_v53, %v518_v52  ;;  %v506_v60 = vld [vmem:[%s934_s0 + $0x10] sm:$0xf]  ;;  %v678_v61 = vld [vmem:[%s934_s0 + $0x20] sm:$0xf0] }
  0x13   :  { %399 = vmatpush.bf16.msra.mxu1 %v695_v17  ;;  %v523_v59 = vor.u32 %v680_v54, %v520_v55  ;;  %v526_v62 = vld [vmem:[%s934_s0 + $0x38] sm:$0xf]  ;;  %v683_v63 = vld [vmem:[%s934_s0 + $0x48] sm:$0xf0]  ;;  %v507_v0 = vor.u32 %v678_v61, %v506_v60  ;;  %v724_v11 = vld [vmem:[%s933_s2] ss:$0 sm:$0xff] }
  0x14   :  { %418 = vmatpush.bf16.msra.mxu2 %v703_v18  ;;  %v527_v1 = vor.u32 %v683_v63, %v526_v62 }
  0x15   :  { %437 = vmatpush.bf16.msra.mxu3 %v711_v19 }
  0x16   :  { %381 = vmatpush.bf16.msra.mxu0 %v686_v20 }
  0x17   :  { %400 = vmatpush.bf16.msra.mxu1 %v694_v21 }
  0x18   :  { %419 = vmatpush.bf16.msra.mxu2 %v702_v22 }
  0x19   :  { %438 = vmatpush.bf16.msra.mxu3 %v710_v23 }
  0x1a   :  { %382 = vmatpush.bf16.msra.mxu0 %v685_v24 }
  0x1b   :  { %401 = vmatpush.bf16.msra.mxu1 %v693_v25 }
  0x1c   :  { %420 = vmatpush.bf16.msra.mxu2 %v701_v26 }
  0x1d   :  { %439 = vmatpush.bf16.msra.mxu3 %v709_v27 }
  0x1e   :  { %383 = vmatpush.bf16.msra.mxu0 %v684_v28 }
  0x1f   :  { %402 = vmatpush.bf16.msra.mxu1 %v692_v29 }
  0x20   :  { %421 = vmatpush.bf16.msra.mxu2 %v700_v30 }
  0x21   :  { %440 = vmatpush.bf16.msra.mxu3 %v708_v31  ;;  %384 = vmatmul.bf16.vlgmr.msra.gmra.mxu0 %v491_v41 }
  0x22   :  { %456 = vmatpush.bf16.msrb.mxu0 %v719_v40  ;;  %403 = vmatmul.bf16.vlgmr.msra.gmra.mxu1 %v495_v42 }
  0x23   :  { %720 = vmatpush.bf16.msrb.mxu1 %v719_v40  ;;  %422 = vmatmul.bf16.vlgmr.msra.gmra.mxu2 %v499_v43 }
  0x24   :  { %441 = vmatmul.bf16.vlgmr.msra.gmra.mxu3 %v503_v44 }
  0x26   :  { %457 = vmatpush.bf16.msrb.mxu0 %v718_v45 }
  0x27   :  { %721 = vmatpush.bf16.msrb.mxu1 %v718_v45 }
  0x2a   :  { %458 = vmatpush.bf16.msrb.mxu0 %v717_v46 }
  0x2b   :  { %722 = vmatpush.bf16.msrb.mxu1 %v717_v46 }
  0x2e   :  { %459 = vmatpush.bf16.msrb.mxu0 %v716_v47 }
  0x2f   :  { %723 = vmatpush.bf16.msrb.mxu1 %v716_v47 }
  0x31   :  { %389 = vmatmul.bf16.gmra.mxu0 %v511_v56 }
  0x32   :  { %408 = vmatmul.bf16.gmra.mxu1 %v515_v57 }
  0x33   :  { %427 = vmatmul.bf16.gmra.mxu2 %v519_v58 }
  0x34   :  { %446 = vmatmul.bf16.gmra.mxu3 %v523_v59 }
  0x41   :  { %672 = vmatmul.msk.bf16.vlgmr.msrb.gmra.mxu0 %vm369_vm0, %v507_v0 }
  0x42   :  { %673 = vmatmul.msk.bf16.vlgmr.msrb.gmra.mxu1 %vm369_vm0, %v527_v1 }
  0x9e   :  { %v385_v2 = vpop.f32.mrf.mxu0 }
  0x9f   :  { %v404_v3 = vpop.f32.mrf.mxu1  ;;  %v386_v13 = vadd.f32 %v724_v11, %v385_v2 }
  0xa1   :  { %v405_v18 = vadd.f32 %v404_v3, %v386_v13 }
  0xa6   :  { %v423_v4 = vpop.f32.mrf.mxu2  ;;  %v387_v6 = vpop.f32.mrf.mxu0 }
  0xa7   :  { %v442_v5 = vpop.f32.mrf.mxu3  ;;  %v406_v7 = vpop.f32.mrf.mxu1  ;;  %v424_v20 = vadd.f32 %v423_v4, %v405_v18  ;;  %v388_v23 = vadd.f32 %v724_v11, %v387_v6 }
  0xa9   :  { %v443_v25 = vadd.f32 %v442_v5, %v424_v20  ;;  %v407_v30 = vadd.f32 %v406_v7, %v388_v23 }
  0xae   :  { %v425_v8 = vpop.f32.mrf.mxu2  ;;  %v390_v9 = vpop.f32.mrf.mxu0 }
  0xaf   :  { %v409_v10 = vpop.f32.mrf.mxu1  ;;  %v444_v12 = vpop.f32.mrf.mxu3  ;;  %v391_v14 = vadd.f32 %v724_v11, %v390_v9  ;;  %v426_v34 = vadd.f32 %v425_v8, %v407_v30 }
  0xb1   :  { %v410_v19 = vadd.f32 %v409_v10, %v391_v14  ;;  %v445_v41 = vadd.f32 %v444_v12, %v426_v34 }
  0xb6   :  { %v428_v15 = vpop.f32.mrf.mxu2  ;;  %v392_v16 = vpop.f32.mrf.mxu0 }
  0xb7   :  { %v411_v17 = vpop.f32.mrf.mxu1  ;;  %v429_v21 = vadd.f32 %v428_v15, %v410_v19  ;;  %v447_v22 = vpop.f32.mrf.mxu3  ;;  %v393_v24 = vadd.f32 %v724_v11, %v392_v16 }
  0xb9   :  { %v448_v26 = vadd.f32 %v447_v22, %v429_v21  ;;  %v412_v31 = vadd.f32 %v411_v17, %v393_v24 }
  0xbe   :  { %v430_v27 = vpop.f32.mrf.mxu2  ;;  %v461_v28 = vpop.f32.mrf.mxu0 }
  0xbf   :  { %v466_v29 = vpop.f32.mrf.mxu1  ;;  %v462_v32 = vadd.f32 %v461_v28, %v443_v25  ;;  %v431_v35 = vadd.f32 %v430_v27, %v412_v31  ;;  %v449_v40 = vpop.f32.mrf.mxu3 }
  0xc0   :  { %v467_v33 = vadd.f32 %v466_v29, %v448_v26 }
  0xc1   :  { %v471_v36 = vmax.f32 %v462_v32, 0.0  ;;  %v450_v42 = vadd.f32 %v449_v40, %v431_v35 }
  0xc2   :  { %v473_v37 = vmax.f32 %v467_v33, 0.0 }
  0xc3   :  { %v475_v38 = vpack.c.bf16 %v471_v36, %v471_v36 }
  0xc4   :  { %v477_v39 = vpack.c.bf16 %v473_v37, %v473_v37 }
  0xc5   :  { %480 = vst.msk [vmem:[%s935_s3] sm:$0xf] %vm479_vm1, %v475_v38 }
  0xc6   :  { %482 = vst.msk [vmem:[%s935_s3 + $0x8] sm:$0xf] %vm479_vm1, %v477_v39  ;;  %v463_v43 = vpop.f32.mrf.mxu0 }
  0xc7   :  { %v468_v44 = vpop.f32.mrf.mxu1  ;;  %v464_v45 = vadd.f32 %v463_v43, %v445_v41 }
  0xc8   :  { %v469_v46 = vadd.f32 %v468_v44, %v450_v42 }
  0xc9   :  { %v472_v47 = vmax.f32 %v464_v45, 0.0 }
  0xca   :  { %v474_v48 = vmax.f32 %v469_v46, 0.0 }
  0xcb   :  { %v476_v49 = vpack.c.bf16 %v472_v47, %v472_v47 }
  0xcc   :  { %v478_v50 = vpack.c.bf16 %v474_v48, %v474_v48 }
  0xcd   :  { %481 = vst.msk [vmem:[%s935_s3 + $0x4] sm:$0xf] %vm479_vm1, %v476_v49 }
  0xce   :  { %483 = vst.msk [vmem:[%s935_s3 + $0xc] sm:$0xf] %vm479_vm1, %v478_v50 }

// kernel: ssd_forward.14
= control target key start
LH: loop header
LB: loop body
LE: loop exit
PB: predicated region body
PF: predicated region fallthrough
CT: control target
= control target key end

     0   :  { %vm369_vm0 = vcmask 523264   ;;  %vm475_vm1 = vcmask 519168   ;;  %s928_s1 = inlined_call_operand.vmem [shape: bf16[576,64], index: 1, kind: input, shape index: {}]   ;;  %s929_s2 = inlined_call_operand.vmem [shape: f32[1,64], index: 2, kind: input, shape index: {}]   ;;  %s930_s0 = inlined_call_operand.vmem [shape: bf16[32,576], index: 0, kind: input, shape index: {}]   ;;  %s931_s3 = inlined_call_operand.vmem [shape: bf16[32,64], index: 3, kind: output, shape index: {}]  }
   0x1   :  { %v687_v0 = vld [vmem:[%s928_s1 + $0x38] sm:$0xff]  ;;  %v686_v4 = vld [vmem:[%s928_s1 + $0x30] sm:$0xff]  ;;  %v685_v8 = vld [vmem:[%s928_s1 + $0x28] sm:$0xff] }
   0x2   :  { %v695_v1 = vld [vmem:[%s928_s1 + $0x78] sm:$0xff]  ;;  %376 = vmatpush.bf16.msra.mxu0 %v687_v0  ;;  %v694_v5 = vld [vmem:[%s928_s1 + $0x70] sm:$0xff]  ;;  %v693_v9 = vld [vmem:[%s928_s1 + $0x68] sm:$0xff] }
   0x3   :  { %v703_v2 = vld [vmem:[%s928_s1 + $0xb8] sm:$0xff]  ;;  %395 = vmatpush.bf16.msra.mxu1 %v695_v1  ;;  %v702_v6 = vld [vmem:[%s928_s1 + $0xb0] sm:$0xff]  ;;  %v701_v10 = vld [vmem:[%s928_s1 + $0xa8] sm:$0xff] }
   0x4   :  { %v711_v3 = vld [vmem:[%s928_s1 + $0xf8] sm:$0xff]  ;;  %414 = vmatpush.bf16.msra.mxu2 %v703_v2  ;;  %v710_v7 = vld [vmem:[%s928_s1 + $0xf0] sm:$0xff]  ;;  %v709_v11 = vld [vmem:[%s928_s1 + $0xe8] sm:$0xff] }
   0x5   :  { %433 = vmatpush.bf16.msra.mxu3 %v711_v3  ;;  %v684_v12 = vld [vmem:[%s928_s1 + $0x20] sm:$0xff]  ;;  %v683_v16 = vld [vmem:[%s928_s1 + $0x18] sm:$0xff]  ;;  %v682_v20 = vld [vmem:[%s928_s1 + $0x10] sm:$0xff] }
   0x6   :  { %377 = vmatpush.bf16.msra.mxu0 %v686_v4  ;;  %v692_v13 = vld [vmem:[%s928_s1 + $0x60] sm:$0xff]  ;;  %v691_v17 = vld [vmem:[%s928_s1 + $0x58] sm:$0xff]  ;;  %v690_v21 = vld [vmem:[%s928_s1 + $0x50] sm:$0xff] }
   0x7   :  { %396 = vmatpush.bf16.msra.mxu1 %v694_v5  ;;  %v700_v14 = vld [vmem:[%s928_s1 + $0xa0] sm:$0xff]  ;;  %v699_v18 = vld [vmem:[%s928_s1 + $0x98] sm:$0xff]  ;;  %v698_v22 = vld [vmem:[%s928_s1 + $0x90] sm:$0xff] }
   0x8   :  { %415 = vmatpush.bf16.msra.mxu2 %v702_v6  ;;  %v708_v15 = vld [vmem:[%s928_s1 + $0xe0] sm:$0xff]  ;;  %v707_v19 = vld [vmem:[%s928_s1 + $0xd8] sm:$0xff]  ;;  %v706_v23 = vld [vmem:[%s928_s1 + $0xd0] sm:$0xff] }
   0x9   :  { %434 = vmatpush.bf16.msra.mxu3 %v710_v7  ;;  %v681_v24 = vld [vmem:[%s928_s1 + $0x8] sm:$0xff]  ;;  %v680_v28 = vld [vmem:[%s928_s1] sm:$0xff]  ;;  %v672_v33 = vld [vmem:[%s930_s0 + $0x10] sm:$0xf0] }
   0xa   :  { %378 = vmatpush.bf16.msra.mxu0 %v685_v8  ;;  %v689_v25 = vld [vmem:[%s928_s1 + $0x48] sm:$0xff]  ;;  %v688_v29 = vld [vmem:[%s928_s1 + $0x40] sm:$0xff]  ;;  %v488_v35 = vld [vmem:[%s930_s0 + $0x14] sm:$0xf0] }
   0xb   :  { %397 = vmatpush.bf16.msra.mxu1 %v693_v9  ;;  %v697_v26 = vld [vmem:[%s928_s1 + $0x88] sm:$0xff]  ;;  %v696_v30 = vld [vmem:[%s928_s1 + $0x80] sm:$0xff]  ;;  %v673_v37 = vld [vmem:[%s930_s0 + $0x18] sm:$0xf0] }
   0xc   :  { %416 = vmatpush.bf16.msra.mxu2 %v701_v10  ;;  %v705_v27 = vld [vmem:[%s928_s1 + $0xc8] sm:$0xff]  ;;  %v704_v31 = vld [vmem:[%s928_s1 + $0xc0] sm:$0xff]  ;;  %v715_v40 = vld [vmem:[%s928_s1 + $0x118] sm:$0xff] }
   0xd   :  { %435 = vmatpush.bf16.msra.mxu3 %v709_v11  ;;  %v486_v32 = vld [vmem:[%s930_s0] sm:$0xf]  ;;  %v670_v34 = vld [vmem:[%s930_s0 + $0x4] sm:$0xf]  ;;  %v494_v36 = vld [vmem:[%s930_s0 + $0x8] sm:$0xf] }
   0xe   :  { %379 = vmatpush.bf16.msra.mxu0 %v684_v12  ;;  %v671_v38 = vld [vmem:[%s930_s0 + $0xc] sm:$0xf]  ;;  %v496_v39 = vld [vmem:[%s930_s0 + $0x1c] sm:$0xf0]  ;;  %v487_v41 = vor.u32 %v672_v33, %v486_v32  ;;  %v491_v42 = vor.u32 %v670_v34, %v488_v35  ;;  %v495_v43 = vor.u32 %v673_v37, %v494_v36  ;;  %v714_v45 = vld [vmem:[%s928_s1 + $0x110] sm:$0xff] }
   0xf   :  { %398 = vmatpush.bf16.msra.mxu1 %v692_v13  ;;  %v499_v44 = vor.u32 %v671_v38, %v496_v39  ;;  %v713_v46 = vld [vmem:[%s928_s1 + $0x108] sm:$0xff]  ;;  %v712_v47 = vld [vmem:[%s928_s1 + $0x100] sm:$0xff]  ;;  %v677_v49 = vld [vmem:[%s930_s0 + $0x38] sm:$0xf0] }
  0x10   :  { %417 = vmatpush.bf16.msra.mxu2 %v700_v14  ;;  %v506_v48 = vld [vmem:[%s930_s0 + $0x28] sm:$0xf]  ;;  %v675_v50 = vld [vmem:[%s930_s0 + $0x2c] sm:$0xf]  ;;  %v508_v51 = vld [vmem:[%s930_s0 + $0x3c] sm:$0xf0] }
  0x11   :  { %436 = vmatpush.bf16.msra.mxu3 %v708_v15  ;;  %v514_v52 = vld [vmem:[%s930_s0 + $0x30] sm:$0xf]  ;;  %v678_v53 = vld [vmem:[%s930_s0 + $0x40] sm:$0xf0]  ;;  %v676_v54 = vld [vmem:[%s930_s0 + $0x34] sm:$0xf]  ;;  %v507_v56 = vor.u32 %v677_v49, %v506_v48  ;;  %v511_v57 = vor.u32 %v675_v50, %v508_v51 }
  0x12   :  { %380 = vmatpush.bf16.msra.mxu0 %v683_v16  ;;  %v516_v55 = vld [vmem:[%s930_s0 + $0x44] sm:$0xf0]  ;;  %v515_v58 = vor.u32 %v678_v53, %v514_v52  ;;  %v502_v60 = vld [vmem:[%s930_s0 + $0x10] sm:$0xf]  ;;  %v674_v61 = vld [vmem:[%s930_s0 + $0x20] sm:$0xf0] }
  0x13   :  { %399 = vmatpush.bf16.msra.mxu1 %v691_v17  ;;  %v519_v59 = vor.u32 %v676_v54, %v516_v55  ;;  %v522_v62 = vld [vmem:[%s930_s0 + $0x38] sm:$0xf]  ;;  %v679_v63 = vld [vmem:[%s930_s0 + $0x48] sm:$0xf0]  ;;  %v503_v0 = vor.u32 %v674_v61, %v502_v60  ;;  %v720_v11 = vld [vmem:[%s929_s2] ss:$0 sm:$0xff] }
  0x14   :  { %418 = vmatpush.bf16.msra.mxu2 %v699_v18  ;;  %v523_v1 = vor.u32 %v679_v63, %v522_v62 }
  0x15   :  { %437 = vmatpush.bf16.msra.mxu3 %v707_v19 }
  0x16   :  { %381 = vmatpush.bf16.msra.mxu0 %v682_v20 }
  0x17   :  { %400 = vmatpush.bf16.msra.mxu1 %v690_v21 }
  0x18   :  { %419 = vmatpush.bf16.msra.mxu2 %v698_v22 }
  0x19   :  { %438 = vmatpush.bf16.msra.mxu3 %v706_v23 }
  0x1a   :  { %382 = vmatpush.bf16.msra.mxu0 %v681_v24 }
  0x1b   :  { %401 = vmatpush.bf16.msra.mxu1 %v689_v25 }
  0x1c   :  { %420 = vmatpush.bf16.msra.mxu2 %v697_v26 }
  0x1d   :  { %439 = vmatpush.bf16.msra.mxu3 %v705_v27 }
  0x1e   :  { %383 = vmatpush.bf16.msra.mxu0 %v680_v28 }
  0x1f   :  { %402 = vmatpush.bf16.msra.mxu1 %v688_v29 }
  0x20   :  { %421 = vmatpush.bf16.msra.mxu2 %v696_v30 }
  0x21   :  { %440 = vmatpush.bf16.msra.mxu3 %v704_v31  ;;  %384 = vmatmul.bf16.vlgmr.msra.gmra.mxu0 %v487_v41 }
  0x22   :  { %456 = vmatpush.bf16.msrb.mxu0 %v715_v40  ;;  %403 = vmatmul.bf16.vlgmr.msra.gmra.mxu1 %v491_v42 }
  0x23   :  { %716 = vmatpush.bf16.msrb.mxu1 %v715_v40  ;;  %422 = vmatmul.bf16.vlgmr.msra.gmra.mxu2 %v495_v43 }
  0x24   :  { %441 = vmatmul.bf16.vlgmr.msra.gmra.mxu3 %v499_v44 }
  0x26   :  { %457 = vmatpush.bf16.msrb.mxu0 %v714_v45 }
  0x27   :  { %717 = vmatpush.bf16.msrb.mxu1 %v714_v45 }
  0x2a   :  { %458 = vmatpush.bf16.msrb.mxu0 %v713_v46 }
  0x2b   :  { %718 = vmatpush.bf16.msrb.mxu1 %v713_v46 }
  0x2e   :  { %459 = vmatpush.bf16.msrb.mxu0 %v712_v47 }
  0x2f   :  { %719 = vmatpush.bf16.msrb.mxu1 %v712_v47 }
  0x31   :  { %389 = vmatmul.bf16.gmra.mxu0 %v507_v56 }
  0x32   :  { %408 = vmatmul.bf16.gmra.mxu1 %v511_v57 }
  0x33   :  { %427 = vmatmul.bf16.gmra.mxu2 %v515_v58 }
  0x34   :  { %446 = vmatmul.bf16.gmra.mxu3 %v519_v59 }
  0x41   :  { %668 = vmatmul.msk.bf16.vlgmr.msrb.gmra.mxu0 %vm369_vm0, %v503_v0 }
  0x42   :  { %669 = vmatmul.msk.bf16.vlgmr.msrb.gmra.mxu1 %vm369_vm0, %v523_v1 }
  0x9e   :  { %v385_v2 = vpop.f32.mrf.mxu0 }
  0x9f   :  { %v404_v3 = vpop.f32.mrf.mxu1  ;;  %v386_v13 = vadd.f32 %v720_v11, %v385_v2 }
  0xa1   :  { %v405_v18 = vadd.f32 %v404_v3, %v386_v13 }
  0xa6   :  { %v423_v4 = vpop.f32.mrf.mxu2  ;;  %v387_v6 = vpop.f32.mrf.mxu0 }
  0xa7   :  { %v442_v5 = vpop.f32.mrf.mxu3  ;;  %v406_v7 = vpop.f32.mrf.mxu1  ;;  %v424_v20 = vadd.f32 %v423_v4, %v405_v18  ;;  %v388_v23 = vadd.f32 %v720_v11, %v387_v6 }
  0xa9   :  { %v443_v25 = vadd.f32 %v442_v5, %v424_v20  ;;  %v407_v30 = vadd.f32 %v406_v7, %v388_v23 }
  0xae   :  { %v425_v8 = vpop.f32.mrf.mxu2  ;;  %v390_v9 = vpop.f32.mrf.mxu0 }
  0xaf   :  { %v409_v10 = vpop.f32.mrf.mxu1  ;;  %v444_v12 = vpop.f32.mrf.mxu3  ;;  %v391_v14 = vadd.f32 %v720_v11, %v390_v9  ;;  %v426_v34 = vadd.f32 %v425_v8, %v407_v30 }
  0xb1   :  { %v410_v19 = vadd.f32 %v409_v10, %v391_v14  ;;  %v445_v39 = vadd.f32 %v444_v12, %v426_v34 }
  0xb6   :  { %v428_v15 = vpop.f32.mrf.mxu2  ;;  %v392_v16 = vpop.f32.mrf.mxu0 }
  0xb7   :  { %v411_v17 = vpop.f32.mrf.mxu1  ;;  %v429_v21 = vadd.f32 %v428_v15, %v410_v19  ;;  %v447_v22 = vpop.f32.mrf.mxu3  ;;  %v393_v24 = vadd.f32 %v720_v11, %v392_v16 }
  0xb9   :  { %v448_v26 = vadd.f32 %v447_v22, %v429_v21  ;;  %v412_v31 = vadd.f32 %v411_v17, %v393_v24 }
  0xbe   :  { %v430_v27 = vpop.f32.mrf.mxu2  ;;  %v461_v28 = vpop.f32.mrf.mxu0 }
  0xbf   :  { %v466_v29 = vpop.f32.mrf.mxu1  ;;  %v462_v32 = vadd.f32 %v461_v28, %v443_v25  ;;  %v431_v35 = vadd.f32 %v430_v27, %v412_v31  ;;  %v449_v38 = vpop.f32.mrf.mxu3 }
  0xc0   :  { %v467_v33 = vadd.f32 %v466_v29, %v448_v26 }
  0xc1   :  { %v471_v36 = vpack.c.bf16 %v462_v32, %v462_v32  ;;  %v450_v40 = vadd.f32 %v449_v38, %v431_v35 }
  0xc2   :  { %v473_v37 = vpack.c.bf16 %v467_v33, %v467_v33 }
  0xc3   :  { %476 = vst.msk [vmem:[%s931_s3] sm:$0xf] %vm475_vm1, %v471_v36 }
  0xc4   :  { %478 = vst.msk [vmem:[%s931_s3 + $0x8] sm:$0xf] %vm475_vm1, %v473_v37 }
  0xc6   :  { %v463_v41 = vpop.f32.mrf.mxu0 }
  0xc7   :  { %v468_v42 = vpop.f32.mrf.mxu1  ;;  %v464_v43 = vadd.f32 %v463_v41, %v445_v39 }
  0xc8   :  { %v469_v44 = vadd.f32 %v468_v42, %v450_v40 }
  0xc9   :  { %v472_v45 = vpack.c.bf16 %v464_v43, %v464_v43 }
  0xca   :  { %v474_v46 = vpack.c.bf16 %v469_v44, %v469_v44 }
  0xcb   :  { %477 = vst.msk [vmem:[%s931_s3 + $0x4] sm:$0xf] %vm475_vm1, %v472_v45 }
  0xcc   :  { %479 = vst.msk [vmem:[%s931_s3 + $0xc] sm:$0xf] %vm475_vm1, %v474_v46 }

// kernel: ssd_forward.12
= control target key start
LH: loop header
LB: loop body
LE: loop exit
PB: predicated region body
PF: predicated region fallthrough
CT: control target
= control target key end

     0   :  { %vm327_vm0 = vcmask 523264   ;;  %vm398_vm1 = vcmask 519168   ;;  %s729_s1 = inlined_call_operand.vmem [shape: bf16[576,64], index: 1, kind: input, shape index: {}]   ;;  %s730_s2 = inlined_call_operand.vmem [shape: f32[1,64], index: 2, kind: input, shape index: {}]   ;;  %s731_s0 = inlined_call_operand.vmem [shape: bf16[8,576], index: 0, kind: input, shape index: {}]   ;;  %s732_s3 = inlined_call_operand.vmem [shape: bf16[8,64], index: 3, kind: output, shape index: {}]  }
   0x1   :  { %v556_v0 = vld [vmem:[%s729_s1 + $0x38] sm:$0xff]  ;;  %v555_v4 = vld [vmem:[%s729_s1 + $0x30] sm:$0xff]  ;;  %v554_v8 = vld [vmem:[%s729_s1 + $0x28] sm:$0xff] }
   0x2   :  { %v572_v1 = vld [vmem:[%s729_s1 + $0xb8] sm:$0xff]  ;;  %331 = vmatpush.bf16.msra.mxu0 %v556_v0  ;;  %v571_v5 = vld [vmem:[%s729_s1 + $0xb0] sm:$0xff]  ;;  %v570_v9 = vld [vmem:[%s729_s1 + $0xa8] sm:$0xff] }
   0x3   :  { %v580_v2 = vld [vmem:[%s729_s1 + $0xf8] sm:$0xff]  ;;  %357 = vmatpush.bf16.msra.mxu2 %v572_v1  ;;  %v579_v6 = vld [vmem:[%s729_s1 + $0xf0] sm:$0xff]  ;;  %v578_v10 = vld [vmem:[%s729_s1 + $0xe8] sm:$0xff] }
   0x4   :  { %v564_v3 = vld [vmem:[%s729_s1 + $0x78] sm:$0xff]  ;;  %370 = vmatpush.bf16.msra.mxu3 %v580_v2  ;;  %v563_v7 = vld [vmem:[%s729_s1 + $0x70] sm:$0xff]  ;;  %v562_v11 = vld [vmem:[%s729_s1 + $0x68] sm:$0xff] }
   0x5   :  { %344 = vmatpush.bf16.msra.mxu1 %v564_v3  ;;  %v553_v12 = vld [vmem:[%s729_s1 + $0x20] sm:$0xff]  ;;  %v552_v16 = vld [vmem:[%s729_s1 + $0x18] sm:$0xff]  ;;  %v551_v20 = vld [vmem:[%s729_s1 + $0x10] sm:$0xff] }
   0x6   :  { %332 = vmatpush.bf16.msra.mxu0 %v555_v4  ;;  %v569_v13 = vld [vmem:[%s729_s1 + $0xa0] sm:$0xff]  ;;  %v568_v17 = vld [vmem:[%s729_s1 + $0x98] sm:$0xff]  ;;  %v567_v21 = vld [vmem:[%s729_s1 + $0x90] sm:$0xff] }
   0x7   :  { %358 = vmatpush.bf16.msra.mxu2 %v571_v5  ;;  %v577_v14 = vld [vmem:[%s729_s1 + $0xe0] sm:$0xff]  ;;  %v576_v18 = vld [vmem:[%s729_s1 + $0xd8] sm:$0xff]  ;;  %v575_v22 = vld [vmem:[%s729_s1 + $0xd0] sm:$0xff] }
   0x8   :  { %371 = vmatpush.bf16.msra.mxu3 %v579_v6  ;;  %v561_v15 = vld [vmem:[%s729_s1 + $0x60] sm:$0xff]  ;;  %v560_v19 = vld [vmem:[%s729_s1 + $0x58] sm:$0xff]  ;;  %v559_v23 = vld [vmem:[%s729_s1 + $0x50] sm:$0xff] }
   0x9   :  { %345 = vmatpush.bf16.msra.mxu1 %v563_v7  ;;  %v550_v24 = vld [vmem:[%s729_s1 + $0x8] sm:$0xff]  ;;  %v15_v26 = vld [vmem:[%s731_s0] sm:$0xff]  ;;  %v584_v38 = vld [vmem:[%s729_s1 + $0x118] sm:$0xff] }
   0xa   :  { %333 = vmatpush.bf16.msra.mxu0 %v554_v8  ;;  %v566_v25 = vld [vmem:[%s729_s1 + $0x88] sm:$0xff]  ;;  %v97_v30 = vunpack.c.l.b16 %v15_v26  ;;  %v549_v32 = vld [vmem:[%s729_s1] sm:$0xff]  ;;  %v98_v35 = vunpack.c.h.b16 %v15_v26  ;;  %v583_v43 = vld [vmem:[%s729_s1 + $0x110] sm:$0xff] }
   0xb   :  { %359 = vmatpush.bf16.msra.mxu2 %v570_v9  ;;  %v16_v27 = vld [vmem:[%s731_s0 + $0x8] sm:$0xff]  ;;  %v565_v33 = vld [vmem:[%s729_s1 + $0x80] sm:$0xff]  ;;  %v17_v45 = vld [vmem:[%s731_s0 + $0x10] sm:$0xf] }
   0xc   :  { %372 = vmatpush.bf16.msra.mxu3 %v578_v10  ;;  %v574_v28 = vld [vmem:[%s729_s1 + $0xc8] sm:$0xff]  ;;  %v99_v31 = vunpack.c.l.b16 %v16_v27  ;;  %v100_v34 = vunpack.c.h.b16 %v16_v27  ;;  %v573_v36 = vld [vmem:[%s729_s1 + $0xc0] sm:$0xff]  ;;  %v102_v39 = vpack.c.b16 %v97_v30, %v97_v30  ;;  %v103_v42 = vpack.c.b16 %v98_v35, %v98_v35 }
   0xd   :  { %346 = vmatpush.bf16.msra.mxu1 %v562_v11  ;;  %v558_v29 = vld [vmem:[%s729_s1 + $0x48] sm:$0xff]  ;;  %v557_v37 = vld [vmem:[%s729_s1 + $0x40] sm:$0xff]  ;;  %v101_v47 = vunpack.c.l.b16 %v17_v45 }
   0xe   :  { %334 = vmatpush.bf16.msra.mxu0 %v553_v12  ;;  %v104_v40 = vpack.c.b16 %v99_v31, %v99_v31  ;;  %v105_v41 = vpack.c.b16 %v100_v34, %v100_v34  ;;  %v582_v44 = vld [vmem:[%s729_s1 + $0x108] sm:$0xff]  ;;  %v581_v46 = vld [vmem:[%s729_s1 + $0x100] sm:$0xff] }
   0xf   :  { %360 = vmatpush.bf16.msra.mxu2 %v569_v13  ;;  %v106_v48 = vpack.c.b16 %v101_v47, %v101_v47  ;;  %v585_v50 = vld [vmem:[%s730_s2] ss:$0 sm:$0xff] }
  0x10   :  { %373 = vmatpush.bf16.msra.mxu3 %v577_v14 }
  0x11   :  { %347 = vmatpush.bf16.msra.mxu1 %v561_v15 }
  0x12   :  { %335 = vmatpush.bf16.msra.mxu0 %v552_v16 }
  0x13   :  { %361 = vmatpush.bf16.msra.mxu2 %v568_v17 }
  0x14   :  { %374 = vmatpush.bf16.msra.mxu3 %v576_v18 }
  0x15   :  { %348 = vmatpush.bf16.msra.mxu1 %v560_v19 }
  0x16   :  { %336 = vmatpush.bf16.msra.mxu0 %v551_v20 }
  0x17   :  { %362 = vmatpush.bf16.msra.mxu2 %v567_v21 }
  0x18   :  { %375 = vmatpush.bf16.msra.mxu3 %v575_v22 }
  0x19   :  { %349 = vmatpush.bf16.msra.mxu1 %v559_v23 }
  0x1a   :  { %337 = vmatpush.bf16.msra.mxu0 %v550_v24 }
  0x1b   :  { %363 = vmatpush.bf16.msra.mxu2 %v566_v25 }
  0x1c   :  { %376 = vmatpush.bf16.msra.mxu3 %v574_v28 }
  0x1d   :  { %350 = vmatpush.bf16.msra.mxu1 %v558_v29 }
  0x1e   :  { %338 = vmatpush.bf16.msra.mxu0 %v549_v32 }
  0x1f   :  { %364 = vmatpush.bf16.msra.mxu2 %v565_v33 }
  0x20   :  { %377 = vmatpush.bf16.msra.mxu3 %v573_v36 }
  0x21   :  { %351 = vmatpush.bf16.msra.mxu1 %v557_v37  ;;  %339 = vmatmul.bf16.vlgmr.msra.gmra.mxu0 %v102_v39 }
  0x22   :  { %387 = vmatpush.bf16.msrb.mxu0 %v584_v38  ;;  %365 = vmatmul.bf16.vlgmr.msra.gmra.mxu2 %v104_v40 }
  0x23   :  { %378 = vmatmul.bf16.vlgmr.msra.gmra.mxu3 %v105_v41 }
  0x24   :  { %352 = vmatmul.bf16.vlgmr.msra.gmra.mxu1 %v103_v42 }
  0x26   :  { %388 = vmatpush.bf16.msrb.mxu0 %v583_v43 }
  0x2a   :  { %389 = vmatpush.bf16.msrb.mxu0 %v582_v44 }
  0x2e   :  { %390 = vmatpush.bf16.msrb.mxu0 %v581_v46 }
  0x31   :  { %548 = vmatmul.msk.bf16.vlgmr.msrb.gmra.mxu0 %vm327_vm0, %v106_v48 }
  0x9e   :  { %v340_v49 = vpop.f32.mrf.mxu0 }
  0x9f   :  { %v341_v52 = vadd.f32 %v585_v50, %v340_v49 }
  0xa1   :  { %v353_v51 = vpop.f32.mrf.mxu1 }
  0xa2   :  { %v354_v56 = vadd.f32 %v353_v51, %v341_v52 }
  0xa5   :  { %v366_v53 = vpop.f32.mrf.mxu2 }
  0xa6   :  { %v379_v54 = vpop.f32.mrf.mxu3  ;;  %v342_v55 = vpop.f32.mrf.mxu0  ;;  %v367_v58 = vadd.f32 %v366_v53, %v354_v56 }
  0xa8   :  { %v380_v60 = vadd.f32 %v379_v54, %v367_v58 }
  0xa9   :  { %v355_v57 = vpop.f32.mrf.mxu1 }
  0xad   :  { %v368_v59 = vpop.f32.mrf.mxu2 }
  0xae   :  { %v381_v61 = vpop.f32.mrf.mxu3  ;;  %v392_v62 = vpop.f32.mrf.mxu0 }
  0xaf   :  { %v393_v63 = vadd.f32 %v392_v62, %v380_v60 }
  0xb1   :  { %v396_v0 = vmax.f32 %v393_v63, 0.0 }
  0xb3   :  { %v397_v1 = vpack.c.bf16 %v396_v0, %v396_v0 }
  0xb5   :  { %399 = vst.msk [vmem:[%s732_s3] sm:$0xf] %vm398_vm1, %v397_v1 }
  0xb6   :  { %v394_v2 = vpop.f32.mrf.mxu0 }

// kernel: ssd_forward.15
= control target key start
LH: loop header
LB: loop body
LE: loop exit
PB: predicated region body
PF: predicated region fallthrough
CT: control target
= control target key end

     0   :  { %vm327_vm0 = vcmask 523264   ;;  %vm397_vm1 = vcmask 519168   ;;  %s728_s1 = inlined_call_operand.vmem [shape: bf16[576,64], index: 1, kind: input, shape index: {}]   ;;  %s729_s2 = inlined_call_operand.vmem [shape: f32[1,64], index: 2, kind: input, shape index: {}]   ;;  %s730_s0 = inlined_call_operand.vmem [shape: bf16[8,576], index: 0, kind: input, shape index: {}]   ;;  %s731_s3 = inlined_call_operand.vmem [shape: bf16[8,64], index: 3, kind: output, shape index: {}]  }
   0x1   :  { %v555_v0 = vld [vmem:[%s728_s1 + $0x38] sm:$0xff]  ;;  %v554_v4 = vld [vmem:[%s728_s1 + $0x30] sm:$0xff]  ;;  %v553_v8 = vld [vmem:[%s728_s1 + $0x28] sm:$0xff] }
   0x2   :  { %v571_v1 = vld [vmem:[%s728_s1 + $0xb8] sm:$0xff]  ;;  %331 = vmatpush.bf16.msra.mxu0 %v555_v0  ;;  %v570_v5 = vld [vmem:[%s728_s1 + $0xb0] sm:$0xff]  ;;  %v569_v9 = vld [vmem:[%s728_s1 + $0xa8] sm:$0xff] }
   0x3   :  { %v563_v2 = vld [vmem:[%s728_s1 + $0x78] sm:$0xff]  ;;  %357 = vmatpush.bf16.msra.mxu2 %v571_v1  ;;  %v562_v6 = vld [vmem:[%s728_s1 + $0x70] sm:$0xff]  ;;  %v561_v10 = vld [vmem:[%s728_s1 + $0x68] sm:$0xff] }
   0x4   :  { %v579_v3 = vld [vmem:[%s728_s1 + $0xf8] sm:$0xff]  ;;  %344 = vmatpush.bf16.msra.mxu1 %v563_v2  ;;  %v578_v7 = vld [vmem:[%s728_s1 + $0xf0] sm:$0xff]  ;;  %v577_v11 = vld [vmem:[%s728_s1 + $0xe8] sm:$0xff] }
   0x5   :  { %370 = vmatpush.bf16.msra.mxu3 %v579_v3  ;;  %v552_v12 = vld [vmem:[%s728_s1 + $0x20] sm:$0xff]  ;;  %v551_v16 = vld [vmem:[%s728_s1 + $0x18] sm:$0xff]  ;;  %v550_v20 = vld [vmem:[%s728_s1 + $0x10] sm:$0xff] }
   0x6   :  { %332 = vmatpush.bf16.msra.mxu0 %v554_v4  ;;  %v568_v13 = vld [vmem:[%s728_s1 + $0xa0] sm:$0xff]  ;;  %v567_v17 = vld [vmem:[%s728_s1 + $0x98] sm:$0xff]  ;;  %v566_v21 = vld [vmem:[%s728_s1 + $0x90] sm:$0xff] }
   0x7   :  { %358 = vmatpush.bf16.msra.mxu2 %v570_v5  ;;  %v560_v14 = vld [vmem:[%s728_s1 + $0x60] sm:$0xff]  ;;  %v559_v18 = vld [vmem:[%s728_s1 + $0x58] sm:$0xff]  ;;  %v558_v22 = vld [vmem:[%s728_s1 + $0x50] sm:$0xff] }
   0x8   :  { %345 = vmatpush.bf16.msra.mxu1 %v562_v6  ;;  %v576_v15 = vld [vmem:[%s728_s1 + $0xe0] sm:$0xff]  ;;  %v575_v19 = vld [vmem:[%s728_s1 + $0xd8] sm:$0xff]  ;;  %v574_v23 = vld [vmem:[%s728_s1 + $0xd0] sm:$0xff] }
   0x9   :  { %371 = vmatpush.bf16.msra.mxu3 %v578_v7  ;;  %v549_v24 = vld [vmem:[%s728_s1 + $0x8] sm:$0xff]  ;;  %v15_v26 = vld [vmem:[%s730_s0] sm:$0xff]  ;;  %v583_v38 = vld [vmem:[%s728_s1 + $0x118] sm:$0xff] }
   0xa   :  { %333 = vmatpush.bf16.msra.mxu0 %v553_v8  ;;  %v565_v25 = vld [vmem:[%s728_s1 + $0x88] sm:$0xff]  ;;  %v97_v30 = vunpack.c.l.b16 %v15_v26  ;;  %v548_v32 = vld [vmem:[%s728_s1] sm:$0xff]  ;;  %v98_v34 = vunpack.c.h.b16 %v15_v26  ;;  %v582_v43 = vld [vmem:[%s728_s1 + $0x110] sm:$0xff] }
   0xb   :  { %359 = vmatpush.bf16.msra.mxu2 %v569_v9  ;;  %v16_v27 = vld [vmem:[%s730_s0 + $0x8] sm:$0xff]  ;;  %v564_v33 = vld [vmem:[%s728_s1 + $0x80] sm:$0xff]  ;;  %v17_v45 = vld [vmem:[%s730_s0 + $0x10] sm:$0xf] }
   0xc   :  { %346 = vmatpush.bf16.msra.mxu1 %v561_v10  ;;  %v557_v28 = vld [vmem:[%s728_s1 + $0x48] sm:$0xff]  ;;  %v99_v31 = vunpack.c.l.b16 %v16_v27  ;;  %v100_v35 = vunpack.c.h.b16 %v16_v27  ;;  %v556_v36 = vld [vmem:[%s728_s1 + $0x40] sm:$0xff]  ;;  %v102_v39 = vpack.c.b16 %v97_v30, %v97_v30  ;;  %v103_v41 = vpack.c.b16 %v98_v34, %v98_v34 }
   0xd   :  { %372 = vmatpush.bf16.msra.mxu3 %v577_v11  ;;  %v573_v29 = vld [vmem:[%s728_s1 + $0xc8] sm:$0xff]  ;;  %v572_v37 = vld [vmem:[%s728_s1 + $0xc0] sm:$0xff]  ;;  %v101_v47 = vunpack.c.l.b16 %v17_v45 }
   0xe   :  { %334 = vmatpush.bf16.msra.mxu0 %v552_v12  ;;  %v104_v40 = vpack.c.b16 %v99_v31, %v99_v31  ;;  %v105_v42 = vpack.c.b16 %v100_v35, %v100_v35  ;;  %v581_v44 = vld [vmem:[%s728_s1 + $0x108] sm:$0xff]  ;;  %v580_v46 = vld [vmem:[%s728_s1 + $0x100] sm:$0xff] }
   0xf   :  { %360 = vmatpush.bf16.msra.mxu2 %v568_v13  ;;  %v106_v48 = vpack.c.b16 %v101_v47, %v101_v47  ;;  %v584_v50 = vld [vmem:[%s729_s2] ss:$0 sm:$0xff] }
  0x10   :  { %347 = vmatpush.bf16.msra.mxu1 %v560_v14 }
  0x11   :  { %373 = vmatpush.bf16.msra.mxu3 %v576_v15 }
  0x12   :  { %335 = vmatpush.bf16.msra.mxu0 %v551_v16 }
  0x13   :  { %361 = vmatpush.bf16.msra.mxu2 %v567_v17 }
  0x14   :  { %348 = vmatpush.bf16.msra.mxu1 %v559_v18 }
  0x15   :  { %374 = vmatpush.bf16.msra.mxu3 %v575_v19 }
  0x16   :  { %336 = vmatpush.bf16.msra.mxu0 %v550_v20 }
  0x17   :  { %362 = vmatpush.bf16.msra.mxu2 %v566_v21 }
  0x18   :  { %349 = vmatpush.bf16.msra.mxu1 %v558_v22 }
  0x19   :  { %375 = vmatpush.bf16.msra.mxu3 %v574_v23 }
  0x1a   :  { %337 = vmatpush.bf16.msra.mxu0 %v549_v24 }
  0x1b   :  { %363 = vmatpush.bf16.msra.mxu2 %v565_v25 }
  0x1c   :  { %350 = vmatpush.bf16.msra.mxu1 %v557_v28 }
  0x1d   :  { %376 = vmatpush.bf16.msra.mxu3 %v573_v29 }
  0x1e   :  { %338 = vmatpush.bf16.msra.mxu0 %v548_v32 }
  0x1f   :  { %364 = vmatpush.bf16.msra.mxu2 %v564_v33 }
  0x20   :  { %351 = vmatpush.bf16.msra.mxu1 %v556_v36 }
  0x21   :  { %377 = vmatpush.bf16.msra.mxu3 %v572_v37  ;;  %339 = vmatmul.bf16.vlgmr.msra.gmra.mxu0 %v102_v39 }
  0x22   :  { %387 = vmatpush.bf16.msrb.mxu0 %v583_v38  ;;  %365 = vmatmul.bf16.vlgmr.msra.gmra.mxu2 %v104_v40 }
  0x23   :  { %352 = vmatmul.bf16.vlgmr.msra.gmra.mxu1 %v103_v41 }
  0x24   :  { %378 = vmatmul.bf16.vlgmr.msra.gmra.mxu3 %v105_v42 }
  0x26   :  { %388 = vmatpush.bf16.msrb.mxu0 %v582_v43 }
  0x2a   :  { %389 = vmatpush.bf16.msrb.mxu0 %v581_v44 }
  0x2e   :  { %390 = vmatpush.bf16.msrb.mxu0 %v580_v46 }
  0x31   :  { %547 = vmatmul.msk.bf16.vlgmr.msrb.gmra.mxu0 %vm327_vm0, %v106_v48 }
  0x9e   :  { %v340_v49 = vpop.f32.mrf.mxu0 }
  0x9f   :  { %v341_v52 = vadd.f32 %v584_v50, %v340_v49 }
  0xa0   :  { %v353_v51 = vpop.f32.mrf.mxu1 }
  0xa1   :  { %v354_v56 = vadd.f32 %v353_v51, %v341_v52 }
  0xa5   :  { %v366_v53 = vpop.f32.mrf.mxu2 }
  0xa6   :  { %v342_v55 = vpop.f32.mrf.mxu0  ;;  %v367_v58 = vadd.f32 %v366_v53, %v354_v56 }
  0xa7   :  { %v379_v54 = vpop.f32.mrf.mxu3 }
  0xa8   :  { %v355_v57 = vpop.f32.mrf.mxu1  ;;  %v380_v60 = vadd.f32 %v379_v54, %v367_v58 }
  0xad   :  { %v368_v59 = vpop.f32.mrf.mxu2 }
  0xae   :  { %v392_v62 = vpop.f32.mrf.mxu0 }
  0xaf   :  { %v381_v61 = vpop.f32.mrf.mxu3  ;;  %v393_v63 = vadd.f32 %v392_v62, %v380_v60 }
  0xb1   :  { %v396_v0 = vpack.c.bf16 %v393_v63, %v393_v63 }
  0xb3   :  { %398 = vst.msk [vmem:[%s731_s3] sm:$0xf] %vm397_vm1, %v396_v0 }
  0xb6   :  { %v394_v1 = vpop.f32.mrf.mxu0 }

</bundles_post_ra>
